<compile_context>
chip_gen: v5e
topology: v5e:2x2
jax: 0.10.0
libtpu: 0.0.40
codegen_flags: <defaults>
</compile_context>

<pallas_src>
import jax
import jax.numpy as jnp
from jax.experimental import pallas as pl
from jax.experimental.pallas import tpu as pltpu


def _round_up(n, m):
    return ((n + m - 1) // m) * m


def _pad_axis(x, axis, target):
    pad = target - x.shape[axis]
    if pad <= 0:
        return x
    widths = [(0, 0)] * x.ndim
    widths[axis] = (0, pad)
    return jnp.pad(x, widths)


def _pick_chunk(Bp, D, Hp, Dp, T):
    """Chunk length TT (multiple of 8) + vmem_limit from a per-generation-safe
    VMEM budget (fits v7x's 64 MiB physical VMEM as well as v5e/v6e)."""
    bytes_per_t = Bp * (2 * 2 * D          # x chunk, bf16, double-buffered
                        + 2 * 4            # mask chunk, f32, double-buffered
                        + 2 * 4 * Dp       # out chunk, f32, double-buffered
                        + 4 * 4 * Hp       # xproj scratch, f32
                        + 4 * Hp)          # masked-h scratch, f32
    fixed = (2 * 2 * (D * 4 * Hp + Hp * 4 * Hp + Hp * Dp)  # bf16 weights (x2 buf)
             + 2 * 4 * (4 * Hp + Dp)                       # f32 biases   (x2 buf)
             + 2 * 4 * Bp * Hp)                            # h/c state
    budget = 32 << 20                       # conservative across generations
    tt = max(8, min(64, (budget - fixed) // max(bytes_per_t, 1)))
    tt = max(8, (tt // 8) * 8)
    tt = min(tt, _round_up(T, 8))
    vmem_limit = int(min(max(fixed + tt * bytes_per_t + (8 << 20), 16 << 20),
                         56 << 20))
    return int(tt), vmem_limit


# ---------------------------------------------------------------------------
# Fused LSTM kernel: per grid step = one time chunk of TT steps.
# ---------------------------------------------------------------------------
def _lstm_fused_kernel(x_ref, m_ref, wih_ref, b_lstm_ref, whh_ref, wp_ref,
                       b_proj_ref, out_ref, xp_sc, hbuf_sc, h_sc, c_sc):
    """x_ref      : (TT, Bp, D)    bf16  time-major input chunk
       m_ref      : (TT, Bp, 1)    f32   validity mask (prefix; padded rows 0)
       wih_ref    : (D, 4*Hp)      bf16  W_ih^T, gate blocks 128-lane aligned
       b_lstm_ref : (1, 4*Hp)      f32   b_ih + b_hh
       whh_ref    : (Hp, 4*Hp)     bf16  W_hh^T
       wp_ref     : (Hp, Dp)       bf16  W_proj^T
       b_proj_ref : (1, Dp)        f32   projection bias
       out_ref    : (TT, Bp, Dp)   f32   projected output chunk
       xp_sc      : (TT, Bp, 4*Hp) f32   per-chunk input projection
       hbuf_sc    : (TT, Bp, Hp)   f32   per-chunk masked hidden states
       h_sc, c_sc : (Bp, Hp)       f32   recurrent state, persists across chunks
    """
    chunk = pl.program_id(0)
    TT, Bp, D = x_ref.shape
    Hp = h_sc.shape[1]

    @pl.when(chunk == 0)
    def _():
        h_sc[...] = jnp.zeros_like(h_sc)
        c_sc[...] = jnp.zeros_like(c_sc)

    # --- Chunk prologue (fused input projection): one large bf16 MXU matmul.
    x2d = x_ref[...].reshape(TT * Bp, D)
    xproj = jnp.dot(x2d, wih_ref[...], preferred_element_type=jnp.float32)
    xp_sc[...] = (xproj + b_lstm_ref[...]).reshape(TT, Bp, 4 * Hp)

    whh = whh_ref[...]                                     # (Hp, 4Hp) bf16

    # --- Recurrence: one small h @ W_hh^T MXU push per step, gate math in f32.
    def step(tt, carry):
        h, c = carry                                       # (Bp, Hp) f32
        gates = xp_sc[tt] + jnp.dot(h.astype(jnp.bfloat16), whh,
                                    preferred_element_type=jnp.float32)
        i_g = jax.nn.sigmoid(gates[:, 0 * Hp:1 * Hp])      # 128-lane aligned
        f_g = jax.nn.sigmoid(gates[:, 1 * Hp:2 * Hp])
        g_g = jnp.tanh(gates[:, 2 * Hp:3 * Hp])
        o_g = jax.nn.sigmoid(gates[:, 3 * Hp:4 * Hp])
        c = f_g * c + i_g * g_g
        h = o_g * jnp.tanh(c)
        # Packed padding is a suffix: masked h output, no state freeze needed.
        hbuf_sc[tt] = h * m_ref[tt]
        return (h, c)

    h_fin, c_fin = jax.lax.fori_loop(0, TT, step, (h_sc[...], c_sc[...]),
                                     unroll=True)
    h_sc[...] = h_fin
    c_sc[...] = c_fin

    # --- Chunk epilogue (fused output projection): lane-dense store.
    hb = hbuf_sc[...].reshape(TT * Bp, Hp).astype(jnp.bfloat16)
    out = jnp.dot(hb, wp_ref[...], preferred_element_type=jnp.float32)
    out_ref[...] = (out + b_proj_ref[...]).reshape(
        TT, Bp, out_ref.shape[2]).astype(out_ref.dtype)


# ---------------------------------------------------------------------------
# Wrapper
# ---------------------------------------------------------------------------
@jax.jit
def rnn_layers_forward(data, non_pad_mask, params):
    """data: (B, T, d_model), non_pad_mask: (B, T, 1) prefix mask."""
    B, T, D = data.shape
    H = params["w_hh"].shape[1]                            # w_hh: (4H, H)
    Hp = _round_up(H, 128)                                 # lane-aligned gates
    Dp = _round_up(D, 128)                                 # lane-dense output
    Bp = _round_up(B, 16)                                  # full sublane tiles

    TT, vmem_limit = _pick_chunk(Bp, D, Hp, Dp, T)
    T_pad = _round_up(T, TT)

    # ---- weight packing: gate dim padded per-gate so each gate occupies a
    #      128-lane-aligned block; matmul operands cast to bf16.
    wih_g = _pad_axis(params["w_ih"].reshape(4, H, D), 1, Hp)       # (4,Hp,D)
    wih_t = wih_g.reshape(4 * Hp, D).T.astype(jnp.bfloat16)         # (D,4Hp)
    whh_g = _pad_axis(params["w_hh"].reshape(4, H, H), 1, Hp)       # (4,Hp,H)
    whh_t = _pad_axis(whh_g.reshape(4 * Hp, H).T, 0,
                      Hp).astype(jnp.bfloat16)                      # (Hp,4Hp)
    b_lstm = _pad_axis((params["b_ih"] + params["b_hh"]).reshape(4, H),
                       1, Hp).reshape(1, 4 * Hp).astype(jnp.float32)
    wp_t = _pad_axis(_pad_axis(params["w_proj"].T, 0, Hp), 1,
                     Dp).astype(jnp.bfloat16)                       # (Hp,Dp)
    b_proj = _pad_axis(params["b_proj"].reshape(1, D), 1,
                       Dp).astype(jnp.float32)                      # (1,Dp)

    # ---- activations: time-major, batch padded to Bp, time padded to T_pad.
    # TODO(synk): fold these transposes into BlockSpec index_maps (batch-major
    # blocks + in-kernel sublane indexing) to drop two small HBM passes.
    x_tm = jnp.transpose(data, (1, 0, 2)).astype(jnp.bfloat16)
    x_tm = _pad_axis(_pad_axis(x_tm, 0, T_pad), 1, Bp)              # (Tp,Bp,D)
    m_tm = jnp.transpose(non_pad_mask, (1, 0, 2)).astype(jnp.float32)
    m_tm = _pad_axis(_pad_axis(m_tm, 0, T_pad), 1, Bp)              # (Tp,Bp,1)

    out_tm = pl.pallas_call(
        _lstm_fused_kernel,
        out_shape=jax.ShapeDtypeStruct((T_pad, Bp, Dp), jnp.float32),
        grid=(T_pad // TT,),
        in_specs=[
            pl.BlockSpec((TT, Bp, D), lambda c: (c, 0, 0)),         # x chunk
            pl.BlockSpec((TT, Bp, 1), lambda c: (c, 0, 0)),         # mask chunk
            pl.BlockSpec((D, 4 * Hp), lambda c: (0, 0)),            # W_ih^T
            pl.BlockSpec((1, 4 * Hp), lambda c: (0, 0)),            # lstm bias
            pl.BlockSpec((Hp, 4 * Hp), lambda c: (0, 0)),           # W_hh^T
            pl.BlockSpec((Hp, Dp), lambda c: (0, 0)),               # W_proj^T
            pl.BlockSpec((1, Dp), lambda c: (0, 0)),                # proj bias
        ],
        out_specs=pl.BlockSpec((TT, Bp, Dp), lambda c: (c, 0, 0)),
        scratch_shapes=[
            pltpu.VMEM((TT, Bp, 4 * Hp), jnp.float32),              # xproj
            pltpu.VMEM((TT, Bp, Hp), jnp.float32),                  # masked h
            pltpu.VMEM((Bp, Hp), jnp.float32),                      # h state
            pltpu.VMEM((Bp, Hp), jnp.float32),                      # c state
        ],
        compiler_params=pltpu.CompilerParams(
            dimension_semantics=("arbitrary",),                     # recurrence
            vmem_limit_bytes=vmem_limit),
    )(x_tm, m_tm, wih_t, b_lstm, whh_t, wp_t, b_proj)
    # TODO(synk): on v7x (2 TCs) add a leading "parallel" grid axis over batch
    # shards (each with its own h/c scratch slot) to split the serial pass.

    out = jnp.transpose(out_tm, (1, 0, 2))[:B, :T, :D]
    return out.astype(data.dtype)


# ---------------------------------------------------------------------------
# Pure-JAX reference (matches the PyTorch module)
# ---------------------------------------------------------------------------
def rnn_layers_reference(data, non_pad_mask, params):
    B, T, D = data.shape
    H = params["w_hh"].shape[1]
    lengths = jnp.sum(non_pad_mask[:, :, 0], axis=1)

    def step(carry, inp):
        h, c = carry
        x_t, t = inp
        gates = (x_t @ params["w_ih"].T + h @ params["w_hh"].T
                 + params["b_ih"] + params["b_hh"])
        i_g, f_g, g_g, o_g = jnp.split(gates, 4, axis=1)
        i_g = jax.nn.sigmoid(i_g)
        f_g = jax.nn.sigmoid(f_g)
        g_g = jnp.tanh(g_g)
        o_g = jax.nn.sigmoid(o_g)
        c_new = f_g * c + i_g * g_g
        h_new = o_g * jnp.tanh(c_new)
        valid = (lengths > t).astype(data.dtype)[:, None]
        c = jnp.where(valid > 0, c_new, c)
        h = jnp.where(valid > 0, h_new, h)
        return (h, c), h_new * valid

    x_tbd = jnp.transpose(data, (1, 0, 2))
    init = (jnp.zeros((B, H), data.dtype), jnp.zeros((B, H), data.dtype))
    _, hs = jax.lax.scan(step, init, (x_tbd, jnp.arange(T)))
    out = hs @ params["w_proj"].T + params["b_proj"]
    return jnp.transpose(out, (1, 0, 2))


def init_params(key, d_model, d_rnn):
    ks = jax.random.split(key, 6)
    bound = 1.0 / jnp.sqrt(d_rnn)
    u = lambda k, shape: jax.random.uniform(k, shape, jnp.float32, -bound, bound)
    return {
        "w_ih": u(ks[0], (4 * d_rnn, d_model)),
        "w_hh": u(ks[1], (4 * d_rnn, d_rnn)),
        "b_ih": u(ks[2], (4 * d_rnn,)),
        "b_hh": u(ks[3], (4 * d_rnn,)),
        "w_proj": u(ks[4], (d_model, d_rnn)),
        "b_proj": u(ks[5], (d_model,)),
    }


if __name__ == "__main__":
    B, T, d_model, d_rnn = 2, 8, 32, 32
    key = jax.random.PRNGKey(0)
    k_params, k_data = jax.random.split(key)

    params = init_params(k_params, d_model, d_rnn)
    data = jax.random.normal(k_data, (B, T, d_model), jnp.float32)

    # lengths = [8, 5]; at least one full-length sequence so max(lengths) == T
    lengths = jnp.array([T, 5], dtype=jnp.int32)
    non_pad_mask = (jnp.arange(T)[None, :] < lengths[:, None]).astype(
        jnp.float32)[:, :, None]                          # (B, T, 1)

    out = rnn_layers_forward(data, non_pad_mask, params)
    out = jax.block_until_ready(out)

    ref = rnn_layers_reference(data, non_pad_mask, params)
    assert out.shape == (B, T, d_model)
    err = float(jnp.max(jnp.abs(out - ref)))
    # bf16 matmul operands with f32 accumulation -> slightly looser tolerance.
    assert jnp.allclose(out, ref, rtol=5e-2, atol=5e-2), err

    print("KERNEL_OK")
</pallas_src>

<mosaic_0001>
module attributes {stable_mosaic.version = 11 : i64} {
  func.func @_lstm_fused_kernel(%arg0: i32, %arg1: memref<8x16x32xbf16, #tpu.memory_space<vmem>>, %arg2: memref<8x16x1xf32, #tpu.memory_space<vmem>>, %arg3: memref<32x512xbf16, #tpu.memory_space<vmem>>, %arg4: memref<1x512xf32, #tpu.memory_space<vmem>>, %arg5: memref<128x512xbf16, #tpu.memory_space<vmem>>, %arg6: memref<128x128xbf16, #tpu.memory_space<vmem>>, %arg7: memref<1x128xf32, #tpu.memory_space<vmem>>, %arg8: memref<8x16x128xf32, #tpu.memory_space<vmem>>, %arg9: memref<8x16x512xf32, #tpu.memory_space<vmem>>, %arg10: memref<8x16x128xf32, #tpu.memory_space<vmem>>, %arg11: memref<16x128xf32, #tpu.memory_space<vmem>>, %arg12: memref<16x128xf32, #tpu.memory_space<vmem>>) attributes {dimension_semantics = [#tpu.dimension_semantics<arbitrary>], iteration_bounds = array<i64: 1>, scalar_prefetch = 0 : i64, scratch_operands = 4 : i64, tpu.core_type = #tpu.core_type<tc>, window_params = [{transform_indices = @transform_0, window_bounds = array<i64: 8, 16, 32>}, {transform_indices = @transform_1, window_bounds = array<i64: 8, 16, 1>}, {pipeline_mode = #tpu.pipeline_mode<synchronous>, transform_indices = @transform_2, window_bounds = array<i64: 32, 512>}, {pipeline_mode = #tpu.pipeline_mode<synchronous>, transform_indices = @transform_3, window_bounds = array<i64: 1, 512>}, {pipeline_mode = #tpu.pipeline_mode<synchronous>, transform_indices = @transform_4, window_bounds = array<i64: 128, 512>}, {pipeline_mode = #tpu.pipeline_mode<synchronous>, transform_indices = @transform_5, window_bounds = array<i64: 128, 128>}, {pipeline_mode = #tpu.pipeline_mode<synchronous>, transform_indices = @transform_6, window_bounds = array<i64: 1, 128>}, {transform_indices = @transform_7, window_bounds = array<i64: 8, 16, 128>}]} {
    %c0_i32 = arith.constant 0 : i32
    %0 = arith.cmpi eq, %arg0, %c0_i32 : i32
    %1 = arith.extui %0 : i1 to i32
    %c0_i32_0 = arith.constant 0 : i32
    %2 = arith.cmpi ne, %1, %c0_i32_0 : i32
    scf.if %2 {
      %cst_112 = arith.constant 0.000000e+00 : f32
      %347 = vector.broadcast %cst_112 : f32 to vector<16x128xf32>
      %c0_113 = arith.constant 0 : index
      %c0_114 = arith.constant 0 : index
      %348 = vector.load %arg11[%c0_113, %c0_114] : memref<16x128xf32, #tpu.memory_space<vmem>>, vector<16x128xf32>
      tpu.vector_store %arg11[%c0_113, %c0_114], %347 {strides = array<i32>} : memref<16x128xf32, #tpu.memory_space<vmem>>, vector<16x128xf32>,
      %cst_115 = arith.constant 0.000000e+00 : f32
      %349 = vector.broadcast %cst_115 : f32 to vector<16x128xf32>
      %c0_116 = arith.constant 0 : index
      %c0_117 = arith.constant 0 : index
      %350 = vector.load %arg12[%c0_116, %c0_117] : memref<16x128xf32, #tpu.memory_space<vmem>>, vector<16x128xf32>
      tpu.vector_store %arg12[%c0_116, %c0_117], %349 {strides = array<i32>} : memref<16x128xf32, #tpu.memory_space<vmem>>, vector<16x128xf32>,
    } else {
    }
    %c0 = arith.constant 0 : index
    %c0_1 = arith.constant 0 : index
    %c0_2 = arith.constant 0 : index
    %3 = vector.load %arg1[%c0, %c0_1, %c0_2] : memref<8x16x32xbf16, #tpu.memory_space<vmem>>, vector<8x16x32xbf16>
    %4 = vector.shape_cast %3 : vector<8x16x32xbf16> to vector<128x32xbf16>
    %c0_3 = arith.constant 0 : index
    %c0_4 = arith.constant 0 : index
    %5 = vector.load %arg3[%c0_3, %c0_4] : memref<32x512xbf16, #tpu.memory_space<vmem>>, vector<32x512xbf16>
    %cst = arith.constant dense<0.000000e+00> : vector<128x512xf32>
    %6 = tpu.matmul %4, %5, %cst {dimension_numbers = #tpu.dot_dimension_numbers<[1], [0], [0], [1], [0, 0, 1, 1], [], []>} : vector<128x32xbf16>, vector<32x512xbf16>, vector<128x512xf32> -> vector<128x512xf32>
    %c0_5 = arith.constant 0 : index
    %c0_6 = arith.constant 0 : index
    %7 = vector.load %arg4[%c0_5, %c0_6] : memref<1x512xf32, #tpu.memory_space<vmem>>, vector<1x512xf32>
    %8 = vector.broadcast %7 : vector<1x512xf32> to vector<128x512xf32>
    %9 = arith.addf %6, %8 : vector<128x512xf32>
    %10 = vector.shape_cast %9 : vector<128x512xf32> to vector<8x16x512xf32>
    %c0_7 = arith.constant 0 : index
    %c0_8 = arith.constant 0 : index
    %c0_9 = arith.constant 0 : index
    %11 = vector.load %arg9[%c0_7, %c0_8, %c0_9] : memref<8x16x512xf32, #tpu.memory_space<vmem>>, vector<8x16x512xf32>
    tpu.vector_store %arg9[%c0_7, %c0_8, %c0_9], %10 {strides = array<i32>} : memref<8x16x512xf32, #tpu.memory_space<vmem>>, vector<8x16x512xf32>,
    %c0_10 = arith.constant 0 : index
    %c0_11 = arith.constant 0 : index
    %12 = vector.load %arg5[%c0_10, %c0_11] : memref<128x512xbf16, #tpu.memory_space<vmem>>, vector<128x512xbf16>
    %c0_12 = arith.constant 0 : index
    %c0_13 = arith.constant 0 : index
    %13 = vector.load %arg11[%c0_12, %c0_13] : memref<16x128xf32, #tpu.memory_space<vmem>>, vector<16x128xf32>
    %c0_14 = arith.constant 0 : index
    %c0_15 = arith.constant 0 : index
    %14 = vector.load %arg12[%c0_14, %c0_15] : memref<16x128xf32, #tpu.memory_space<vmem>>, vector<16x128xf32>
    %c0_i32_16 = arith.constant 0 : i32
    %15 = arith.index_cast %c0_i32_16 : i32 to index
    %c0_17 = arith.constant 0 : index
    %c0_18 = arith.constant 0 : index
    %16 = vector.load %arg9[%15, %c0_17, %c0_18] : memref<8x16x512xf32, #tpu.memory_space<vmem>>, vector<1x16x512xf32>
    %17 = vector.shape_cast %16 : vector<1x16x512xf32> to vector<16x512xf32>
    %18 = arith.truncf %13 : vector<16x128xf32> to vector<16x128xbf16>
    %cst_19 = arith.constant dense<0.000000e+00> : vector<16x512xf32>
    %19 = tpu.matmul %18, %12, %cst_19 {dimension_numbers = #tpu.dot_dimension_numbers<[1], [0], [0], [1], [0, 0, 1, 1], [], []>} : vector<16x128xbf16>, vector<128x512xbf16>, vector<16x512xf32> -> vector<16x512xf32>
    %20 = arith.addf %17, %19 : vector<16x512xf32>
    %21 = vector.extract_strided_slice %20 {offsets = [0, 0], sizes = [16, 128], strides = [1, 1]} : vector<16x512xf32> to vector<16x128xf32>
    %22 = arith.negf %21 : vector<16x128xf32>
    %23 = math.exp %22 : vector<16x128xf32>
    %cst_20 = arith.constant 1.000000e+00 : f32
    %24 = vector.broadcast %cst_20 : f32 to vector<16x128xf32>
    %25 = arith.addf %24, %23 : vector<16x128xf32>
    %26 = arith.divf %24, %25 : vector<16x128xf32>
    %27 = vector.extract_strided_slice %20 {offsets = [0, 128], sizes = [16, 128], strides = [1, 1]} : vector<16x512xf32> to vector<16x128xf32>
    %28 = arith.negf %27 : vector<16x128xf32>
    %29 = math.exp %28 : vector<16x128xf32>
    %cst_21 = arith.constant 1.000000e+00 : f32
    %30 = vector.broadcast %cst_21 : f32 to vector<16x128xf32>
    %31 = arith.addf %30, %29 : vector<16x128xf32>
    %32 = arith.divf %30, %31 : vector<16x128xf32>
    %33 = vector.extract_strided_slice %20 {offsets = [0, 256], sizes = [16, 128], strides = [1, 1]} : vector<16x512xf32> to vector<16x128xf32>
    %34 = math.tanh %33 : vector<16x128xf32>
    %35 = vector.extract_strided_slice %20 {offsets = [0, 384], sizes = [16, 128], strides = [1, 1]} : vector<16x512xf32> to vector<16x128xf32>
    %36 = arith.negf %35 : vector<16x128xf32>
    %37 = math.exp %36 : vector<16x128xf32>
    %cst_22 = arith.constant 1.000000e+00 : f32
    %38 = vector.broadcast %cst_22 : f32 to vector<16x128xf32>
    %39 = arith.addf %38, %37 : vector<16x128xf32>
    %40 = arith.divf %38, %39 : vector<16x128xf32>
    %41 = arith.mulf %32, %14 : vector<16x128xf32>
    %42 = arith.mulf %26, %34 : vector<16x128xf32>
    %43 = arith.addf %41, %42 : vector<16x128xf32>
    %44 = math.tanh %43 : vector<16x128xf32>
    %45 = arith.mulf %40, %44 : vector<16x128xf32>
    %46 = arith.index_cast %c0_i32_16 : i32 to index
    %c0_23 = arith.constant 0 : index
    %c0_24 = arith.constant 0 : index
    %47 = vector.load %arg2[%46, %c0_23, %c0_24] : memref<8x16x1xf32, #tpu.memory_space<vmem>>, vector<1x16x1xf32>
    %48 = vector.shape_cast %47 : vector<1x16x1xf32> to vector<16x1xf32>
    %49 = vector.broadcast %48 : vector<16x1xf32> to vector<16x128xf32>
    %50 = arith.mulf %45, %49 : vector<16x128xf32>
    %51 = arith.index_cast %c0_i32_16 : i32 to index
    %c0_25 = arith.constant 0 : index
    %c0_26 = arith.constant 0 : index
    %52 = vector.load %arg10[%51, %c0_25, %c0_26] : memref<8x16x128xf32, #tpu.memory_space<vmem>>, vector<1x16x128xf32>
    %53 = vector.shape_cast %52 : vector<1x16x128xf32> to vector<16x128xf32>
    %54 = vector.shape_cast %50 : vector<16x128xf32> to vector<1x16x128xf32>
    tpu.vector_store %arg10[%51, %c0_25, %c0_26], %54 {strides = array<i32>} : memref<8x16x128xf32, #tpu.memory_space<vmem>>, vector<1x16x128xf32>,
    %c1_i32 = arith.constant 1 : i32
    %55 = arith.index_cast %c1_i32 : i32 to index
    %c0_27 = arith.constant 0 : index
    %c0_28 = arith.constant 0 : index
    %56 = vector.load %arg9[%55, %c0_27, %c0_28] : memref<8x16x512xf32, #tpu.memory_space<vmem>>, vector<1x16x512xf32>
    %57 = vector.shape_cast %56 : vector<1x16x512xf32> to vector<16x512xf32>
    %58 = arith.truncf %45 : vector<16x128xf32> to vector<16x128xbf16>
    %cst_29 = arith.constant dense<0.000000e+00> : vector<16x512xf32>
    %59 = tpu.matmul %58, %12, %cst_29 {dimension_numbers = #tpu.dot_dimension_numbers<[1], [0], [0], [1], [0, 0, 1, 1], [], []>} : vector<16x128xbf16>, vector<128x512xbf16>, vector<16x512xf32> -> vector<16x512xf32>
    %60 = arith.addf %57, %59 : vector<16x512xf32>
    %61 = vector.extract_strided_slice %60 {offsets = [0, 0], sizes = [16, 128], strides = [1, 1]} : vector<16x512xf32> to vector<16x128xf32>
    %62 = arith.negf %61 : vector<16x128xf32>
    %63 = math.exp %62 : vector<16x128xf32>
    %cst_30 = arith.constant 1.000000e+00 : f32
    %64 = vector.broadcast %cst_30 : f32 to vector<16x128xf32>
    %65 = arith.addf %64, %63 : vector<16x128xf32>
    %66 = arith.divf %64, %65 : vector<16x128xf32>
    %67 = vector.extract_strided_slice %60 {offsets = [0, 128], sizes = [16, 128], strides = [1, 1]} : vector<16x512xf32> to vector<16x128xf32>
    %68 = arith.negf %67 : vector<16x128xf32>
    %69 = math.exp %68 : vector<16x128xf32>
    %cst_31 = arith.constant 1.000000e+00 : f32
    %70 = vector.broadcast %cst_31 : f32 to vector<16x128xf32>
    %71 = arith.addf %70, %69 : vector<16x128xf32>
    %72 = arith.divf %70, %71 : vector<16x128xf32>
    %73 = vector.extract_strided_slice %60 {offsets = [0, 256], sizes = [16, 128], strides = [1, 1]} : vector<16x512xf32> to vector<16x128xf32>
    %74 = math.tanh %73 : vector<16x128xf32>
    %75 = vector.extract_strided_slice %60 {offsets = [0, 384], sizes = [16, 128], strides = [1, 1]} : vector<16x512xf32> to vector<16x128xf32>
    %76 = arith.negf %75 : vector<16x128xf32>
    %77 = math.exp %76 : vector<16x128xf32>
    %cst_32 = arith.constant 1.000000e+00 : f32
    %78 = vector.broadcast %cst_32 : f32 to vector<16x128xf32>
    %79 = arith.addf %78, %77 : vector<16x128xf32>
    %80 = arith.divf %78, %79 : vector<16x128xf32>
    %81 = arith.mulf %72, %43 : vector<16x128xf32>
    %82 = arith.mulf %66, %74 : vector<16x128xf32>
    %83 = arith.addf %81, %82 : vector<16x128xf32>
    %84 = math.tanh %83 : vector<16x128xf32>
    %85 = arith.mulf %80, %84 : vector<16x128xf32>
    %86 = arith.index_cast %c1_i32 : i32 to index
    %c0_33 = arith.constant 0 : index
    %c0_34 = arith.constant 0 : index
    %87 = vector.load %arg2[%86, %c0_33, %c0_34] : memref<8x16x1xf32, #tpu.memory_space<vmem>>, vector<1x16x1xf32>
    %88 = vector.shape_cast %87 : vector<1x16x1xf32> to vector<16x1xf32>
    %89 = vector.broadcast %88 : vector<16x1xf32> to vector<16x128xf32>
    %90 = arith.mulf %85, %89 : vector<16x128xf32>
    %91 = arith.index_cast %c1_i32 : i32 to index
    %c0_35 = arith.constant 0 : index
    %c0_36 = arith.constant 0 : index
    %92 = vector.load %arg10[%91, %c0_35, %c0_36] : memref<8x16x128xf32, #tpu.memory_space<vmem>>, vector<1x16x128xf32>
    %93 = vector.shape_cast %92 : vector<1x16x128xf32> to vector<16x128xf32>
    %94 = vector.shape_cast %90 : vector<16x128xf32> to vector<1x16x128xf32>
    tpu.vector_store %arg10[%91, %c0_35, %c0_36], %94 {strides = array<i32>} : memref<8x16x128xf32, #tpu.memory_space<vmem>>, vector<1x16x128xf32>,
    %c2_i32 = arith.constant 2 : i32
    %95 = arith.index_cast %c2_i32 : i32 to index
    %c0_37 = arith.constant 0 : index
    %c0_38 = arith.constant 0 : index
    %96 = vector.load %arg9[%95, %c0_37, %c0_38] : memref<8x16x512xf32, #tpu.memory_space<vmem>>, vector<1x16x512xf32>
    %97 = vector.shape_cast %96 : vector<1x16x512xf32> to vector<16x512xf32>
    %98 = arith.truncf %85 : vector<16x128xf32> to vector<16x128xbf16>
    %cst_39 = arith.constant dense<0.000000e+00> : vector<16x512xf32>
    %99 = tpu.matmul %98, %12, %cst_39 {dimension_numbers = #tpu.dot_dimension_numbers<[1], [0], [0], [1], [0, 0, 1, 1], [], []>} : vector<16x128xbf16>, vector<128x512xbf16>, vector<16x512xf32> -> vector<16x512xf32>
    %100 = arith.addf %97, %99 : vector<16x512xf32>
    %101 = vector.extract_strided_slice %100 {offsets = [0, 0], sizes = [16, 128], strides = [1, 1]} : vector<16x512xf32> to vector<16x128xf32>
    %102 = arith.negf %101 : vector<16x128xf32>
    %103 = math.exp %102 : vector<16x128xf32>
    %cst_40 = arith.constant 1.000000e+00 : f32
    %104 = vector.broadcast %cst_40 : f32 to vector<16x128xf32>
    %105 = arith.addf %104, %103 : vector<16x128xf32>
    %106 = arith.divf %104, %105 : vector<16x128xf32>
    %107 = vector.extract_strided_slice %100 {offsets = [0, 128], sizes = [16, 128], strides = [1, 1]} : vector<16x512xf32> to vector<16x128xf32>
    %108 = arith.negf %107 : vector<16x128xf32>
    %109 = math.exp %108 : vector<16x128xf32>
    %cst_41 = arith.constant 1.000000e+00 : f32
    %110 = vector.broadcast %cst_41 : f32 to vector<16x128xf32>
    %111 = arith.addf %110, %109 : vector<16x128xf32>
    %112 = arith.divf %110, %111 : vector<16x128xf32>
    %113 = vector.extract_strided_slice %100 {offsets = [0, 256], sizes = [16, 128], strides = [1, 1]} : vector<16x512xf32> to vector<16x128xf32>
    %114 = math.tanh %113 : vector<16x128xf32>
    %115 = vector.extract_strided_slice %100 {offsets = [0, 384], sizes = [16, 128], strides = [1, 1]} : vector<16x512xf32> to vector<16x128xf32>
    %116 = arith.negf %115 : vector<16x128xf32>
    %117 = math.exp %116 : vector<16x128xf32>
    %cst_42 = arith.constant 1.000000e+00 : f32
    %118 = vector.broadcast %cst_42 : f32 to vector<16x128xf32>
    %119 = arith.addf %118, %117 : vector<16x128xf32>
    %120 = arith.divf %118, %119 : vector<16x128xf32>
    %121 = arith.mulf %112, %83 : vector<16x128xf32>
    %122 = arith.mulf %106, %114 : vector<16x128xf32>
    %123 = arith.addf %121, %122 : vector<16x128xf32>
    %124 = math.tanh %123 : vector<16x128xf32>
    %125 = arith.mulf %120, %124 : vector<16x128xf32>
    %126 = arith.index_cast %c2_i32 : i32 to index
    %c0_43 = arith.constant 0 : index
    %c0_44 = arith.constant 0 : index
    %127 = vector.load %arg2[%126, %c0_43, %c0_44] : memref<8x16x1xf32, #tpu.memory_space<vmem>>, vector<1x16x1xf32>
    %128 = vector.shape_cast %127 : vector<1x16x1xf32> to vector<16x1xf32>
    %129 = vector.broadcast %128 : vector<16x1xf32> to vector<16x128xf32>
    %130 = arith.mulf %125, %129 : vector<16x128xf32>
    %131 = arith.index_cast %c2_i32 : i32 to index
    %c0_45 = arith.constant 0 : index
    %c0_46 = arith.constant 0 : index
    %132 = vector.load %arg10[%131, %c0_45, %c0_46] : memref<8x16x128xf32, #tpu.memory_space<vmem>>, vector<1x16x128xf32>
    %133 = vector.shape_cast %132 : vector<1x16x128xf32> to vector<16x128xf32>
    %134 = vector.shape_cast %130 : vector<16x128xf32> to vector<1x16x128xf32>
    tpu.vector_store %arg10[%131, %c0_45, %c0_46], %134 {strides = array<i32>} : memref<8x16x128xf32, #tpu.memory_space<vmem>>, vector<1x16x128xf32>,
    %c3_i32 = arith.constant 3 : i32
    %135 = arith.index_cast %c3_i32 : i32 to index
    %c0_47 = arith.constant 0 : index
    %c0_48 = arith.constant 0 : index
    %136 = vector.load %arg9[%135, %c0_47, %c0_48] : memref<8x16x512xf32, #tpu.memory_space<vmem>>, vector<1x16x512xf32>
    %137 = vector.shape_cast %136 : vector<1x16x512xf32> to vector<16x512xf32>
    %138 = arith.truncf %125 : vector<16x128xf32> to vector<16x128xbf16>
    %cst_49 = arith.constant dense<0.000000e+00> : vector<16x512xf32>
    %139 = tpu.matmul %138, %12, %cst_49 {dimension_numbers = #tpu.dot_dimension_numbers<[1], [0], [0], [1], [0, 0, 1, 1], [], []>} : vector<16x128xbf16>, vector<128x512xbf16>, vector<16x512xf32> -> vector<16x512xf32>
    %140 = arith.addf %137, %139 : vector<16x512xf32>
    %141 = vector.extract_strided_slice %140 {offsets = [0, 0], sizes = [16, 128], strides = [1, 1]} : vector<16x512xf32> to vector<16x128xf32>
    %142 = arith.negf %141 : vector<16x128xf32>
    %143 = math.exp %142 : vector<16x128xf32>
    %cst_50 = arith.constant 1.000000e+00 : f32
    %144 = vector.broadcast %cst_50 : f32 to vector<16x128xf32>
    %145 = arith.addf %144, %143 : vector<16x128xf32>
    %146 = arith.divf %144, %145 : vector<16x128xf32>
    %147 = vector.extract_strided_slice %140 {offsets = [0, 128], sizes = [16, 128], strides = [1, 1]} : vector<16x512xf32> to vector<16x128xf32>
    %148 = arith.negf %147 : vector<16x128xf32>
    %149 = math.exp %148 : vector<16x128xf32>
    %cst_51 = arith.constant 1.000000e+00 : f32
    %150 = vector.broadcast %cst_51 : f32 to vector<16x128xf32>
    %151 = arith.addf %150, %149 : vector<16x128xf32>
    %152 = arith.divf %150, %151 : vector<16x128xf32>
    %153 = vector.extract_strided_slice %140 {offsets = [0, 256], sizes = [16, 128], strides = [1, 1]} : vector<16x512xf32> to vector<16x128xf32>
    %154 = math.tanh %153 : vector<16x128xf32>
    %155 = vector.extract_strided_slice %140 {offsets = [0, 384], sizes = [16, 128], strides = [1, 1]} : vector<16x512xf32> to vector<16x128xf32>
    %156 = arith.negf %155 : vector<16x128xf32>
    %157 = math.exp %156 : vector<16x128xf32>
    %cst_52 = arith.constant 1.000000e+00 : f32
    %158 = vector.broadcast %cst_52 : f32 to vector<16x128xf32>
    %159 = arith.addf %158, %157 : vector<16x128xf32>
    %160 = arith.divf %158, %159 : vector<16x128xf32>
    %161 = arith.mulf %152, %123 : vector<16x128xf32>
    %162 = arith.mulf %146, %154 : vector<16x128xf32>
    %163 = arith.addf %161, %162 : vector<16x128xf32>
    %164 = math.tanh %163 : vector<16x128xf32>
    %165 = arith.mulf %160, %164 : vector<16x128xf32>
    %166 = arith.index_cast %c3_i32 : i32 to index
    %c0_53 = arith.constant 0 : index
    %c0_54 = arith.constant 0 : index
    %167 = vector.load %arg2[%166, %c0_53, %c0_54] : memref<8x16x1xf32, #tpu.memory_space<vmem>>, vector<1x16x1xf32>
    %168 = vector.shape_cast %167 : vector<1x16x1xf32> to vector<16x1xf32>
    %169 = vector.broadcast %168 : vector<16x1xf32> to vector<16x128xf32>
    %170 = arith.mulf %165, %169 : vector<16x128xf32>
    %171 = arith.index_cast %c3_i32 : i32 to index
    %c0_55 = arith.constant 0 : index
    %c0_56 = arith.constant 0 : index
    %172 = vector.load %arg10[%171, %c0_55, %c0_56] : memref<8x16x128xf32, #tpu.memory_space<vmem>>, vector<1x16x128xf32>
    %173 = vector.shape_cast %172 : vector<1x16x128xf32> to vector<16x128xf32>
    %174 = vector.shape_cast %170 : vector<16x128xf32> to vector<1x16x128xf32>
    tpu.vector_store %arg10[%171, %c0_55, %c0_56], %174 {strides = array<i32>} : memref<8x16x128xf32, #tpu.memory_space<vmem>>, vector<1x16x128xf32>,
    %c4_i32 = arith.constant 4 : i32
    %175 = arith.index_cast %c4_i32 : i32 to index
    %c0_57 = arith.constant 0 : index
    %c0_58 = arith.constant 0 : index
    %176 = vector.load %arg9[%175, %c0_57, %c0_58] : memref<8x16x512xf32, #tpu.memory_space<vmem>>, vector<1x16x512xf32>
    %177 = vector.shape_cast %176 : vector<1x16x512xf32> to vector<16x512xf32>
    %178 = arith.truncf %165 : vector<16x128xf32> to vector<16x128xbf16>
    %cst_59 = arith.constant dense<0.000000e+00> : vector<16x512xf32>
    %179 = tpu.matmul %178, %12, %cst_59 {dimension_numbers = #tpu.dot_dimension_numbers<[1], [0], [0], [1], [0, 0, 1, 1], [], []>} : vector<16x128xbf16>, vector<128x512xbf16>, vector<16x512xf32> -> vector<16x512xf32>
    %180 = arith.addf %177, %179 : vector<16x512xf32>
    %181 = vector.extract_strided_slice %180 {offsets = [0, 0], sizes = [16, 128], strides = [1, 1]} : vector<16x512xf32> to vector<16x128xf32>
    %182 = arith.negf %181 : vector<16x128xf32>
    %183 = math.exp %182 : vector<16x128xf32>
    %cst_60 = arith.constant 1.000000e+00 : f32
    %184 = vector.broadcast %cst_60 : f32 to vector<16x128xf32>
    %185 = arith.addf %184, %183 : vector<16x128xf32>
    %186 = arith.divf %184, %185 : vector<16x128xf32>
    %187 = vector.extract_strided_slice %180 {offsets = [0, 128], sizes = [16, 128], strides = [1, 1]} : vector<16x512xf32> to vector<16x128xf32>
    %188 = arith.negf %187 : vector<16x128xf32>
    %189 = math.exp %188 : vector<16x128xf32>
    %cst_61 = arith.constant 1.000000e+00 : f32
    %190 = vector.broadcast %cst_61 : f32 to vector<16x128xf32>
    %191 = arith.addf %190, %189 : vector<16x128xf32>
    %192 = arith.divf %190, %191 : vector<16x128xf32>
    %193 = vector.extract_strided_slice %180 {offsets = [0, 256], sizes = [16, 128], strides = [1, 1]} : vector<16x512xf32> to vector<16x128xf32>
    %194 = math.tanh %193 : vector<16x128xf32>
    %195 = vector.extract_strided_slice %180 {offsets = [0, 384], sizes = [16, 128], strides = [1, 1]} : vector<16x512xf32> to vector<16x128xf32>
    %196 = arith.negf %195 : vector<16x128xf32>
    %197 = math.exp %196 : vector<16x128xf32>
    %cst_62 = arith.constant 1.000000e+00 : f32
    %198 = vector.broadcast %cst_62 : f32 to vector<16x128xf32>
    %199 = arith.addf %198, %197 : vector<16x128xf32>
    %200 = arith.divf %198, %199 : vector<16x128xf32>
    %201 = arith.mulf %192, %163 : vector<16x128xf32>
    %202 = arith.mulf %186, %194 : vector<16x128xf32>
    %203 = arith.addf %201, %202 : vector<16x128xf32>
    %204 = math.tanh %203 : vector<16x128xf32>
    %205 = arith.mulf %200, %204 : vector<16x128xf32>
    %206 = arith.index_cast %c4_i32 : i32 to index
    %c0_63 = arith.constant 0 : index
    %c0_64 = arith.constant 0 : index
    %207 = vector.load %arg2[%206, %c0_63, %c0_64] : memref<8x16x1xf32, #tpu.memory_space<vmem>>, vector<1x16x1xf32>
    %208 = vector.shape_cast %207 : vector<1x16x1xf32> to vector<16x1xf32>
    %209 = vector.broadcast %208 : vector<16x1xf32> to vector<16x128xf32>
    %210 = arith.mulf %205, %209 : vector<16x128xf32>
    %211 = arith.index_cast %c4_i32 : i32 to index
    %c0_65 = arith.constant 0 : index
    %c0_66 = arith.constant 0 : index
    %212 = vector.load %arg10[%211, %c0_65, %c0_66] : memref<8x16x128xf32, #tpu.memory_space<vmem>>, vector<1x16x128xf32>
    %213 = vector.shape_cast %212 : vector<1x16x128xf32> to vector<16x128xf32>
    %214 = vector.shape_cast %210 : vector<16x128xf32> to vector<1x16x128xf32>
    tpu.vector_store %arg10[%211, %c0_65, %c0_66], %214 {strides = array<i32>} : memref<8x16x128xf32, #tpu.memory_space<vmem>>, vector<1x16x128xf32>,
    %c5_i32 = arith.constant 5 : i32
    %215 = arith.index_cast %c5_i32 : i32 to index
    %c0_67 = arith.constant 0 : index
    %c0_68 = arith.constant 0 : index
    %216 = vector.load %arg9[%215, %c0_67, %c0_68] : memref<8x16x512xf32, #tpu.memory_space<vmem>>, vector<1x16x512xf32>
    %217 = vector.shape_cast %216 : vector<1x16x512xf32> to vector<16x512xf32>
    %218 = arith.truncf %205 : vector<16x128xf32> to vector<16x128xbf16>
    %cst_69 = arith.constant dense<0.000000e+00> : vector<16x512xf32>
    %219 = tpu.matmul %218, %12, %cst_69 {dimension_numbers = #tpu.dot_dimension_numbers<[1], [0], [0], [1], [0, 0, 1, 1], [], []>} : vector<16x128xbf16>, vector<128x512xbf16>, vector<16x512xf32> -> vector<16x512xf32>
    %220 = arith.addf %217, %219 : vector<16x512xf32>
    %221 = vector.extract_strided_slice %220 {offsets = [0, 0], sizes = [16, 128], strides = [1, 1]} : vector<16x512xf32> to vector<16x128xf32>
    %222 = arith.negf %221 : vector<16x128xf32>
    %223 = math.exp %222 : vector<16x128xf32>
    %cst_70 = arith.constant 1.000000e+00 : f32
    %224 = vector.broadcast %cst_70 : f32 to vector<16x128xf32>
    %225 = arith.addf %224, %223 : vector<16x128xf32>
    %226 = arith.divf %224, %225 : vector<16x128xf32>
    %227 = vector.extract_strided_slice %220 {offsets = [0, 128], sizes = [16, 128], strides = [1, 1]} : vector<16x512xf32> to vector<16x128xf32>
    %228 = arith.negf %227 : vector<16x128xf32>
    %229 = math.exp %228 : vector<16x128xf32>
    %cst_71 = arith.constant 1.000000e+00 : f32
    %230 = vector.broadcast %cst_71 : f32 to vector<16x128xf32>
    %231 = arith.addf %230, %229 : vector<16x128xf32>
    %232 = arith.divf %230, %231 : vector<16x128xf32>
    %233 = vector.extract_strided_slice %220 {offsets = [0, 256], sizes = [16, 128], strides = [1, 1]} : vector<16x512xf32> to vector<16x128xf32>
    %234 = math.tanh %233 : vector<16x128xf32>
    %235 = vector.extract_strided_slice %220 {offsets = [0, 384], sizes = [16, 128], strides = [1, 1]} : vector<16x512xf32> to vector<16x128xf32>
    %236 = arith.negf %235 : vector<16x128xf32>
    %237 = math.exp %236 : vector<16x128xf32>
    %cst_72 = arith.constant 1.000000e+00 : f32
    %238 = vector.broadcast %cst_72 : f32 to vector<16x128xf32>
    %239 = arith.addf %238, %237 : vector<16x128xf32>
    %240 = arith.divf %238, %239 : vector<16x128xf32>
    %241 = arith.mulf %232, %203 : vector<16x128xf32>
    %242 = arith.mulf %226, %234 : vector<16x128xf32>
    %243 = arith.addf %241, %242 : vector<16x128xf32>
    %244 = math.tanh %243 : vector<16x128xf32>
    %245 = arith.mulf %240, %244 : vector<16x128xf32>
    %246 = arith.index_cast %c5_i32 : i32 to index
    %c0_73 = arith.constant 0 : index
    %c0_74 = arith.constant 0 : index
    %247 = vector.load %arg2[%246, %c0_73, %c0_74] : memref<8x16x1xf32, #tpu.memory_space<vmem>>, vector<1x16x1xf32>
    %248 = vector.shape_cast %247 : vector<1x16x1xf32> to vector<16x1xf32>
    %249 = vector.broadcast %248 : vector<16x1xf32> to vector<16x128xf32>
    %250 = arith.mulf %245, %249 : vector<16x128xf32>
    %251 = arith.index_cast %c5_i32 : i32 to index
    %c0_75 = arith.constant 0 : index
    %c0_76 = arith.constant 0 : index
    %252 = vector.load %arg10[%251, %c0_75, %c0_76] : memref<8x16x128xf32, #tpu.memory_space<vmem>>, vector<1x16x128xf32>
    %253 = vector.shape_cast %252 : vector<1x16x128xf32> to vector<16x128xf32>
    %254 = vector.shape_cast %250 : vector<16x128xf32> to vector<1x16x128xf32>
    tpu.vector_store %arg10[%251, %c0_75, %c0_76], %254 {strides = array<i32>} : memref<8x16x128xf32, #tpu.memory_space<vmem>>, vector<1x16x128xf32>,
    %c6_i32 = arith.constant 6 : i32
    %255 = arith.index_cast %c6_i32 : i32 to index
    %c0_77 = arith.constant 0 : index
    %c0_78 = arith.constant 0 : index
    %256 = vector.load %arg9[%255, %c0_77, %c0_78] : memref<8x16x512xf32, #tpu.memory_space<vmem>>, vector<1x16x512xf32>
    %257 = vector.shape_cast %256 : vector<1x16x512xf32> to vector<16x512xf32>
    %258 = arith.truncf %245 : vector<16x128xf32> to vector<16x128xbf16>
    %cst_79 = arith.constant dense<0.000000e+00> : vector<16x512xf32>
    %259 = tpu.matmul %258, %12, %cst_79 {dimension_numbers = #tpu.dot_dimension_numbers<[1], [0], [0], [1], [0, 0, 1, 1], [], []>} : vector<16x128xbf16>, vector<128x512xbf16>, vector<16x512xf32> -> vector<16x512xf32>
    %260 = arith.addf %257, %259 : vector<16x512xf32>
    %261 = vector.extract_strided_slice %260 {offsets = [0, 0], sizes = [16, 128], strides = [1, 1]} : vector<16x512xf32> to vector<16x128xf32>
    %262 = arith.negf %261 : vector<16x128xf32>
    %263 = math.exp %262 : vector<16x128xf32>
    %cst_80 = arith.constant 1.000000e+00 : f32
    %264 = vector.broadcast %cst_80 : f32 to vector<16x128xf32>
    %265 = arith.addf %264, %263 : vector<16x128xf32>
    %266 = arith.divf %264, %265 : vector<16x128xf32>
    %267 = vector.extract_strided_slice %260 {offsets = [0, 128], sizes = [16, 128], strides = [1, 1]} : vector<16x512xf32> to vector<16x128xf32>
    %268 = arith.negf %267 : vector<16x128xf32>
    %269 = math.exp %268 : vector<16x128xf32>
    %cst_81 = arith.constant 1.000000e+00 : f32
    %270 = vector.broadcast %cst_81 : f32 to vector<16x128xf32>
    %271 = arith.addf %270, %269 : vector<16x128xf32>
    %272 = arith.divf %270, %271 : vector<16x128xf32>
    %273 = vector.extract_strided_slice %260 {offsets = [0, 256], sizes = [16, 128], strides = [1, 1]} : vector<16x512xf32> to vector<16x128xf32>
    %274 = math.tanh %273 : vector<16x128xf32>
    %275 = vector.extract_strided_slice %260 {offsets = [0, 384], sizes = [16, 128], strides = [1, 1]} : vector<16x512xf32> to vector<16x128xf32>
    %276 = arith.negf %275 : vector<16x128xf32>
    %277 = math.exp %276 : vector<16x128xf32>
    %cst_82 = arith.constant 1.000000e+00 : f32
    %278 = vector.broadcast %cst_82 : f32 to vector<16x128xf32>
    %279 = arith.addf %278, %277 : vector<16x128xf32>
    %280 = arith.divf %278, %279 : vector<16x128xf32>
    %281 = arith.mulf %272, %243 : vector<16x128xf32>
    %282 = arith.mulf %266, %274 : vector<16x128xf32>
    %283 = arith.addf %281, %282 : vector<16x128xf32>
    %284 = math.tanh %283 : vector<16x128xf32>
    %285 = arith.mulf %280, %284 : vector<16x128xf32>
    %286 = arith.index_cast %c6_i32 : i32 to index
    %c0_83 = arith.constant 0 : index
    %c0_84 = arith.constant 0 : index
    %287 = vector.load %arg2[%286, %c0_83, %c0_84] : memref<8x16x1xf32, #tpu.memory_space<vmem>>, vector<1x16x1xf32>
    %288 = vector.shape_cast %287 : vector<1x16x1xf32> to vector<16x1xf32>
    %289 = vector.broadcast %288 : vector<16x1xf32> to vector<16x128xf32>
    %290 = arith.mulf %285, %289 : vector<16x128xf32>
    %291 = arith.index_cast %c6_i32 : i32 to index
    %c0_85 = arith.constant 0 : index
    %c0_86 = arith.constant 0 : index
    %292 = vector.load %arg10[%291, %c0_85, %c0_86] : memref<8x16x128xf32, #tpu.memory_space<vmem>>, vector<1x16x128xf32>
    %293 = vector.shape_cast %292 : vector<1x16x128xf32> to vector<16x128xf32>
    %294 = vector.shape_cast %290 : vector<16x128xf32> to vector<1x16x128xf32>
    tpu.vector_store %arg10[%291, %c0_85, %c0_86], %294 {strides = array<i32>} : memref<8x16x128xf32, #tpu.memory_space<vmem>>, vector<1x16x128xf32>,
    %c7_i32 = arith.constant 7 : i32
    %295 = arith.index_cast %c7_i32 : i32 to index
    %c0_87 = arith.constant 0 : index
    %c0_88 = arith.constant 0 : index
    %296 = vector.load %arg9[%295, %c0_87, %c0_88] : memref<8x16x512xf32, #tpu.memory_space<vmem>>, vector<1x16x512xf32>
    %297 = vector.shape_cast %296 : vector<1x16x512xf32> to vector<16x512xf32>
    %298 = arith.truncf %285 : vector<16x128xf32> to vector<16x128xbf16>
    %cst_89 = arith.constant dense<0.000000e+00> : vector<16x512xf32>
    %299 = tpu.matmul %298, %12, %cst_89 {dimension_numbers = #tpu.dot_dimension_numbers<[1], [0], [0], [1], [0, 0, 1, 1], [], []>} : vector<16x128xbf16>, vector<128x512xbf16>, vector<16x512xf32> -> vector<16x512xf32>
    %300 = arith.addf %297, %299 : vector<16x512xf32>
    %301 = vector.extract_strided_slice %300 {offsets = [0, 0], sizes = [16, 128], strides = [1, 1]} : vector<16x512xf32> to vector<16x128xf32>
    %302 = arith.negf %301 : vector<16x128xf32>
    %303 = math.exp %302 : vector<16x128xf32>
    %cst_90 = arith.constant 1.000000e+00 : f32
    %304 = vector.broadcast %cst_90 : f32 to vector<16x128xf32>
    %305 = arith.addf %304, %303 : vector<16x128xf32>
    %306 = arith.divf %304, %305 : vector<16x128xf32>
    %307 = vector.extract_strided_slice %300 {offsets = [0, 128], sizes = [16, 128], strides = [1, 1]} : vector<16x512xf32> to vector<16x128xf32>
    %308 = arith.negf %307 : vector<16x128xf32>
    %309 = math.exp %308 : vector<16x128xf32>
    %cst_91 = arith.constant 1.000000e+00 : f32
    %310 = vector.broadcast %cst_91 : f32 to vector<16x128xf32>
    %311 = arith.addf %310, %309 : vector<16x128xf32>
    %312 = arith.divf %310, %311 : vector<16x128xf32>
    %313 = vector.extract_strided_slice %300 {offsets = [0, 256], sizes = [16, 128], strides = [1, 1]} : vector<16x512xf32> to vector<16x128xf32>
    %314 = math.tanh %313 : vector<16x128xf32>
    %315 = vector.extract_strided_slice %300 {offsets = [0, 384], sizes = [16, 128], strides = [1, 1]} : vector<16x512xf32> to vector<16x128xf32>
    %316 = arith.negf %315 : vector<16x128xf32>
    %317 = math.exp %316 : vector<16x128xf32>
    %cst_92 = arith.constant 1.000000e+00 : f32
    %318 = vector.broadcast %cst_92 : f32 to vector<16x128xf32>
    %319 = arith.addf %318, %317 : vector<16x128xf32>
    %320 = arith.divf %318, %319 : vector<16x128xf32>
    %321 = arith.mulf %312, %283 : vector<16x128xf32>
    %322 = arith.mulf %306, %314 : vector<16x128xf32>
    %323 = arith.addf %321, %322 : vector<16x128xf32>
    %324 = math.tanh %323 : vector<16x128xf32>
    %325 = arith.mulf %320, %324 : vector<16x128xf32>
    %326 = arith.index_cast %c7_i32 : i32 to index
    %c0_93 = arith.constant 0 : index
    %c0_94 = arith.constant 0 : index
    %327 = vector.load %arg2[%326, %c0_93, %c0_94] : memref<8x16x1xf32, #tpu.memory_space<vmem>>, vector<1x16x1xf32>
    %328 = vector.shape_cast %327 : vector<1x16x1xf32> to vector<16x1xf32>
    %329 = vector.broadcast %328 : vector<16x1xf32> to vector<16x128xf32>
    %330 = arith.mulf %325, %329 : vector<16x128xf32>
    %331 = arith.index_cast %c7_i32 : i32 to index
    %c0_95 = arith.constant 0 : index
    %c0_96 = arith.constant 0 : index
    %332 = vector.load %arg10[%331, %c0_95, %c0_96] : memref<8x16x128xf32, #tpu.memory_space<vmem>>, vector<1x16x128xf32>
    %333 = vector.shape_cast %332 : vector<1x16x128xf32> to vector<16x128xf32>
    %334 = vector.shape_cast %330 : vector<16x128xf32> to vector<1x16x128xf32>
    tpu.vector_store %arg10[%331, %c0_95, %c0_96], %334 {strides = array<i32>} : memref<8x16x128xf32, #tpu.memory_space<vmem>>, vector<1x16x128xf32>,
    %c8_i32 = arith.constant 8 : i32
    %c0_97 = arith.constant 0 : index
    %c0_98 = arith.constant 0 : index
    %335 = vector.load %arg11[%c0_97, %c0_98] : memref<16x128xf32, #tpu.memory_space<vmem>>, vector<16x128xf32>
    tpu.vector_store %arg11[%c0_97, %c0_98], %325 {strides = array<i32>} : memref<16x128xf32, #tpu.memory_space<vmem>>, vector<16x128xf32>,
    %c0_99 = arith.constant 0 : index
    %c0_100 = arith.constant 0 : index
    %336 = vector.load %arg12[%c0_99, %c0_100] : memref<16x128xf32, #tpu.memory_space<vmem>>, vector<16x128xf32>
    tpu.vector_store %arg12[%c0_99, %c0_100], %323 {strides = array<i32>} : memref<16x128xf32, #tpu.memory_space<vmem>>, vector<16x128xf32>,
    %c0_101 = arith.constant 0 : index
    %c0_102 = arith.constant 0 : index
    %c0_103 = arith.constant 0 : index
    %337 = vector.load %arg10[%c0_101, %c0_102, %c0_103] : memref<8x16x128xf32, #tpu.memory_space<vmem>>, vector<8x16x128xf32>
    %338 = vector.shape_cast %337 : vector<8x16x128xf32> to vector<128x128xf32>
    %339 = arith.truncf %338 : vector<128x128xf32> to vector<128x128xbf16>
    %c0_104 = arith.constant 0 : index
    %c0_105 = arith.constant 0 : index
    %340 = vector.load %arg6[%c0_104, %c0_105] : memref<128x128xbf16, #tpu.memory_space<vmem>>, vector<128x128xbf16>
    %cst_106 = arith.constant dense<0.000000e+00> : vector<128x128xf32>
    %341 = tpu.matmul %339, %340, %cst_106 {dimension_numbers = #tpu.dot_dimension_numbers<[1], [0], [0], [1], [0, 0, 1, 1], [], []>} : vector<128x128xbf16>, vector<128x128xbf16>, vector<128x128xf32> -> vector<128x128xf32>
    %c0_107 = arith.constant 0 : index
    %c0_108 = arith.constant 0 : index
    %342 = vector.load %arg7[%c0_107, %c0_108] : memref<1x128xf32, #tpu.memory_space<vmem>>, vector<1x128xf32>
    %343 = vector.broadcast %342 : vector<1x128xf32> to vector<128x128xf32>
    %344 = arith.addf %341, %343 : vector<128x128xf32>
    %345 = vector.shape_cast %344 : vector<128x128xf32> to vector<8x16x128xf32>
    %c0_109 = arith.constant 0 : index
    %c0_110 = arith.constant 0 : index
    %c0_111 = arith.constant 0 : index
    %346 = vector.load %arg8[%c0_109, %c0_110, %c0_111] : memref<8x16x128xf32, #tpu.memory_space<vmem>>, vector<8x16x128xf32>
    tpu.vector_store %arg8[%c0_109, %c0_110, %c0_111], %345 {strides = array<i32>} : memref<8x16x128xf32, #tpu.memory_space<vmem>>, vector<8x16x128xf32>,
    return
  }
  func.func @transform_0(%arg0: i32) -> (i32, i32, i32) {
    %c0_i32 = arith.constant 0 : i32
    %c0_i32_0 = arith.constant 0 : i32
    %c0_i32_1 = arith.constant 0 : i32
    return %arg0, %c0_i32, %c0_i32_0 : i32, i32, i32
  }
  func.func @transform_1(%arg0: i32) -> (i32, i32, i32) {
    %c0_i32 = arith.constant 0 : i32
    %c0_i32_0 = arith.constant 0 : i32
    %c0_i32_1 = arith.constant 0 : i32
    return %arg0, %c0_i32, %c0_i32_0 : i32, i32, i32
  }
  func.func @transform_2(%arg0: i32) -> (i32, i32) {
    %c0_i32 = arith.constant 0 : i32
    %c0_i32_0 = arith.constant 0 : i32
    %c0_i32_1 = arith.constant 0 : i32
    return %c0_i32, %c0_i32_0 : i32, i32
  }
  func.func @transform_3(%arg0: i32) -> (i32, i32) {
    %c0_i32 = arith.constant 0 : i32
    %c0_i32_0 = arith.constant 0 : i32
    %c0_i32_1 = arith.constant 0 : i32
    return %c0_i32, %c0_i32_0 : i32, i32
  }
  func.func @transform_4(%arg0: i32) -> (i32, i32) {
    %c0_i32 = arith.constant 0 : i32
    %c0_i32_0 = arith.constant 0 : i32
    %c0_i32_1 = arith.constant 0 : i32
    return %c0_i32, %c0_i32_0 : i32, i32
  }
  func.func @transform_5(%arg0: i32) -> (i32, i32) {
    %c0_i32 = arith.constant 0 : i32
    %c0_i32_0 = arith.constant 0 : i32
    %c0_i32_1 = arith.constant 0 : i32
    return %c0_i32, %c0_i32_0 : i32, i32
  }
  func.func @transform_6(%arg0: i32) -> (i32, i32) {
    %c0_i32 = arith.constant 0 : i32
    %c0_i32_0 = arith.constant 0 : i32
    %c0_i32_1 = arith.constant 0 : i32
    return %c0_i32, %c0_i32_0 : i32, i32
  }
  func.func @transform_7(%arg0: i32) -> (i32, i32, i32) {
    %c0_i32 = arith.constant 0 : i32
    %c0_i32_0 = arith.constant 0 : i32
    %c0_i32_1 = arith.constant 0 : i32
    return %arg0, %c0_i32, %c0_i32_0 : i32, i32, i32
  }
}

</mosaic_0001>

<bundles_post_ra>
// kernel: rnn_layers_forward.1
= control target key start
LH: loop header
LB: loop body
LE: loop exit
PB: predicated region body
PF: predicated region fallthrough
CT: control target
= control target key end

     0   :  { %vm149_vm0 = vcmask 261120   ;;  %s4722_s2 = inlined_call_operand.vmem [shape: bf16[32,512], index: 2, kind: input, shape index: {}]   ;;  %s4723_s0 = inlined_call_operand.vmem [shape: bf16[8,16,32], index: 0, kind: input, shape index: {}]   ;;  %s4724_s4 = inlined_call_operand.vmem [shape: bf16[128,512], index: 4, kind: input, shape index: {}]   ;;  %s4725_s1 = inlined_call_operand.vmem [shape: f32[8,16,1], index: 1, kind: input, shape index: {}]   ;;  %s4726_s3 = inlined_call_operand.vmem [shape: f32[1,512], index: 3, kind: input, shape index: {}]   ;;  %s4727_s5 = inlined_call_operand.vmem [shape: bf16[128,128], index: 5, kind: input, shape index: {}]   ;;  %s4728_s6 = inlined_call_operand.vmem [shape: f32[1,128], index: 6, kind: input, shape index: {}]   ;;  %s4729_s7 = inlined_call_operand.vmem [shape: f32[8,16,128], index: 7, kind: output, shape index: {}]  }
   0x1   :  { %v2586_v0 = vld [vmem:[%s4722_s2 + $0x20] sm:$0xf]  ;;  %v2868_v1 = vld [vmem:[%s4722_s2 + $0x2c] sm:$0xf0]  ;;  %v2867_v2 = vld [vmem:[%s4722_s2 + $0x2c] sm:$0xf] }
   0x2   :  { %v2587_v3 = vor.u32 %v2868_v1, %v2586_v0  ;;  %v2596_v4 = vld [vmem:[%s4722_s2 + $0x38] sm:$0xf0]  ;;  %v2570_v5 = vld [vmem:[%s4722_s2] sm:$0xf]  ;;  %v2864_v6 = vld [vmem:[%s4722_s2 + $0xc] sm:$0xf0] }
   0x3   :  { %v2599_v7 = vor.u32 %v2867_v2, %v2596_v4  ;;  %v2863_v8 = vld [vmem:[%s4722_s2 + $0xc] sm:$0xf]  ;;  %v2580_v9 = vld [vmem:[%s4722_s2 + $0x18] sm:$0xf0]  ;;  %v2571_v10 = vor.u32 %v2864_v6, %v2570_v5  ;;  %v2866_v11 = vld [vmem:[%s4722_s2 + $0x24] sm:$0xf] }
   0x4   :  { %2910 = vmatpush.bf16.msra.mxu1 %v2587_v3  ;;  %2911 = vmatpush.bf16.msra.mxu2 %v2587_v3  ;;  %v2588_v12 = vld [vmem:[%s4722_s2 + $0x30] sm:$0xf0]  ;;  %v2583_v13 = vor.u32 %v2863_v8, %v2580_v9  ;;  %v2594_v15 = vld [vmem:[%s4722_s2 + $0x28] sm:$0xf]  ;;  %v2869_v16 = vld [vmem:[%s4722_s2 + $0x34] sm:$0xf0] }
   0x5   :  { %327 = vmatpush.bf16.msra.mxu3 %v2599_v7  ;;  %v2591_v14 = vor.u32 %v2866_v11, %v2588_v12  ;;  %180 = vmatpush.bf16.msra.mxu0 %v2587_v3  ;;  %v3257_v17 = vld [vmem:[%s4723_s0 + $0x10] sm:$0xff]  ;;  %v2595_v18 = vor.u32 %v2869_v16, %v2594_v15  ;;  %v3262_v19 = vld [vmem:[%s4723_s0 + $0x28] sm:$0xff]  ;;  %v2862_v20 = vld [vmem:[%s4722_s2 + $0x4] sm:$0xf] }
   0x6   :  { %v2572_v21 = vld [vmem:[%s4722_s2 + $0x10] sm:$0xf0]  ;;  %v2854_v22 = vld [vmem:[%s4723_s0] sm:$0xff]  ;;  %v2900_v25 = vld [vmem:[%s4724_s4 + $0xec] sm:$0xf0] }
   0x7   :  { %v2575_v23 = vor.u32 %v2862_v20, %v2572_v21  ;;  %v2746_v24 = vld [vmem:[%s4724_s4 + $0xe0] sm:$0xf]  ;;  %v2578_v26 = vld [vmem:[%s4722_s2 + $0x8] sm:$0xf]  ;;  %v2865_v28 = vld [vmem:[%s4722_s2 + $0x14] sm:$0xf0] }
   0x8   :  { %2912 = vmatpush.bf16.msra.mxu1 %v2571_v10  ;;  %2913 = vmatpush.bf16.msra.mxu2 %v2571_v10  ;;  %v3287_v27 = vor.u32 %v2900_v25, %v2746_v24  ;;  %v2579_v29 = vor.u32 %v2865_v28, %v2578_v26  ;;  %v3298_v30 = vld [vmem:[%s4723_s0 + $0x18] sm:$0xff]  ;;  %v3303_v31 = vld [vmem:[%s4723_s0 + $0x30] sm:$0xff]  ;;  %v2855_v32 = vld [vmem:[%s4723_s0 + $0x8] sm:$0xff] }
   0x9   :  { %328 = vmatpush.bf16.msra.mxu3 %v2583_v13  ;;  %181 = vmatpush.bf16.msra.mxu0 %v2571_v10  ;;  %v2898_v33 = vld [vmem:[%s4724_s4 + $0xe4] sm:$0xf]  ;;  %v2748_v34 = vld [vmem:[%s4724_s4 + $0xf0] sm:$0xf0]  ;;  %v2730_v35 = vld [vmem:[%s4724_s4 + $0xc0] sm:$0xf] }
   0xa   :  { %v3322_v36 = vor.u32 %v2898_v33, %v2748_v34  ;;  %v2896_v37 = vld [vmem:[%s4724_s4 + $0xcc] sm:$0xf0]  ;;  %v2754_v38 = vld [vmem:[%s4724_s4 + $0xe8] sm:$0xf]  ;;  %v2901_v39 = vld [vmem:[%s4724_s4 + $0xf4] sm:$0xf0] }
   0xb   :  { %2602 = vmatmul.msk.bf16.vlgmr.msra.gmra.mxu1 %vm149_vm0, %v3257_v17  ;;  %2605 = vmatmul.msk.bf16.vlgmr.msra.gmra.mxu2 %vm149_vm0, %v3262_v19  ;;  %v3334_v40 = vor.u32 %v2896_v37, %v2730_v35  ;;  %v3336_v41 = vor.u32 %v2901_v39, %v2754_v38  ;;  %v3345_v42 = vld [vmem:[%s4723_s0 + $0x20] sm:$0xff]  ;;  %v3350_v43 = vld [vmem:[%s4723_s0 + $0x38] sm:$0xff]  ;;  %v2732_v45 = vld [vmem:[%s4724_s4 + $0xd0] sm:$0xf0] }
   0xc   :  { %229 = vmatpush.bf16.msrb.mxu1 %v2591_v14  ;;  %278 = vmatpush.bf16.msrb.mxu2 %v2595_v18  ;;  %v2894_v44 = vld [vmem:[%s4724_s4 + $0xc4] sm:$0xf]  ;;  %v2714_v46 = vld [vmem:[%s4724_s4 + $0xa0] sm:$0xf]  ;;  %v2892_v48 = vld [vmem:[%s4724_s4 + $0xac] sm:$0xf0] }
   0xd   :  { %2624 = vmatmul.msk.bf16.vlgmr.msra.gmra.mxu3 %vm149_vm0, %v2854_v22  ;;  %2600 = vmatmul.msk.bf16.vlgmr.msra.gmra.mxu0 %vm149_vm0, %v2854_v22  ;;  %v3367_v47 = vor.u32 %v2894_v44, %v2732_v45  ;;  %v2738_v49 = vld [vmem:[%s4724_s4 + $0xc8] sm:$0xf]  ;;  %v2897_v50 = vld [vmem:[%s4724_s4 + $0xd4] sm:$0xf0]  ;;  %v3378_v51 = vor.u32 %v2892_v48, %v2714_v46  ;;  %v2890_v53 = vld [vmem:[%s4724_s4 + $0xa4] sm:$0xf] }
   0xe   :  { %639 = vmatpush.bf16.msrb.mxu3 %v3287_v27  ;;  %855 = vmatpush.bf16.msrb.mxu0 %v3287_v27  ;;  %v3380_v52 = vor.u32 %v2897_v50, %v2738_v49  ;;  %v2716_v54 = vld [vmem:[%s4724_s4 + $0xb0] sm:$0xf0]  ;;  %v2698_v55 = vld [vmem:[%s4724_s4 + $0x80] sm:$0xf]  ;;  %v2888_v57 = vld [vmem:[%s4724_s4 + $0x8c] sm:$0xf0] }
   0xf   :  { %v3399_v56 = vor.u32 %v2890_v53, %v2716_v54  ;;  %v2722_v58 = vld [vmem:[%s4724_s4 + $0xa8] sm:$0xf]  ;;  %v2893_v59 = vld [vmem:[%s4724_s4 + $0xb4] sm:$0xf0]  ;;  %v3410_v60 = vor.u32 %v2888_v57, %v2698_v55  ;;  %v2886_v62 = vld [vmem:[%s4724_s4 + $0x84] sm:$0xf] }
  0x10   :  { %230 = vmatpush.bf16.msrb.mxu1 %v2575_v23  ;;  %279 = vmatpush.bf16.msrb.mxu2 %v2579_v29  ;;  %v3412_v61 = vor.u32 %v2893_v59, %v2722_v58  ;;  %v2700_v63 = vld [vmem:[%s4724_s4 + $0x90] sm:$0xf0]  ;;  %v2682_v0 = vld [vmem:[%s4724_s4 + $0x60] sm:$0xf]  ;;  %v2884_v2 = vld [vmem:[%s4724_s4 + $0x6c] sm:$0xf0] }
  0x11   :  { %v3431_v1 = vor.u32 %v2886_v62, %v2700_v63  ;;  %v2666_v3 = vld [vmem:[%s4724_s4 + $0x40] sm:$0xf]  ;;  %v2880_v4 = vld [vmem:[%s4724_s4 + $0x4c] sm:$0xf0]  ;;  %v3442_v5 = vor.u32 %v2884_v2, %v2682_v0  ;;  %v2706_v6 = vld [vmem:[%s4724_s4 + $0x88] sm:$0xf] }
  0x12   :  { %640 = vmatpush.bf16.msrb.mxu3 %v3334_v40  ;;  %856 = vmatpush.bf16.msrb.mxu0 %v3334_v40  ;;  %v2889_v7 = vld [vmem:[%s4724_s4 + $0x94] sm:$0xf0]  ;;  %v3452_v8 = vor.u32 %v2880_v4, %v2666_v3  ;;  %v2650_v10 = vld [vmem:[%s4724_s4 + $0x20] sm:$0xf]  ;;  %v2876_v11 = vld [vmem:[%s4724_s4 + $0x2c] sm:$0xf0] }
  0x13   :  { %v3454_v9 = vor.u32 %v2889_v7, %v2706_v6  ;;  %v3465_v12 = vor.u32 %v2876_v11, %v2650_v10  ;;  %v2634_v13 = vld [vmem:[%s4724_s4] sm:$0xf]  ;;  %v2872_v14 = vld [vmem:[%s4724_s4 + $0xc] sm:$0xf0]  ;;  %v2899_v16 = vld [vmem:[%s4724_s4 + $0xec] sm:$0xf] }
  0x14   :  { %653 = vmatpush.bf16.msra.mxu1 %v3322_v36  ;;  %667 = vmatpush.bf16.msra.mxu2 %v3336_v41  ;;  %v3476_v15 = vor.u32 %v2872_v14, %v2634_v13  ;;  %v2756_v18 = vld [vmem:[%s4724_s4 + $0xf8] sm:$0xf0]  ;;  %v2882_v21 = vld [vmem:[%s4724_s4 + $0x64] sm:$0xf]  ;;  %v2895_v23 = vld [vmem:[%s4724_s4 + $0xcc] sm:$0xf] }
  0x15   :  { %v3488_v20 = vor.u32 %v2899_v16, %v2756_v18  ;;  %v2740_v24 = vld [vmem:[%s4724_s4 + $0xd8] sm:$0xf0]  ;;  %v2891_v26 = vld [vmem:[%s4724_s4 + $0xac] sm:$0xf]  ;;  %v2690_v35 = vld [vmem:[%s4724_s4 + $0x68] sm:$0xf] }
  0x16   :  { %641 = vmatpush.bf16.msrb.mxu3 %v3378_v51  ;;  %857 = vmatpush.bf16.msrb.mxu0 %v3378_v51  ;;  %v3510_v25 = vor.u32 %v2895_v23, %v2740_v24  ;;  %v2724_v28 = vld [vmem:[%s4724_s4 + $0xb8] sm:$0xf0]  ;;  %v2885_v37 = vld [vmem:[%s4724_s4 + $0x74] sm:$0xf0]  ;;  %v2883_v39 = vld [vmem:[%s4724_s4 + $0x6c] sm:$0xf] }
  0x17   :  { %v3521_v29 = vor.u32 %v2891_v26, %v2724_v28  ;;  %v2708_v33 = vld [vmem:[%s4724_s4 + $0x98] sm:$0xf0]  ;;  %v3541_v38 = vor.u32 %v2885_v37, %v2690_v35  ;;  %v2878_v46 = vld [vmem:[%s4724_s4 + $0x44] sm:$0xf]  ;;  %v2668_v48 = vld [vmem:[%s4724_s4 + $0x50] sm:$0xf0] }
  0x18   :  { %654 = vmatpush.bf16.msra.mxu1 %v3367_v47  ;;  %668 = vmatpush.bf16.msra.mxu2 %v3380_v52  ;;  %v2692_v44 = vld [vmem:[%s4724_s4 + $0x78] sm:$0xf0]  ;;  %v3564_v49 = vor.u32 %v2878_v46, %v2668_v48  ;;  %v2875_v54 = vld [vmem:[%s4724_s4 + $0x2c] sm:$0xf]  ;;  %v2674_v63 = vld [vmem:[%s4724_s4 + $0x48] sm:$0xf] }
  0x19   :  { %v3553_v45 = vor.u32 %v2883_v39, %v2692_v44  ;;  %v2676_v50 = vld [vmem:[%s4724_s4 + $0x58] sm:$0xf0]  ;;  %v2871_v58 = vld [vmem:[%s4724_s4 + $0xc] sm:$0xf]  ;;  %v2881_v0 = vld [vmem:[%s4724_s4 + $0x54] sm:$0xf0] }
  0x1a   :  { %642 = vmatpush.bf16.msrb.mxu3 %v3410_v60  ;;  %858 = vmatpush.bf16.msrb.mxu0 %v3410_v60  ;;  %v2660_v55 = vld [vmem:[%s4724_s4 + $0x38] sm:$0xf0]  ;;  %v3605_v2 = vor.u32 %v2881_v0, %v2674_v63  ;;  %v2874_v3 = vld [vmem:[%s4724_s4 + $0x24] sm:$0xf]  ;;  %v2652_v4 = vld [vmem:[%s4724_s4 + $0x30] sm:$0xf0] }
  0x1b   :  { %2603 = vmatmul.msk.bf16.gmra.mxu1 %vm149_vm0, %v3298_v30  ;;  %2606 = vmatmul.msk.bf16.gmra.mxu2 %vm149_vm0, %v3303_v31  ;;  %v3585_v57 = vor.u32 %v2875_v54, %v2660_v55  ;;  %v2644_v59 = vld [vmem:[%s4724_s4 + $0x18] sm:$0xf0]  ;;  %v3620_v6 = vor.u32 %v2874_v3, %v2652_v4  ;;  %v2877_v10 = vld [vmem:[%s4724_s4 + $0x34] sm:$0xf0]  ;;  %v2870_v13 = vld [vmem:[%s4724_s4 + $0x4] sm:$0xf] }
  0x1c   :  { %655 = vmatpush.bf16.msra.mxu1 %v3399_v56  ;;  %669 = vmatpush.bf16.msra.mxu2 %v3412_v61  ;;  %v3595_v62 = vor.u32 %v2871_v58, %v2644_v59  ;;  %v2636_v14 = vld [vmem:[%s4724_s4 + $0x10] sm:$0xf0]  ;;  %v3176_v16 = vmov 0.0|0.0   ;;  %v2642_v24 = vld [vmem:[%s4724_s4 + $0x8] sm:$0xf] }
  0x1d   :  { %2625 = vmatmul.msk.bf16.gmra.mxu3 %vm149_vm0, %v2855_v32  ;;  %2601 = vmatmul.msk.bf16.gmra.mxu0 %vm149_vm0, %v2855_v32  ;;  %v3644_v18 = vor.u32 %v2870_v13, %v2636_v14  ;;  %v2873_v26 = vld [vmem:[%s4724_s4 + $0x14] sm:$0xf0]  ;;  %v3177_v14 = vmov 0  }
  0x1e   :  { %643 = vmatpush.bf16.msrb.mxu3 %v3442_v5  ;;  %859 = vmatpush.bf16.msrb.mxu0 %v3442_v5 }
  0x1f   :  { %2916 = vset.pattern.permute.xlu0 %v3177_v14  ;;  %2917 = vset.pattern.permute.xlu1 %v3177_v14 }
  0x20   :  { %656 = vmatpush.bf16.msra.mxu1 %v3431_v1  ;;  %670 = vmatpush.bf16.msra.mxu2 %v3454_v9 }
  0x21   :  { %2918 = vset.pattern.permute.xlu2 %v3177_v14 }
  0x22   :  { %644 = vmatpush.bf16.msrb.mxu3 %v3452_v8  ;;  %860 = vmatpush.bf16.msrb.mxu0 %v3452_v8 }
  0x24   :  { %671 = vmatpush.bf16.msra.mxu2 %v3541_v38 }
  0x26   :  { %645 = vmatpush.bf16.msrb.mxu3 %v3465_v12  ;;  %861 = vmatpush.bf16.msrb.mxu0 %v3465_v12 }
  0x28   :  { %672 = vmatpush.bf16.msra.mxu2 %v3605_v2 }
  0x2a   :  { %862 = vmatpush.bf16.msrb.mxu0 %v3476_v15  ;;  %646 = vmatpush.bf16.msrb.mxu3 %v3476_v15 }
  0x2b   :  { %2604 = vmatmul.msk.bf16.gmra.mxu1 %vm149_vm0, %v3345_v42  ;;  %2607 = vmatmul.msk.bf16.gmra.mxu2 %vm149_vm0, %v3350_v43 }
  0x2d   :  { %2626 = vmatmul.msk.bf16.gmra.mxu3 %vm149_vm0, %v3257_v17 }
  0x2e   :  { %1073 = vmatpush.bf16.msra.mxu0 %v3287_v27  ;;  %681 = vmatpush.bf16.msra.mxu3 %v3488_v20 }
  0x32   :  { %1074 = vmatpush.bf16.msra.mxu0 %v3334_v40  ;;  %682 = vmatpush.bf16.msra.mxu3 %v3510_v25 }
  0x36   :  { %1075 = vmatpush.bf16.msra.mxu0 %v3378_v51  ;;  %683 = vmatpush.bf16.msra.mxu3 %v3521_v29 }
  0x3a   :  { %1076 = vmatpush.bf16.msra.mxu0 %v3410_v60 }
  0x3b   :  { %2608 = vmatmul.msk.bf16.vlgmr.msrb.gmra.mxu1 %vm149_vm0, %v2854_v22  ;;  %2616 = vmatmul.msk.bf16.vlgmr.msrb.gmra.mxu2 %vm149_vm0, %v2854_v22  ;;  %v2684_v22 = vld [vmem:[%s4724_s4 + $0x70] sm:$0xf0] }
  0x3d   :  { %2627 = vmatmul.msk.bf16.gmra.mxu3 %vm149_vm0, %v3298_v30 }
  0x3e   :  { %1077 = vmatpush.bf16.msra.mxu0 %v3442_v5 }
  0x42   :  { %1078 = vmatpush.bf16.msra.mxu0 %v3452_v8 }
  0x46   :  { %1079 = vmatpush.bf16.msra.mxu0 %v3465_v12 }
  0x4a   :  { %1080 = vmatpush.bf16.msra.mxu0 %v3476_v15 }
  0x4b   :  { %2609 = vmatmul.msk.bf16.gmra.mxu1 %vm149_vm0, %v2855_v32  ;;  %2617 = vmatmul.msk.bf16.gmra.mxu2 %vm149_vm0, %v2855_v32  ;;  %v2887_v32 = vld [vmem:[%s4724_s4 + $0x8c] sm:$0xf] }
  0x4c   :  { %v3531_v34 = vor.u32 %v2887_v32, %v2708_v33  ;;  %v3668_v32 = vor.u32 %v2873_v26, %v2642_v24 }
  0x4d   :  { %2628 = vmatmul.msk.bf16.gmra.mxu3 %vm149_vm0, %v3345_v42 }
  0x4e   :  { %684 = vmatpush.bf16.msra.mxu3 %v3531_v34 }
  0x52   :  { %685 = vmatpush.bf16.msra.mxu3 %v3553_v45 }
  0x5b   :  { %2610 = vmatmul.msk.bf16.gmra.mxu1 %vm149_vm0, %v3257_v17  ;;  %2618 = vmatmul.msk.bf16.gmra.mxu2 %vm149_vm0, %v3257_v17  ;;  %v3503_v17 = vor.u32 %v2882_v21, %v2684_v22 }
  0x5d   :  { %2629 = vmatmul.msk.bf16.gmra.mxu3 %vm149_vm0, %v3262_v19  ;;  %657 = vmatpush.bf16.msra.mxu1 %v3503_v17 }
  0x61   :  { %658 = vmatpush.bf16.msra.mxu1 %v3564_v49 }
  0x65   :  { %659 = vmatpush.bf16.msra.mxu1 %v3620_v6 }
  0x69   :  { %660 = vmatpush.bf16.msra.mxu1 %v3644_v18 }
  0x6b   :  { %2611 = vmatmul.msk.bf16.gmra.mxu1 %vm149_vm0, %v3298_v30  ;;  %2619 = vmatmul.msk.bf16.gmra.mxu2 %vm149_vm0, %v3298_v30  ;;  %v2879_v30 = vld [vmem:[%s4724_s4 + $0x4c] sm:$0xf] }
  0x6c   :  { %v3575_v53 = vor.u32 %v2879_v30, %v2676_v50 }
  0x6d   :  { %2630 = vmatmul.msk.bf16.gmra.mxu3 %vm149_vm0, %v3303_v31  ;;  %869 = vmatpush.bf16.msrb.mxu1 %v3322_v36 }
  0x6e   :  { %686 = vmatpush.bf16.msra.mxu3 %v3575_v53 }
  0x71   :  { %870 = vmatpush.bf16.msrb.mxu1 %v3367_v47 }
  0x72   :  { %687 = vmatpush.bf16.msra.mxu3 %v3585_v57 }
  0x75   :  { %871 = vmatpush.bf16.msrb.mxu1 %v3399_v56 }
  0x76   :  { %688 = vmatpush.bf16.msra.mxu3 %v3595_v62 }
  0x79   :  { %872 = vmatpush.bf16.msrb.mxu1 %v3431_v1 }
  0x7b   :  { %2612 = vmatmul.msk.bf16.gmra.mxu1 %vm149_vm0, %v3345_v42  ;;  %2620 = vmatmul.msk.bf16.gmra.mxu2 %vm149_vm0, %v3345_v42  ;;  %v2658_v42 = vld [vmem:[%s4724_s4 + $0x28] sm:$0xf] }
  0x7c   :  { %v3631_v11 = vor.u32 %v2877_v10, %v2658_v42 }
  0x7d   :  { %2631 = vmatmul.msk.bf16.gmra.mxu3 %vm149_vm0, %v3350_v43  ;;  %873 = vmatpush.bf16.msrb.mxu1 %v3503_v17 }
  0x7e   :  { %673 = vmatpush.bf16.msra.mxu2 %v3631_v11 }
  0x81   :  { %874 = vmatpush.bf16.msrb.mxu1 %v3564_v49 }
  0x82   :  { %674 = vmatpush.bf16.msra.mxu2 %v3668_v32 }
  0x85   :  { %875 = vmatpush.bf16.msrb.mxu1 %v3620_v6 }
  0x86   :  { %883 = vmatpush.bf16.msrb.mxu2 %v3336_v41 }
  0x88   :  { %v3623_v7 = vpop.f32.mrf.mxu1 }
  0x89   :  { %4754 = vst [vmem:[#allocation6_spill] sm:$0xff] %v3623_v7  ;;  %876 = vmatpush.bf16.msrb.mxu1 %v3644_v18 }
  0x8a   :  { %884 = vmatpush.bf16.msrb.mxu2 %v3380_v52 }
  0x8b   :  { %2613 = vmatmul.msk.bf16.gmra.mxu1 %vm149_vm0, %v3262_v19  ;;  %2621 = vmatmul.msk.bf16.gmra.mxu2 %vm149_vm0, %v3262_v19 }
  0x8d   :  { %647 = vmatmul.bf16.vlgmr.msrb.gmra.mxu3 %v3176_v16 }
  0x8e   :  { %897 = vmatpush.bf16.msrb.mxu3 %v3488_v20  ;;  %v3647_v21 = vpop.f32.mrf.mxu2  ;;  %885 = vmatpush.bf16.msrb.mxu2 %v3412_v61 }
  0x8f   :  { %4755 = vst [vmem:[#allocation7_spill] sm:$0xff] %v3647_v21 }
  0x90   :  { %v3650_v19 = vpop.f32.mrf.mxu3  ;;  %v3653_v22 = vpop.f32.mrf.mxu1 }
  0x91   :  { %4756 = vst [vmem:[#allocation8_spill] sm:$0xff] %v3653_v22 }
  0x92   :  { %898 = vmatpush.bf16.msrb.mxu3 %v3510_v25  ;;  %886 = vmatpush.bf16.msrb.mxu2 %v3454_v9 }
  0x96   :  { %899 = vmatpush.bf16.msrb.mxu3 %v3521_v29  ;;  %v3658_v23 = vpop.f32.mrf.mxu2  ;;  %887 = vmatpush.bf16.msrb.mxu2 %v3541_v38 }
  0x97   :  { %4757 = vst [vmem:[#allocation9_spill] sm:$0xff] %v3658_v23 }
  0x98   :  { %v3666_v28 = vpop.f32.mrf.mxu3  ;;  %v3671_v33 = vpop.f32.mrf.mxu1 }
  0x99   :  { %4758 = vst [vmem:[#allocation10_spill] sm:$0xff] %v3671_v33 }
  0x9a   :  { %900 = vmatpush.bf16.msrb.mxu3 %v3531_v34  ;;  %888 = vmatpush.bf16.msrb.mxu2 %v3605_v2 }
  0x9b   :  { %2614 = vmatmul.msk.bf16.gmra.mxu1 %vm149_vm0, %v3303_v31  ;;  %2622 = vmatmul.msk.bf16.gmra.mxu2 %vm149_vm0, %v3303_v31 }
  0x9d   :  { %689 = vmatmul.bf16.vlgmr.msra.gmra.mxu3 %v3176_v16 }
  0x9e   :  { %901 = vmatpush.bf16.msrb.mxu3 %v3553_v45  ;;  %v3682_v35 = vpop.f32.mrf.mxu2  ;;  %889 = vmatpush.bf16.msrb.mxu2 %v3631_v11 }
  0x9f   :  { %4759 = vst [vmem:[#allocation11_spill] sm:$0xff] %v3682_v35 }
  0xa0   :  { %v3685_v37 = vpop.f32.mrf.mxu3  ;;  %v3687_v39 = vpop.f32.mrf.mxu1 }
  0xa1   :  { %4760 = vst [vmem:[#allocation12_spill] sm:$0xff] %v3685_v37 }
  0xa2   :  { %4761 = vst [vmem:[#allocation13_spill] sm:$0xff] %v3687_v39  ;;  %902 = vmatpush.bf16.msrb.mxu3 %v3575_v53  ;;  %890 = vmatpush.bf16.msrb.mxu2 %v3668_v32 }
  0xa6   :  { %903 = vmatpush.bf16.msrb.mxu3 %v3585_v57  ;;  %v3694_v31 = vpop.f32.mrf.mxu2 }
  0xa7   :  { %4762 = vst [vmem:[#allocation14_spill] sm:$0xff] %v3694_v31 }
  0xa8   :  { %v3697_v44 = vpop.f32.mrf.mxu3  ;;  %v3699_v46 = vpop.f32.mrf.mxu1 }
  0xa9   :  { %4763 = vst [vmem:[#allocation15_spill] sm:$0xff] %v3697_v44 }
  0xaa   :  { %4764 = vst [vmem:[#allocation16_spill] sm:$0xff] %v3699_v46  ;;  %904 = vmatpush.bf16.msrb.mxu3 %v3595_v62 }
  0xab   :  { %2615 = vmatmul.msk.bf16.gmra.mxu1 %vm149_vm0, %v3350_v43  ;;  %2623 = vmatmul.msk.bf16.gmra.mxu2 %vm149_vm0, %v3350_v43 }
  0xae   :  { %1115 = vmatpush.bf16.msra.mxu3 %v3488_v20  ;;  %v3710_v48 = vpop.f32.mrf.mxu2 }
  0xaf   :  { %4765 = vst [vmem:[#allocation17_spill] sm:$0xff] %v3710_v48  ;;  %v830_v48 = vld [vmem:[%s4725_s1 + $0x8] sm:$0xff] }
  0xb0   :  { %v3714_v30 = vpop.f32.mrf.mxu3  ;;  %v3716_v50 = vpop.f32.mrf.mxu1 }
  0xb1   :  { %4766 = vst [vmem:[#allocation18_spill] sm:$0xff] %v3714_v30 }
  0xb2   :  { %1116 = vmatpush.bf16.msra.mxu3 %v3510_v25  ;;  %4767 = vst [vmem:[#allocation19_spill] sm:$0xff] %v3716_v50 }
  0xb6   :  { %1117 = vmatpush.bf16.msra.mxu3 %v3521_v29  ;;  %v3720_v54 = vpop.f32.mrf.mxu2 }
  0xb7   :  { %4768 = vst [vmem:[#allocation20_spill] sm:$0xff] %v3720_v54 }
  0xb8   :  { %v3724_v43 = vpop.f32.mrf.mxu3  ;;  %v3726_v55 = vpop.f32.mrf.mxu1 }
  0xb9   :  { %4769 = vst [vmem:[#allocation21_spill] sm:$0xff] %v3724_v43 }
  0xba   :  { %1118 = vmatpush.bf16.msra.mxu3 %v3531_v34 }
  0xbb   :  { %661 = vmatmul.bf16.vlgmr.msra.gmra.mxu1 %v3176_v16  ;;  %675 = vmatmul.bf16.vlgmr.msra.gmra.mxu2 %v3176_v16  ;;  %v829_v16 = vld [vmem:[%s4725_s1] sm:$0xff] }
  0xbc   :  { %1087 = vmatpush.bf16.msra.mxu1 %v3322_v36  ;;  %1101 = vmatpush.bf16.msra.mxu2 %v3336_v41 }
  0xbd   :  { %833 = vperm.xlu0 %2916, %v829_v16  }
  0xbe   :  { %1119 = vmatpush.bf16.msra.mxu3 %v3553_v45  ;;  %v3731_v58 = vpop.f32.mrf.mxu2 }
  0xc0   :  { %v3734_v59 = vpop.f32.mrf.mxu3  ;;  %v3736_v63 = vpop.f32.mrf.mxu1  ;;  %1088 = vmatpush.bf16.msra.mxu1 %v3367_v47  ;;  %1102 = vmatpush.bf16.msra.mxu2 %v3380_v52 }
  0xc1   :  { %4770 = vst [vmem:[#allocation22_spill] sm:$0xff] %v3734_v59 }
  0xc2   :  { %1120 = vmatpush.bf16.msra.mxu3 %v3575_v53 }
  0xc4   :  { %1089 = vmatpush.bf16.msra.mxu1 %v3399_v56  ;;  %1103 = vmatpush.bf16.msra.mxu2 %v3412_v61 }
  0xc5   :  { %838 = vperm.xlu0 %2916, %v830_v48  }
  0xc6   :  { %1121 = vmatpush.bf16.msra.mxu3 %v3585_v57  ;;  %v3743_v0 = vpop.f32.mrf.mxu2 }
  0xc8   :  { %v3746_v3 = vpop.f32.mrf.mxu3  ;;  %v3748_v4 = vpop.f32.mrf.mxu1  ;;  %1090 = vmatpush.bf16.msra.mxu1 %v3431_v1  ;;  %1104 = vmatpush.bf16.msra.mxu2 %v3454_v9 }
  0xc9   :  { %4771 = vst [vmem:[#allocation23_spill] sm:$0xff] %v3746_v3 }
  0xca   :  { %1122 = vmatpush.bf16.msra.mxu3 %v3595_v62 }
  0xcc   :  { %1091 = vmatpush.bf16.msra.mxu1 %v3503_v17  ;;  %1105 = vmatpush.bf16.msra.mxu2 %v3541_v38 }
  0xce   :  { %v3754_v42 = vpop.f32.mrf.mxu2 }
  0xcf   :  { %4772 = vst [vmem:[#allocation24_spill] sm:$0xff] %v3754_v42 }
  0xd0   :  { %v3756_v10 = vpop.f32.mrf.mxu3  ;;  %v3758_v13 = vpop.f32.mrf.mxu1  ;;  %1092 = vmatpush.bf16.msra.mxu1 %v3564_v49  ;;  %1106 = vmatpush.bf16.msra.mxu2 %v3605_v2 }
  0xd1   :  { %4773 = vst [vmem:[#allocation25_spill] sm:$0xff] %v3756_v10 }
  0xd2   :  { %4774 = vst [vmem:[#allocation26_spill] sm:$0xff] %v3758_v13 }
  0xd4   :  { %1093 = vmatpush.bf16.msra.mxu1 %v3620_v6  ;;  %1107 = vmatpush.bf16.msra.mxu2 %v3631_v11 }
  0xd6   :  { %v3767_v24 = vpop.f32.mrf.mxu2 }
  0xd7   :  { %4775 = vst [vmem:[#allocation27_spill] sm:$0xff] %v3767_v24 }
  0xd8   :  { %v3769_v26 = vpop.f32.mrf.mxu3  ;;  %v3771_v54 = vpop.f32.mrf.mxu1  ;;  %1094 = vmatpush.bf16.msra.mxu1 %v3644_v18  ;;  %1108 = vmatpush.bf16.msra.mxu2 %v3668_v32 }
  0xd9   :  { %4776 = vst [vmem:[#allocation28_spill] sm:$0xff] %v3769_v26 }
  0xda   :  { %4777 = vst [vmem:[#allocation29_spill] sm:$0xff] %v3771_v54 }
  0xde   :  { %v3778_v14 = vpop.f32.mrf.mxu2 }
  0xdf   :  { %4778 = vst [vmem:[#allocation30_spill] sm:$0xff] %v3778_v14 }
  0xe0   :  { %v3780_v16 = vpop.f32.mrf.mxu3  ;;  %v3782_v31 = vpop.f32.mrf.mxu1 }
  0xe1   :  { %4779 = vst [vmem:[#allocation31_spill] sm:$0xff] %v3780_v16 }
  0xe2   :  { %4780 = vst [vmem:[#allocation32_spill] sm:$0xff] %v3782_v31 }
  0xe6   :  { %v3784_v35 = vpop.f32.mrf.mxu2 }
  0xe7   :  { %4781 = vst [vmem:[#allocation33_spill] sm:$0xff] %v3784_v35 }
  0xe8   :  { %v3786_v23 = vpop.f32.mrf.mxu3  ;;  %v3788_v21 = vpop.f32.mrf.mxu1 }
  0xe9   :  { %4782 = vst [vmem:[#allocation34_spill] sm:$0xff] %v3786_v23 }
  0xea   :  { %4783 = vst [vmem:[#allocation35_spill] sm:$0xff] %v3788_v21 }
  0xee   :  { %v3790_v26 = vpop.f32.mrf.mxu2 }
  0xef   :  { %4784 = vst [vmem:[#allocation36_spill] sm:$0xff] %v3790_v26 }
  0xf0   :  { %v3792_v50 = vpop.f32.mrf.mxu3  ;;  %v3794_v10 = vpop.f32.mrf.mxu1 }
  0xf1   :  { %4785 = vst [vmem:[#allocation37_spill] sm:$0xff] %v3792_v50 }
  0xf2   :  { %4786 = vst [vmem:[#allocation38_spill] sm:$0xff] %v3794_v10 }
  0xf6   :  { %v3796_v46 = vpop.f32.mrf.mxu2 }
  0xf7   :  { %4787 = vst [vmem:[#allocation39_spill] sm:$0xff] %v3796_v46 }
  0xf8   :  { %v3798_v48 = vpop.f32.mrf.mxu3  ;;  %v3800_v3 = vpop.f32.mrf.mxu1 }
  0xf9   :  { %4788 = vst [vmem:[#allocation40_spill] sm:$0xff] %v3798_v48 }
  0xfa   :  { %4789 = vst [vmem:[#allocation41_spill] sm:$0xff] %v3800_v3 }
  0xfe   :  { %v3802_v16 = vpop.f32.mrf.mxu2 }
  0xff   :  { %4790 = vst [vmem:[#allocation42_spill] sm:$0xff] %v3802_v16  ;;  %v59_v16 = vld [vmem:[%s4726_s3] sm:$0xf] }
 0x100   :  { %v3804_v39 = vpop.f32.mrf.mxu1  ;;  %v3806_v59 = vpop.f32.mrf.mxu3 }
 0x101   :  { %4791 = vst [vmem:[#allocation43_spill] sm:$0xff] %v3804_v39 }
 0x102   :  { %4792 = vst [vmem:[#allocation44_spill] sm:$0xff] %v3806_v59  ;;  %v183_v59 = vpop.f32.mrf.mxu0 }
 0x106   :  { %v3808_v23 = vpop.f32.mrf.mxu2 }
 0x107   :  { %4793 = vst [vmem:[#allocation45_spill] sm:$0xff] %v3808_v23  ;;  %v3827_v23 = vperm.slane %v59_v16, 0 }
 0x108   :  { %v3810_v21 = vpop.f32.mrf.mxu1  ;;  %v3812_v26 = vpop.f32.mrf.mxu3 }
 0x109   :  { %4794 = vst [vmem:[#allocation46_spill] sm:$0xff] %v3810_v21 }
 0x10a   :  { %4795 = vst [vmem:[#allocation47_spill] sm:$0xff] %v3812_v26  ;;  %v185_v33 = vpop.f32.mrf.mxu0 }
 0x10b   :  { %4801 = vst [vmem:[#allocation53_spill] sm:$0xff] %v3827_v23  ;;  %v186_v14 = vadd.f32 %v185_v33, %v3827_v23 }
 0x10e   :  { %v3814_v50 = vpop.f32.mrf.mxu2 }
 0x10f   :  { %4796 = vst [vmem:[#allocation48_spill] sm:$0xff] %v3814_v50  ;;  %v184_v50 = vadd.f32 %v183_v59, %v3827_v23 }
 0x110   :  { %v3816_v10 = vpop.f32.mrf.mxu1  ;;  %v648_v46 = vpop.f32.mrf.mxu3 }
 0x111   :  { %4797 = vst [vmem:[#allocation49_spill] sm:$0xff] %v3816_v10  ;;  %v695_v10 = vadd.f32 %v648_v46, %v184_v50  ;;  %v3843_v46 = vperm.slane %v59_v16, 1 }
 0x113   :  { %4808 = vst [vmem:[#allocation60_spill] sm:$0xff] %v3843_v46 }
 0x116   :  { %v3818_v48 = vpop.f32.mrf.mxu2 }
 0x117   :  { %4798 = vst [vmem:[#allocation50_spill] sm:$0xff] %v3818_v48 }
 0x118   :  { %v3820_v3 = vpop.f32.mrf.mxu1  ;;  %v650_v21 = vpop.f32.mrf.mxu3 }
 0x119   :  { %4799 = vst [vmem:[#allocation51_spill] sm:$0xff] %v3820_v3  ;;  %v2760_v3 = vmul.f32 -1.442695, %v695_v10  ;;  %v699_v31 = vadd.f32 %v650_v21, %v186_v14  ;;  %v233_v10 = vadd.f32 %v3726_v55, %v3843_v46 }
 0x11b   :  { %2920 = vpow2.f32 %v2760_v3  ;;  %v2761_v30 = vmul.f32 -1.442695, %v699_v31 }
 0x11d   :  { %2922 = vpow2.f32 %v2761_v30  ;;  %v235_v30 = vadd.f32 %v3736_v63, %v3843_v46 }
 0x11e   :  { %v3825_v39 = vpop.f32.mrf.mxu2 }
 0x11f   :  { %4800 = vst [vmem:[#allocation52_spill] sm:$0xff] %v3825_v39  ;;  %v3837_v39 = vperm.slane %v59_v16, 3 }
 0x120   :  { %v3829_v26 = vpop.f32.mrf.mxu1  ;;  %v690_v43 = vpop.f32.mrf.mxu3 }
 0x121   :  { %4802 = vst [vmem:[#allocation54_spill] sm:$0xff] %v3829_v26  ;;  %v2921_v59 = vpop.eup %2920  ;;  %v331_v50 = vadd.f32 %v3650_v19, %v3837_v39  ;;  %v333_v33 = vadd.f32 %v3666_v28, %v3837_v39 }
 0x122   :  { %4805 = vst [vmem:[#allocation57_spill] sm:$0xff] %v3837_v39  ;;  %v3849_v3 = vadd.f32 1.0, %v2921_v59 }
 0x123   :  { %v698_v21 = vadd.f32 %v690_v43, %v331_v50  ;;  %v3863_v50 = vperm.slane %v59_v16, 2 }
 0x124   :  { %2924 = vrcp.f32 %v3849_v3  ;;  %vm716_vm1 = vweird.f32 %v3849_v3 }
 0x125   :  { %4810 = vst [vmem:[#allocation62_spill] sm:$0xff] %v3863_v50 }
 0x126   :  { %v3832_v35 = vpop.f32.mrf.mxu2 }
 0x127   :  { %4803 = vst [vmem:[#allocation55_spill] sm:$0xff] %v3832_v35  ;;  %v2923_v35 = vpop.eup %2922 }
 0x128   :  { %v3834_v48 = vpop.f32.mrf.mxu1  ;;  %v3856_v28 = vadd.f32 1.0, %v2923_v35 }
 0x129   :  { %4804 = vst [vmem:[#allocation56_spill] sm:$0xff] %v3834_v48  ;;  %v692_v48 = vpop.f32.mrf.mxu3 }
 0x12a   :  { %v702_v31 = vadd.f32 %v692_v48, %v333_v33  ;;  %v3860_v43 = vpop.eup %2924  ;;  %vm731_vm6 = vweird.f32 %v3856_v28  ;;  %v737_v23 = vand.u32 2147483648, %v3856_v28 }
 0x12b   :  { %vm717_vm2 = vweird.f32 %v3860_v43 }
 0x12c   :  { %v2765_v54 = vmul.f32 -1.442695, %v702_v31  ;;  %vm3893_vm3 = vmor %vm716_vm1, %vm717_vm2 }
 0x12e   :  { %v3841_v26 = vpop.f32.mrf.mxu2 }
 0x12f   :  { %4807 = vst [vmem:[#allocation59_spill] sm:$0xff] %v3841_v26 }
 0x130   :  { %v3839_v22 = vpop.f32.mrf.mxu1 }
 0x131   :  { %4806 = vst [vmem:[#allocation58_spill] sm:$0xff] %v3839_v22  ;;  %v2764_v22 = vmul.f32 -1.442695, %v698_v21 }
 0x136   :  { %v3854_v19 = vpop.f32.mrf.mxu2 }
 0x137   :  { %4809 = vst [vmem:[#allocation61_spill] sm:$0xff] %v3854_v19  ;;  %v284_v19 = vadd.f32 %v3743_v0, %v3863_v50 }
 0x138   :  { %v662_v14 = vpop.f32.mrf.mxu1 }
 0x139   :  { %v696_v26 = vadd.f32 %v662_v14, %v233_v10 }
 0x13b   :  { %v2762_v7 = vmul.f32 -1.442695, %v696_v26  ;;  %v712_v26 = vmul.f32 %v3860_v43, %v3849_v3 }
 0x13d   :  { %2926 = vpow2.f32 %v2762_v7  ;;  %v713_v63 = vsub.f32 1.0, %v712_v26 }
 0x13e   :  { %2928 = vpow2.f32 %v2764_v22  ;;  %v676_v21 = vpop.f32.mrf.mxu2 }
 0x13f   :  { %2930 = vpow2.f32 %v2765_v54  ;;  %v282_v54 = vadd.f32 %v3731_v58, %v3863_v50 }
 0x140   :  { %v664_v55 = vpop.f32.mrf.mxu1  ;;  %2932 = vrcp.f32 %v3856_v28 }
 0x141   :  { %v700_v48 = vadd.f32 %v664_v55, %v235_v30  ;;  %v697_v14 = vadd.f32 %v676_v21, %v282_v54 }
 0x143   :  { %v2927_v59 = vpop.eup %2926  ;;  %v2763_v7 = vmul.f32 -1.442695, %v700_v48  ;;  %v714_v48 = vmul.f32 %v3860_v43, %v713_v63 }
 0x144   :  { %v2929_v22 = vpop.eup %2928  ;;  %v747_v35 = vadd.f32 1.0, %v2927_v59 }
 0x145   :  { %v2931_v33 = vpop.eup %2930  ;;  %2934 = vpow2.f32 %v2763_v7  ;;  %v3869_v10 = vadd.f32 1.0, %v2929_v22  ;;  %v720_v7 = vand.u32 2147483647, %v3849_v3  ;;  %v722_v22 = vand.u32 2147483648, %v3849_v3 }
 0x146   :  { %2936 = vrcp.f32 %v747_v35  ;;  %v3871_v31 = vpop.eup %2932  ;;  %v3873_v16 = vadd.f32 1.0, %v2931_v33  ;;  %v715_v54 = vadd.f32 %v3860_v43, %v714_v48  ;;  %v678_v63 = vpop.f32.mrf.mxu2  ;;  %v760_v24 = vand.u32 2147483648, %v747_v35 }
 0x147   :  { %2938 = vrcp.f32 %v3869_v10  ;;  %v727_v55 = vmul.f32 %v3871_v31, %v3856_v28  ;;  %vm3901_vm5 = vcmp.eq.f32.partialorder %v720_v7, 8.507059e+37  ;;  %v723_v44 = vor.u32 1.1754944e-38, %v722_v22 }
 0x148   :  { %2940 = vrcp.f32 %v3873_v16  ;;  %v701_v13 = vadd.f32 %v678_v63, %v284_v19  ;;  %vm754_vm7 = vweird.f32 %v747_v35  ;;  %v761_v39 = vor.u32 1.1754944e-38, %v760_v24 }
 0x149   :  { %2942 = vtanh.f32 %v697_v14  ;;  %v728_v33 = vsub.f32 1.0, %v727_v55  ;;  %v735_v7 = vand.u32 2147483647, %v3856_v28  ;;  %vm732_vm10 = vweird.f32 %v3871_v31 }
 0x14a   :  { %vm3927_vm11 = vmor %vm731_vm6, %vm732_vm10  ;;  %vm794_vm2 = vweird.f32 %v3869_v10 }
 0x14b   :  { %v2935_v30 = vpop.eup %2934  ;;  %vm736_vm14 = vcmp.eq.f32.partialorder %v735_v7, 8.507059e+37 }
 0x14c   :  { %v2937_v59 = vpop.eup %2936  ;;  %v3880_v58 = vadd.f32 1.0, %v2935_v30  ;;  %v2772_v30 = vld [vmem:[%s4725_s1 + $0x10] sm:$0xff] }
 0x14d   :  { %v750_v26 = vmul.f32 %v2937_v59, %v747_v35  ;;  %1050 = vperm.xlu1 %2917, %v2772_v30   ;;  %v3897_v3 = vpop.eup %2938  ;;  %vm755_vm4 = vweird.f32 %v2937_v59  ;;  %v719_v30 = vsel %vm3893_vm3, %v3860_v43, %v715_v54  ;;  %v2773_v43 = vld [vmem:[%s4725_s1 + $0x18] sm:$0xff] }
 0x14e   :  { %2944 = vrcp.f32 %v3880_v58  ;;  %v3899_v48 = vpop.eup %2940  ;;  %vm756_vm8 = vmor %vm754_vm7, %vm755_vm4  ;;  %v790_v19 = vmul.f32 %v3897_v3, %v3869_v10  ;;  %v724_v24 = vsel %vm3901_vm5, %v723_v44, %v719_v30  ;;  %vm769_vm13 = vweird.f32 %v3880_v58 }
 0x14f   :  { %v751_v21 = vsub.f32 1.0, %v750_v26  ;;  %v758_v26 = vand.u32 2147483647, %v747_v35  ;;  %v2943_v0 = vpop.eup %2942  ;;  %2946 = vtanh.f32 %v701_v13  ;;  %v805_v54 = vmul.f32 %v3899_v48, %v3873_v16 }
 0x150   :  { %v821_v14 = vmul.f32 %v2943_v0, %v724_v24  ;;  %v791_v42 = vsub.f32 1.0, %v790_v19  ;;  %v773_v13 = vand.u32 2147483647, %v3880_v58  ;;  %v738_v0 = vor.u32 1.1754944e-38, %v737_v23 }
 0x151   :  { %v752_v55 = vmul.f32 %v2937_v59, %v751_v21  ;;  %v729_v21 = vmul.f32 %v3871_v31, %v728_v33  ;;  %vm759_vm9 = vcmp.eq.f32.partialorder %v758_v26, 8.507059e+37  ;;  %v806_v30 = vsub.f32 1.0, %v805_v54 }
 0x152   :  { %v792_v19 = vmul.f32 %v3897_v3, %v791_v42  ;;  %vm774_vm0 = vcmp.eq.f32.partialorder %v773_v13, 8.507059e+37  ;;  %vm795_vm1 = vweird.f32 %v3897_v3  ;;  %vm810_vm3 = vweird.f32 %v3899_v48 }
 0x153   :  { %v753_v50 = vadd.f32 %v2937_v59, %v752_v55  ;;  %v775_v55 = vand.u32 2147483648, %v3880_v58  ;;  %v807_v23 = vmul.f32 %v3899_v48, %v806_v30  ;;  %vm796_vm4 = vmor %vm794_vm2, %vm795_vm1  ;;  %vm809_vm5 = vweird.f32 %v3873_v16 }
 0x154   :  { %v2945_v37 = vpop.eup %2944  ;;  %v813_v26 = vand.u32 2147483647, %v3873_v16  ;;  %vm811_vm6 = vmor %vm809_vm5, %vm810_vm3 }
 0x155   :  { %v757_v22 = vsel %vm756_vm8, %v2937_v59, %v753_v50  ;;  %v765_v35 = vmul.f32 %v2945_v37, %v3880_v58  ;;  %v730_v59 = vadd.f32 %v3871_v31, %v729_v21  ;;  %1055 = vperm.xlu1 %2917, %v2773_v43   ;;  %vm770_vm12 = vweird.f32 %v2945_v37  ;;  %v834_v58 = vpop.permute.xlu0 %833 }
 0x156   :  { %v762_v33 = vsel %vm759_vm9, %v761_v39, %v757_v22  ;;  %v2947_v22 = vpop.eup %2946  ;;  %vm771_vm15 = vmor %vm769_vm13, %vm770_vm12  ;;  %vm814_vm8 = vcmp.eq.f32.partialorder %v813_v26, 8.507059e+37 }
 0x157   :  { %v819_v63 = vmul.f32 0.0, %v762_v33  ;;  %v766_v50 = vsub.f32 1.0, %v765_v35  ;;  %v734_v28 = vsel %vm3927_vm11, %v3871_v31, %v730_v59  ;;  %v776_v35 = vor.u32 1.1754944e-38, %v775_v55 }
 0x158   :  { %v739_v24 = vsel %vm736_vm14, %v738_v0, %v734_v28  ;;  %v793_v31 = vadd.f32 %v3897_v3, %v792_v19  ;;  %v815_v59 = vand.u32 2147483648, %v3873_v16 }
 0x159   :  { %v3931_v39 = vadd.f32 %v821_v14, %v819_v63  ;;  %v767_v44 = vmul.f32 %v2945_v37, %v766_v50  ;;  %v822_v63 = vmul.f32 %v2947_v22, %v739_v24  ;;  %v800_v14 = vand.u32 2147483648, %v3869_v10 }
 0x15a   :  { %v808_v50 = vadd.f32 %v3899_v48, %v807_v23  ;;  %v797_v55 = vsel %vm796_vm4, %v3897_v3, %v793_v31  ;;  %v816_v0 = vor.u32 1.1754944e-38, %v815_v59  ;;  %v4819_v23 = vld [vmem:[#allocation53_spill] sm:$0xff] }
 0x15b   :  { %v768_v21 = vadd.f32 %v2945_v37, %v767_v44  ;;  %2948 = vtanh.f32 %v3931_v39  ;;  %v801_v44 = vor.u32 1.1754944e-38, %v800_v14  ;;  %v4820_v59 = vld [vmem:[#allocation57_spill] sm:$0xff] }
 0x15d   :  { %v772_v43 = vsel %vm771_vm15, %v2945_v37, %v768_v21  ;;  %v798_v37 = vand.u32 2147483647, %v3869_v10  ;;  %v812_v10 = vsel %vm811_vm6, %v3899_v48, %v808_v50  ;;  %v839_v21 = vpop.permute.xlu0 %838  ;;  %v188_v48 = vpop.f32.mrf.mxu0 }
 0x15e   :  { %v777_v33 = vsel %vm774_vm0, %v776_v35, %v772_v43  ;;  %v817_v22 = vsel %vm814_vm8, %v816_v0, %v812_v10 }
 0x15f   :  { %v820_v54 = vmul.f32 0.0, %v777_v33  ;;  %vm799_vm7 = vcmp.eq.f32.partialorder %v798_v37, 8.507059e+37  ;;  %v238_v33 = vadd.f32 %v3748_v4, %v3843_v46 }
 0x160   :  { %v802_v13 = vsel %vm799_vm7, %v801_v44, %v797_v55  ;;  %v4821_v55 = vld [vmem:[#allocation12_spill] sm:$0xff] }
 0x161   :  { %v3943_v7 = vadd.f32 %v822_v63, %v820_v54  ;;  %v2949_v42 = vpop.eup %2948  ;;  %v189_v54 = vadd.f32 %v188_v48, %v4819_v23  ;;  %v336_v26 = vadd.f32 %v4821_v55, %v4820_v59 }
 0x162   :  { %v827_v30 = vmul.f32 %v2949_v42, %v802_v13  ;;  %v4822_v42 = vld [vmem:[#allocation26_spill] sm:$0xff] }
 0x163   :  { %2950 = vtanh.f32 %v3943_v7  ;;  %v240_v44 = vadd.f32 %v4822_v42, %v3843_v46 }
 0x164   :  { %v3956_v19 = vmul.f32 %v834_v58, %v827_v30 }
 0x165   :  { %v190_v24 = vpop.f32.mrf.mxu0 }
 0x166   :  { %4817 = vst [vmem:[#allocation63_spill] sm:$0xff] %v3956_v19  ;;  %v191_v10 = vadd.f32 %v190_v24, %v4819_v23 }
 0x169   :  { %v2951_v28 = vpop.eup %2950 }
 0x16a   :  { %v828_v35 = vmul.f32 %v2951_v28, %v817_v22 }
 0x16c   :  { %v3958_v3 = vmul.f32 %v839_v21, %v828_v35  ;;  %v854_v43 = vpack.c.bf16 %v828_v35, %v827_v30 }
 0x16e   :  { %4818 = vst [vmem:[#allocation64_spill] sm:$0xff] %v3958_v3  ;;  %863 = vmatmul.bf16.vlgmr.msrb.gmra.mxu0 %v854_v43  ;;  %877 = vmatmul.bf16.vlgmr.msrb.gmra.mxu1 %v854_v43 }
 0x16f   :  { %891 = vmatmul.bf16.vlgmr.msrb.gmra.mxu2 %v854_v43  ;;  %905 = vmatmul.bf16.vlgmr.msrb.gmra.mxu3 %v854_v43 }
 0x170   :  { %1291 = vmatpush.bf16.msrb.mxu0 %v3287_v27  ;;  %1305 = vmatpush.bf16.msrb.mxu1 %v3322_v36 }
 0x171   :  { %1319 = vmatpush.bf16.msrb.mxu2 %v3336_v41  ;;  %1333 = vmatpush.bf16.msrb.mxu3 %v3488_v20 }
 0x174   :  { %1292 = vmatpush.bf16.msrb.mxu0 %v3334_v40  ;;  %1306 = vmatpush.bf16.msrb.mxu1 %v3367_v47 }
 0x175   :  { %1320 = vmatpush.bf16.msrb.mxu2 %v3380_v52  ;;  %1334 = vmatpush.bf16.msrb.mxu3 %v3510_v25 }
 0x178   :  { %1293 = vmatpush.bf16.msrb.mxu0 %v3378_v51  ;;  %1307 = vmatpush.bf16.msrb.mxu1 %v3399_v56 }
 0x179   :  { %1321 = vmatpush.bf16.msrb.mxu2 %v3412_v61  ;;  %1335 = vmatpush.bf16.msrb.mxu3 %v3521_v29 }
 0x17c   :  { %1294 = vmatpush.bf16.msrb.mxu0 %v3410_v60  ;;  %1308 = vmatpush.bf16.msrb.mxu1 %v3431_v1 }
 0x17d   :  { %1322 = vmatpush.bf16.msrb.mxu2 %v3454_v9  ;;  %1336 = vmatpush.bf16.msrb.mxu3 %v3531_v34 }
 0x180   :  { %1295 = vmatpush.bf16.msrb.mxu0 %v3442_v5  ;;  %1309 = vmatpush.bf16.msrb.mxu1 %v3503_v17 }
 0x181   :  { %1323 = vmatpush.bf16.msrb.mxu2 %v3541_v38  ;;  %1337 = vmatpush.bf16.msrb.mxu3 %v3553_v45 }
 0x184   :  { %1296 = vmatpush.bf16.msrb.mxu0 %v3452_v8  ;;  %1310 = vmatpush.bf16.msrb.mxu1 %v3564_v49 }
 0x185   :  { %1324 = vmatpush.bf16.msrb.mxu2 %v3605_v2  ;;  %1338 = vmatpush.bf16.msrb.mxu3 %v3575_v53 }
 0x188   :  { %1297 = vmatpush.bf16.msrb.mxu0 %v3465_v12  ;;  %1311 = vmatpush.bf16.msrb.mxu1 %v3620_v6 }
 0x189   :  { %1325 = vmatpush.bf16.msrb.mxu2 %v3631_v11  ;;  %1339 = vmatpush.bf16.msrb.mxu3 %v3585_v57 }
 0x18c   :  { %1298 = vmatpush.bf16.msrb.mxu0 %v3476_v15  ;;  %1312 = vmatpush.bf16.msrb.mxu1 %v3644_v18 }
 0x18d   :  { %1326 = vmatpush.bf16.msrb.mxu2 %v3668_v32  ;;  %1340 = vmatpush.bf16.msrb.mxu3 %v3595_v62 }
 0x1eb   :  { %v864_v63 = vpop.f32.mrf.mxu0  ;;  %v878_v58 = vpop.f32.mrf.mxu1 }
 0x1ec   :  { %v911_v31 = vadd.f32 %v864_v63, %v189_v54  ;;  %v912_v14 = vadd.f32 %v878_v58, %v238_v33  ;;  %v4823_v58 = vld [vmem:[#allocation15_spill] sm:$0xff] }
 0x1ee   :  { %v2766_v37 = vmul.f32 -1.442695, %v911_v31  ;;  %v2768_v50 = vmul.f32 -1.442695, %v912_v14  ;;  %v338_v31 = vadd.f32 %v4823_v58, %v4820_v59 }
 0x1f0   :  { %2952 = vpow2.f32 %v2766_v37  ;;  %v4824_v37 = vld [vmem:[#allocation62_spill] sm:$0xff] }
 0x1f1   :  { %2954 = vpow2.f32 %v2768_v50  ;;  %v4825_v50 = vld [vmem:[#allocation24_spill] sm:$0xff] }
 0x1f2   :  { %v906_v13 = vpop.f32.mrf.mxu3  ;;  %v892_v24 = vpop.f32.mrf.mxu2  ;;  %v287_v55 = vadd.f32 %v4825_v50, %v4824_v37 }
 0x1f3   :  { %v914_v4 = vadd.f32 %v906_v13, %v336_v26  ;;  %v866_v0 = vpop.f32.mrf.mxu0  ;;  %v880_v30 = vpop.f32.mrf.mxu1 }
 0x1f4   :  { %v915_v28 = vadd.f32 %v866_v0, %v191_v10  ;;  %v916_v21 = vadd.f32 %v880_v30, %v240_v44  ;;  %v913_v10 = vadd.f32 %v892_v24, %v287_v55  ;;  %v4826_v55 = vld [vmem:[#allocation27_spill] sm:$0xff] }
 0x1f5   :  { %v2770_v22 = vmul.f32 -1.442695, %v914_v4 }
 0x1f6   :  { %v2953_v35 = vpop.eup %2952  ;;  %v2767_v43 = vmul.f32 -1.442695, %v915_v28  ;;  %v2769_v54 = vmul.f32 -1.442695, %v916_v21 }
 0x1f7   :  { %v2955_v48 = vpop.eup %2954  ;;  %v925_v33 = vadd.f32 1.0, %v2953_v35  ;;  %2956 = vpow2.f32 %v2770_v22 }
 0x1f8   :  { %v963_v63 = vadd.f32 1.0, %v2955_v48  ;;  %2958 = vpow2.f32 %v2767_v43 }
 0x1f9   :  { %2960 = vrcp.f32 %v925_v33  ;;  %v936_v58 = vand.u32 2147483647, %v925_v33  ;;  %vm932_vm11 = vweird.f32 %v925_v33 }
 0x1fa   :  { %2962 = vrcp.f32 %v963_v63  ;;  %v908_v14 = vpop.f32.mrf.mxu3  ;;  %v976_v24 = vand.u32 2147483648, %v963_v63  ;;  %v894_v50 = vpop.f32.mrf.mxu2  ;;  %vm970_vm12 = vweird.f32 %v963_v63 }
 0x1fb   :  { %2964 = vpow2.f32 %v2769_v54  ;;  %v918_v26 = vadd.f32 %v908_v14, %v338_v31  ;;  %v938_v31 = vand.u32 2147483648, %v925_v33  ;;  %vm937_vm15 = vcmp.eq.f32.partialorder %v936_v58, 8.507059e+37 }
 0x1fd   :  { %v2957_v42 = vpop.eup %2956  ;;  %v2771_v30 = vmul.f32 -1.442695, %v918_v26  ;;  %v289_v26 = vadd.f32 %v4826_v55, %v4824_v37 }
 0x1fe   :  { %v2959_v44 = vpop.eup %2958  ;;  %v4006_v13 = vadd.f32 1.0, %v2957_v42 }
 0x1ff   :  { %v2961_v4 = vpop.eup %2960  ;;  %v4008_v0 = vadd.f32 1.0, %v2959_v44  ;;  %v974_v44 = vand.u32 2147483647, %v963_v63  ;;  %v917_v16 = vadd.f32 %v894_v50, %v289_v26 }
 0x200   :  { %v2963_v28 = vpop.eup %2962  ;;  %v928_v21 = vmul.f32 %v2961_v4, %v925_v33  ;;  %2966 = vrcp.f32 %v4006_v13  ;;  %vm933_vm9 = vweird.f32 %v2961_v4 }
 0x201   :  { %v2965_v22 = vpop.eup %2964  ;;  %v966_v35 = vmul.f32 %v2963_v28, %v963_v63  ;;  %2968 = vrcp.f32 %v4008_v0  ;;  %vm971_vm10 = vweird.f32 %v2963_v28  ;;  %vm934_vm13 = vmor %vm932_vm11, %vm933_vm9  ;;  %vm975_vm0 = vcmp.eq.f32.partialorder %v974_v44, 8.507059e+37 }
 0x202   :  { %v929_v43 = vsub.f32 1.0, %v928_v21  ;;  %2970 = vtanh.f32 %v913_v10  ;;  %v4012_v48 = vadd.f32 1.0, %v2965_v22  ;;  %v2780_v10 = vld [vmem:[%s4725_s1 + $0x20] sm:$0xff]  ;;  %vm972_vm14 = vmor %vm970_vm12, %vm971_vm10  ;;  %v953_v58 = vand.u32 2147483648, %v4008_v0 }
 0x203   :  { %v967_v54 = vsub.f32 1.0, %v966_v35  ;;  %2972 = vpow2.f32 %v2771_v30  ;;  %1268 = vperm.xlu2 %2918, %v2780_v10   ;;  %v939_v35 = vor.u32 1.1754944e-38, %v938_v31  ;;  %v951_v26 = vand.u32 2147483647, %v4008_v0 }
 0x204   :  { %v930_v14 = vmul.f32 %v2961_v4, %v929_v43  ;;  %2974 = vrcp.f32 %v4012_v48  ;;  %vm947_vm2 = vweird.f32 %v4008_v0  ;;  %v989_v44 = vand.u32 2147483647, %v4012_v48 }
 0x205   :  { %v968_v42 = vmul.f32 %v2963_v28, %v967_v54  ;;  %v977_v54 = vor.u32 1.1754944e-38, %v976_v24  ;;  %2976 = vtanh.f32 %v917_v16  ;;  %vm952_vm5 = vcmp.eq.f32.partialorder %v951_v26, 8.507059e+37 }
 0x206   :  { %v4020_v21 = vpop.eup %2966  ;;  %v931_v22 = vadd.f32 %v2961_v4, %v930_v14  ;;  %vm985_vm6 = vweird.f32 %v4012_v48  ;;  %vm990_vm8 = vcmp.eq.f32.partialorder %v989_v44, 8.507059e+37  ;;  %vm1010_vm10 = vweird.f32 %v4006_v13 }
 0x207   :  { %v2969_v30 = vpop.eup %2968  ;;  %v969_v43 = vadd.f32 %v2963_v28, %v968_v42  ;;  %v1006_v33 = vmul.f32 %v4020_v21, %v4006_v13  ;;  %vm1011_vm9 = vweird.f32 %v4020_v21  ;;  %v1014_v26 = vand.u32 2147483647, %v4006_v13 }
 0x208   :  { %v2971_v19 = vpop.eup %2970  ;;  %v935_v55 = vsel %vm934_vm13, %v2961_v4, %v931_v22  ;;  %v943_v3 = vmul.f32 %v2969_v30, %v4008_v0  ;;  %vm948_vm1 = vweird.f32 %v2969_v30  ;;  %vm1012_vm12 = vmor %vm1010_vm10, %vm1011_vm9 }
 0x209   :  { %v2973_v37 = vpop.eup %2972  ;;  %v940_v59 = vsel %vm937_vm15, %v939_v35, %v935_v55  ;;  %v973_v46 = vsel %vm972_vm14, %v2963_v28, %v969_v43  ;;  %v2781_v28 = vld [vmem:[%s4725_s1 + $0x28] sm:$0xff]  ;;  %vm949_vm4 = vmor %vm947_vm2, %vm948_vm1  ;;  %vm1015_vm15 = vcmp.eq.f32.partialorder %v1014_v26, 8.507059e+37 }
 0x20a   :  { %v2975_v14 = vpop.eup %2974  ;;  %v978_v63 = vsel %vm975_vm0, %v977_v54, %v973_v46  ;;  %v1037_v10 = vmul.f32 %v2971_v19, %v940_v59  ;;  %v944_v31 = vsub.f32 1.0, %v943_v3  ;;  %v4025_v42 = vadd.f32 1.0, %v2973_v37 }
 0x20b   :  { %v1035_v50 = vmul.f32 %v978_v63, %v3931_v39  ;;  %v981_v4 = vmul.f32 %v2975_v14, %v4012_v48  ;;  %v991_v39 = vand.u32 2147483648, %v4012_v48  ;;  %v1007_v59 = vsub.f32 1.0, %v1006_v33  ;;  %1273 = vperm.xlu2 %2918, %v2781_v28   ;;  %v2977_v35 = vpop.eup %2976 }
 0x20c   :  { %v945_v24 = vmul.f32 %v2969_v30, %v944_v31  ;;  %2978 = vrcp.f32 %v4025_v42  ;;  %vm986_vm3 = vweird.f32 %v2975_v14  ;;  %v954_v37 = vor.u32 1.1754944e-38, %v953_v58 }
 0x20d   :  { %v4035_v46 = vadd.f32 %v1037_v10, %v1035_v50  ;;  %v982_v19 = vsub.f32 1.0, %v981_v4  ;;  %vm987_vm7 = vmor %vm985_vm6, %vm986_vm3  ;;  %v992_v63 = vor.u32 1.1754944e-38, %v991_v39  ;;  %v1008_v0 = vmul.f32 %v4020_v21, %v1007_v59 }
 0x20e   :  { %v946_v3 = vadd.f32 %v2969_v30, %v945_v24  ;;  %v1016_v24 = vand.u32 2147483648, %v4006_v13  ;;  %vm1025_vm13 = vweird.f32 %v4025_v42 }
 0x20f   :  { %v983_v16 = vmul.f32 %v2975_v14, %v982_v19  ;;  %2980 = vtanh.f32 %v4035_v46  ;;  %v1009_v48 = vadd.f32 %v4020_v21, %v1008_v0  ;;  %v1031_v19 = vand.u32 2147483648, %v4025_v42 }
 0x210   :  { %v950_v22 = vsel %vm949_vm4, %v2969_v30, %v946_v3  ;;  %v1051_v30 = vpop.permute.xlu1 %1050  ;;  %v1029_v3 = vand.u32 2147483647, %v4025_v42 }
 0x211   :  { %v955_v43 = vsel %vm952_vm5, %v954_v37, %v950_v22  ;;  %v984_v54 = vadd.f32 %v2975_v14, %v983_v16  ;;  %v1013_v39 = vsel %vm1012_vm12, %v4020_v21, %v1009_v48  ;;  %v1017_v16 = vor.u32 1.1754944e-38, %v1016_v24 }
 0x212   :  { %v2979_v55 = vpop.eup %2978  ;;  %v1038_v10 = vmul.f32 %v2977_v35, %v955_v43  ;;  %v1032_v13 = vor.u32 1.1754944e-38, %v1031_v19  ;;  %vm1030_vm0 = vcmp.eq.f32.partialorder %v1029_v3, 8.507059e+37  ;;  %v4833_v19 = vld [vmem:[#allocation18_spill] sm:$0xff]  ;;  %v4834_v3 = vld [vmem:[#allocation8_spill] sm:$0xff] }
 0x213   :  { %v988_v33 = vsel %vm987_vm7, %v2975_v14, %v984_v54  ;;  %v1021_v31 = vmul.f32 %v2979_v55, %v4025_v42  ;;  %vm1026_vm11 = vweird.f32 %v2979_v55  ;;  %v1018_v44 = vsel %vm1015_vm15, %v1017_v16, %v1013_v39  ;;  %v4835_v16 = vld [vmem:[#allocation32_spill] sm:$0xff] }
 0x214   :  { %v993_v50 = vsel %vm990_vm8, %v992_v63, %v988_v33  ;;  %vm1027_vm14 = vmor %vm1025_vm13, %vm1026_vm11 }
 0x215   :  { %v1036_v4 = vmul.f32 %v993_v50, %v3943_v7  ;;  %v1022_v58 = vsub.f32 1.0, %v1021_v31  ;;  %v2981_v59 = vpop.eup %2980  ;;  %v4830_v31 = vld [vmem:[#allocation60_spill] sm:$0xff]  ;;  %v4831_v50 = vld [vmem:[#allocation29_spill] sm:$0xff] }
 0x216   :  { %v1043_v22 = vmul.f32 %v2981_v59, %v1018_v44  ;;  %v196_v59 = vadd.f32 %v4834_v3, %v4819_v23 }
 0x217   :  { %v4047_v28 = vadd.f32 %v1038_v10, %v1036_v4  ;;  %v1023_v14 = vmul.f32 %v2979_v55, %v1022_v58  ;;  %v243_v4 = vadd.f32 %v4831_v50, %v4830_v31 }
 0x218   :  { %v1056_v43 = vpop.permute.xlu1 %1055  ;;  %v4057_v0 = vmul.f32 %v1051_v30, %v1043_v22 }
 0x219   :  { %v1024_v7 = vadd.f32 %v2979_v55, %v1023_v14  ;;  %2982 = vtanh.f32 %v4047_v28 }
 0x21a   :  { %4827 = vst [vmem:[#allocation53_spill] sm:$0xff] %v4057_v0 }
 0x21b   :  { %v1028_v37 = vsel %vm1027_vm14, %v2979_v55, %v1024_v7  ;;  %v4829_v55 = vld [vmem:[#allocation6_spill] sm:$0xff]  ;;  %v4832_v7 = vld [vmem:[#allocation57_spill] sm:$0xff] }
 0x21c   :  { %v1033_v54 = vsel %vm1030_vm0, %v1032_v13, %v1028_v37  ;;  %v194_v10 = vadd.f32 %v4829_v55, %v4819_v23  ;;  %v341_v39 = vadd.f32 %v4833_v19, %v4832_v7  ;;  %v245_v37 = vadd.f32 %v4835_v16, %v4830_v31  ;;  %v4838_v19 = vld [vmem:[#allocation30_spill] sm:$0xff] }
 0x21f   :  { %v2983_v35 = vpop.eup %2982 }
 0x220   :  { %v1044_v63 = vmul.f32 %v2983_v35, %v1033_v54 }
 0x222   :  { %v4059_v21 = vmul.f32 %v1056_v43, %v1044_v63  ;;  %v1072_v33 = vpack.c.bf16 %v1044_v63, %v1043_v22 }
 0x224   :  { %4828 = vst [vmem:[#allocation12_spill] sm:$0xff] %v4059_v21  ;;  %1081 = vmatmul.bf16.vlgmr.msra.gmra.mxu0 %v1072_v33  ;;  %1095 = vmatmul.bf16.vlgmr.msra.gmra.mxu1 %v1072_v33 }
 0x225   :  { %1109 = vmatmul.bf16.vlgmr.msra.gmra.mxu2 %v1072_v33  ;;  %1123 = vmatmul.bf16.vlgmr.msra.gmra.mxu3 %v1072_v33 }
 0x226   :  { %1509 = vmatpush.bf16.msra.mxu0 %v3287_v27  ;;  %1523 = vmatpush.bf16.msra.mxu1 %v3322_v36 }
 0x227   :  { %1537 = vmatpush.bf16.msra.mxu2 %v3336_v41  ;;  %1551 = vmatpush.bf16.msra.mxu3 %v3488_v20 }
 0x22a   :  { %1510 = vmatpush.bf16.msra.mxu0 %v3334_v40  ;;  %1524 = vmatpush.bf16.msra.mxu1 %v3367_v47 }
 0x22b   :  { %1538 = vmatpush.bf16.msra.mxu2 %v3380_v52  ;;  %1552 = vmatpush.bf16.msra.mxu3 %v3510_v25 }
 0x22e   :  { %1511 = vmatpush.bf16.msra.mxu0 %v3378_v51  ;;  %1525 = vmatpush.bf16.msra.mxu1 %v3399_v56 }
 0x22f   :  { %1539 = vmatpush.bf16.msra.mxu2 %v3412_v61  ;;  %1553 = vmatpush.bf16.msra.mxu3 %v3521_v29 }
 0x232   :  { %1512 = vmatpush.bf16.msra.mxu0 %v3410_v60  ;;  %1526 = vmatpush.bf16.msra.mxu1 %v3431_v1 }
 0x233   :  { %1540 = vmatpush.bf16.msra.mxu2 %v3454_v9  ;;  %1554 = vmatpush.bf16.msra.mxu3 %v3531_v34 }
 0x236   :  { %1513 = vmatpush.bf16.msra.mxu0 %v3442_v5  ;;  %1527 = vmatpush.bf16.msra.mxu1 %v3503_v17 }
 0x237   :  { %1541 = vmatpush.bf16.msra.mxu2 %v3541_v38  ;;  %1555 = vmatpush.bf16.msra.mxu3 %v3553_v45 }
 0x23a   :  { %1514 = vmatpush.bf16.msra.mxu0 %v3452_v8  ;;  %1528 = vmatpush.bf16.msra.mxu1 %v3564_v49 }
 0x23b   :  { %1542 = vmatpush.bf16.msra.mxu2 %v3605_v2  ;;  %1556 = vmatpush.bf16.msra.mxu3 %v3575_v53 }
 0x23e   :  { %1515 = vmatpush.bf16.msra.mxu0 %v3465_v12  ;;  %1529 = vmatpush.bf16.msra.mxu1 %v3620_v6 }
 0x23f   :  { %1543 = vmatpush.bf16.msra.mxu2 %v3631_v11  ;;  %1557 = vmatpush.bf16.msra.mxu3 %v3585_v57 }
 0x242   :  { %1516 = vmatpush.bf16.msra.mxu0 %v3476_v15  ;;  %1530 = vmatpush.bf16.msra.mxu1 %v3644_v18 }
 0x243   :  { %1544 = vmatpush.bf16.msra.mxu2 %v3668_v32  ;;  %1558 = vmatpush.bf16.msra.mxu3 %v3595_v62 }
 0x2a1   :  { %v1082_v30 = vpop.f32.mrf.mxu0  ;;  %v1096_v58 = vpop.f32.mrf.mxu1 }
 0x2a2   :  { %v1129_v48 = vadd.f32 %v1082_v30, %v194_v10  ;;  %v1130_v24 = vadd.f32 %v1096_v58, %v243_v4  ;;  %v4836_v58 = vld [vmem:[#allocation21_spill] sm:$0xff] }
 0x2a4   :  { %v2774_v14 = vmul.f32 -1.442695, %v1129_v48  ;;  %v2776_v26 = vmul.f32 -1.442695, %v1130_v24  ;;  %v343_v48 = vadd.f32 %v4836_v58, %v4832_v7 }
 0x2a6   :  { %2984 = vpow2.f32 %v2774_v14 }
 0x2a7   :  { %2986 = vpow2.f32 %v2776_v26  ;;  %v4837_v26 = vld [vmem:[#allocation62_spill] sm:$0xff] }
 0x2a8   :  { %v1124_v44 = vpop.f32.mrf.mxu3  ;;  %v1110_v24 = vpop.f32.mrf.mxu2 }
 0x2a9   :  { %v1132_v13 = vadd.f32 %v1124_v44, %v341_v39  ;;  %v1084_v22 = vpop.f32.mrf.mxu0  ;;  %v1098_v35 = vpop.f32.mrf.mxu1  ;;  %v292_v39 = vadd.f32 %v4838_v19, %v4837_v26 }
 0x2aa   :  { %v1133_v43 = vadd.f32 %v1084_v22, %v196_v59  ;;  %v1134_v54 = vadd.f32 %v1098_v35, %v245_v37 }
 0x2ab   :  { %v2778_v63 = vmul.f32 -1.442695, %v1132_v13  ;;  %v1131_v37 = vadd.f32 %v1110_v24, %v292_v39  ;;  %v4839_v39 = vld [vmem:[#allocation33_spill] sm:$0xff] }
 0x2ac   :  { %v2985_v33 = vpop.eup %2984  ;;  %v2775_v55 = vmul.f32 -1.442695, %v1133_v43  ;;  %v2777_v4 = vmul.f32 -1.442695, %v1134_v54 }
 0x2ad   :  { %v2987_v10 = vpop.eup %2986  ;;  %v1143_v50 = vadd.f32 1.0, %v2985_v33  ;;  %2988 = vpow2.f32 %v2778_v63 }
 0x2ae   :  { %v1181_v30 = vadd.f32 1.0, %v2987_v10  ;;  %2990 = vpow2.f32 %v2775_v55 }
 0x2af   :  { %2992 = vrcp.f32 %v1143_v50  ;;  %v1154_v58 = vand.u32 2147483647, %v1143_v50  ;;  %vm1150_vm3 = vweird.f32 %v1143_v50 }
 0x2b0   :  { %2994 = vrcp.f32 %v1181_v30  ;;  %v1126_v14 = vpop.f32.mrf.mxu3  ;;  %v1194_v24 = vand.u32 2147483648, %v1181_v30  ;;  %v1112_v19 = vpop.f32.mrf.mxu2  ;;  %vm1188_vm4 = vweird.f32 %v1181_v30 }
 0x2b1   :  { %2996 = vpow2.f32 %v2777_v4  ;;  %v1136_v3 = vadd.f32 %v1126_v14, %v343_v48  ;;  %v1156_v48 = vand.u32 2147483648, %v1143_v50  ;;  %vm1155_vm7 = vcmp.eq.f32.partialorder %v1154_v58, 8.507059e+37 }
 0x2b2   :  { %v1195_v0 = vor.u32 1.1754944e-38, %v1194_v24 }
 0x2b3   :  { %v2989_v59 = vpop.eup %2988  ;;  %v2779_v35 = vmul.f32 -1.442695, %v1136_v3  ;;  %v294_v3 = vadd.f32 %v4839_v39, %v4837_v26 }
 0x2b4   :  { %v2991_v16 = vpop.eup %2990  ;;  %v4109_v44 = vadd.f32 1.0, %v2989_v59 }
 0x2b5   :  { %v2993_v13 = vpop.eup %2992  ;;  %v4111_v22 = vadd.f32 1.0, %v2991_v16  ;;  %v1192_v16 = vand.u32 2147483647, %v1181_v30  ;;  %v1135_v39 = vadd.f32 %v1112_v19, %v294_v3 }
 0x2b6   :  { %v2995_v43 = vpop.eup %2994  ;;  %v1146_v54 = vmul.f32 %v2993_v13, %v1143_v50  ;;  %2998 = vrcp.f32 %v4109_v44  ;;  %vm1151_vm1 = vweird.f32 %v2993_v13 }
 0x2b7   :  { %v2997_v63 = vpop.eup %2996  ;;  %v1184_v33 = vmul.f32 %v2995_v43, %v1181_v30  ;;  %3000 = vrcp.f32 %v4111_v22  ;;  %vm1189_vm2 = vweird.f32 %v2995_v43  ;;  %vm1152_vm5 = vmor %vm1150_vm3, %vm1151_vm1  ;;  %vm1193_vm8 = vcmp.eq.f32.partialorder %v1192_v16, 8.507059e+37 }
 0x2b8   :  { %v1147_v55 = vsub.f32 1.0, %v1146_v54  ;;  %3002 = vtanh.f32 %v1131_v37  ;;  %v4115_v10 = vadd.f32 1.0, %v2997_v63  ;;  %v2788_v37 = vld [vmem:[%s4725_s1 + $0x30] sm:$0xff]  ;;  %vm1190_vm6 = vmor %vm1188_vm4, %vm1189_vm2  ;;  %vm1165_vm10 = vweird.f32 %v4111_v22 }
 0x2b9   :  { %v1185_v4 = vsub.f32 1.0, %v1184_v33  ;;  %3004 = vpow2.f32 %v2779_v35  ;;  %v2789_v35 = vld [vmem:[%s4725_s1 + $0x38] sm:$0xff]  ;;  %1486 = vperm.xlu0 %2916, %v2788_v37   ;;  %vm1228_vm2 = vweird.f32 %v4109_v44 }
 0x2ba   :  { %v1148_v14 = vmul.f32 %v2993_v13, %v1147_v55  ;;  %3006 = vrcp.f32 %v4115_v10  ;;  %1491 = vperm.xlu1 %2917, %v2789_v35   ;;  %v1157_v55 = vor.u32 1.1754944e-38, %v1156_v48  ;;  %vm1203_vm14 = vweird.f32 %v4115_v10 }
 0x2bb   :  { %v1186_v59 = vmul.f32 %v2995_v43, %v1185_v4  ;;  %3008 = vtanh.f32 %v1135_v39 }
 0x2bc   :  { %v4126_v54 = vpop.eup %2998  ;;  %v1149_v63 = vadd.f32 %v2993_v13, %v1148_v14 }
 0x2bd   :  { %v3001_v33 = vpop.eup %3000  ;;  %v1187_v4 = vadd.f32 %v2995_v43, %v1186_v59  ;;  %v1224_v30 = vmul.f32 %v4126_v54, %v4109_v44  ;;  %vm1229_vm1 = vweird.f32 %v4126_v54 }
 0x2be   :  { %v3003_v42 = vpop.eup %3002  ;;  %v1153_v21 = vsel %vm1152_vm5, %v2993_v13, %v1149_v63  ;;  %v1161_v26 = vmul.f32 %v3001_v33, %v4111_v22  ;;  %v1171_v13 = vand.u32 2147483648, %v4111_v22  ;;  %vm1166_vm9 = vweird.f32 %v3001_v33  ;;  %vm1230_vm4 = vmor %vm1228_vm2, %vm1229_vm1 }
 0x2bf   :  { %v3005_v7 = vpop.eup %3004  ;;  %v1158_v14 = vsel %vm1155_vm7, %v1157_v55, %v1153_v21  ;;  %v1191_v50 = vsel %vm1190_vm6, %v2995_v43, %v1187_v4  ;;  %v1169_v21 = vand.u32 2147483647, %v4111_v22  ;;  %vm1167_vm12 = vmor %vm1165_vm10, %vm1166_vm9  ;;  %v1207_v63 = vand.u32 2147483647, %v4115_v10 }
 0x2c0   :  { %v3007_v37 = vpop.eup %3006  ;;  %v1196_v35 = vsel %vm1193_vm8, %v1195_v0, %v1191_v50  ;;  %v1255_v48 = vmul.f32 %v3003_v42, %v1158_v14  ;;  %v1162_v59 = vsub.f32 1.0, %v1161_v26  ;;  %v1222_v19 = vadd.f32 1.0, %v3005_v7 }
 0x2c1   :  { %v1253_v3 = vmul.f32 %v1196_v35, %v4035_v46  ;;  %v1199_v24 = vmul.f32 %v3007_v37, %v4115_v10  ;;  %v1209_v0 = vand.u32 2147483648, %v4115_v10  ;;  %v1225_v7 = vsub.f32 1.0, %v1224_v30  ;;  %v3009_v4 = vpop.eup %3008 }
 0x2c2   :  { %v1163_v58 = vmul.f32 %v3001_v33, %v1162_v59  ;;  %3010 = vrcp.f32 %v1222_v19  ;;  %vm1204_vm11 = vweird.f32 %v3007_v37  ;;  %v1172_v26 = vor.u32 1.1754944e-38, %v1171_v13  ;;  %v1269_v13 = vpop.permute.xlu2 %1268 }
 0x2c3   :  { %v4137_v43 = vadd.f32 %v1255_v48, %v1253_v3  ;;  %v1200_v16 = vsub.f32 1.0, %v1199_v24  ;;  %vm1170_vm13 = vcmp.eq.f32.partialorder %v1169_v21, 8.507059e+37  ;;  %vm1205_vm15 = vmor %vm1203_vm14, %vm1204_vm11  ;;  %v1210_v35 = vor.u32 1.1754944e-38, %v1209_v0 }
 0x2c4   :  { %v1164_v42 = vadd.f32 %v3001_v33, %v1163_v58  ;;  %v1226_v48 = vmul.f32 %v4126_v54, %v1225_v7  ;;  %vm1208_vm0 = vcmp.eq.f32.partialorder %v1207_v63, 8.507059e+37  ;;  %v1234_v21 = vand.u32 2147483648, %v4109_v44 }
 0x2c5   :  { %v1201_v46 = vmul.f32 %v3007_v37, %v1200_v16  ;;  %3012 = vtanh.f32 %v4137_v43  ;;  %v1249_v0 = vand.u32 2147483648, %v1222_v19  ;;  %vm1243_vm5 = vweird.f32 %v1222_v19 }
 0x2c6   :  { %v1168_v55 = vsel %vm1167_vm12, %v3001_v33, %v1164_v42  ;;  %v1227_v10 = vadd.f32 %v4126_v54, %v1226_v48  ;;  %v1247_v7 = vand.u32 2147483647, %v1222_v19 }
 0x2c7   :  { %v1173_v39 = vsel %vm1170_vm13, %v1172_v26, %v1168_v55  ;;  %v1202_v14 = vadd.f32 %v3007_v37, %v1201_v46  ;;  %v1235_v26 = vor.u32 1.1754944e-38, %v1234_v21 }
 0x2c8   :  { %v3011_v50 = vpop.eup %3010  ;;  %v1256_v30 = vmul.f32 %v3009_v4, %v1173_v39  ;;  %v1231_v42 = vsel %vm1230_vm4, %v4126_v54, %v1227_v10  ;;  %v1250_v4 = vor.u32 1.1754944e-38, %v1249_v0  ;;  %vm1248_vm8 = vcmp.eq.f32.partialorder %v1247_v7, 8.507059e+37  ;;  %v4845_v0 = vld [vmem:[#allocation22_spill] sm:$0xff]  ;;  %v4846_v7 = vld [vmem:[#allocation13_spill] sm:$0xff] }
 0x2c9   :  { %v1206_v22 = vsel %vm1205_vm15, %v3007_v37, %v1202_v14  ;;  %v1239_v59 = vmul.f32 %v3011_v50, %v1222_v19  ;;  %v1232_v37 = vand.u32 2147483647, %v4109_v44  ;;  %vm1244_vm3 = vweird.f32 %v3011_v50 }
 0x2ca   :  { %v1211_v3 = vsel %vm1208_vm0, %v1210_v35, %v1206_v22  ;;  %vm1245_vm6 = vmor %vm1243_vm5, %vm1244_vm3  ;;  %v1274_v14 = vpop.permute.xlu2 %1273 }
 0x2cb   :  { %v1254_v24 = vmul.f32 %v1211_v3, %v4047_v28  ;;  %v1240_v33 = vsub.f32 1.0, %v1239_v59  ;;  %v3013_v46 = vpop.eup %3012  ;;  %vm1233_vm7 = vcmp.eq.f32.partialorder %v1232_v37, 8.507059e+37  ;;  %v4843_v3 = vld [vmem:[#allocation35_spill] sm:$0xff] }
 0x2cc   :  { %v1236_v55 = vsel %vm1233_vm7, %v1235_v26, %v1231_v42  ;;  %v4847_v26 = vld [vmem:[#allocation38_spill] sm:$0xff] }
 0x2cd   :  { %v4148_v58 = vadd.f32 %v1256_v30, %v1254_v24  ;;  %v1241_v16 = vmul.f32 %v3011_v50, %v1240_v33  ;;  %v1261_v39 = vmul.f32 %v3013_v46, %v1236_v55  ;;  %v248_v24 = vadd.f32 %v4843_v3, %v4830_v31 }
 0x2ce   :  { %v201_v46 = vadd.f32 %v4846_v7, %v4819_v23 }
 0x2cf   :  { %v1242_v28 = vadd.f32 %v3011_v50, %v1241_v16  ;;  %3014 = vtanh.f32 %v4148_v58  ;;  %v4155_v22 = vmul.f32 %v1269_v13, %v1261_v39 }
 0x2d1   :  { %v1246_v63 = vsel %vm1245_vm6, %v3011_v50, %v1242_v28  ;;  %4840 = vst [vmem:[#allocation26_spill] sm:$0xff] %v4155_v22  ;;  %v4842_v50 = vld [vmem:[#allocation10_spill] sm:$0xff]  ;;  %v4844_v28 = vld [vmem:[#allocation57_spill] sm:$0xff] }
 0x2d2   :  { %v1251_v35 = vsel %vm1248_vm8, %v1250_v4, %v1246_v63  ;;  %v199_v59 = vadd.f32 %v4842_v50, %v4819_v23  ;;  %v346_v42 = vadd.f32 %v4845_v0, %v4844_v28  ;;  %v250_v63 = vadd.f32 %v4847_v26, %v4830_v31  ;;  %v4850_v0 = vld [vmem:[#allocation36_spill] sm:$0xff] }
 0x2d5   :  { %v3015_v44 = vpop.eup %3014 }
 0x2d6   :  { %v1262_v48 = vmul.f32 %v3015_v44, %v1251_v35 }
 0x2d8   :  { %v4157_v30 = vmul.f32 %v1274_v14, %v1262_v48  ;;  %v1290_v54 = vpack.c.bf16 %v1262_v48, %v1261_v39 }
 0x2da   :  { %4841 = vst [vmem:[#allocation15_spill] sm:$0xff] %v4157_v30  ;;  %1299 = vmatmul.bf16.vlgmr.msrb.gmra.mxu0 %v1290_v54  ;;  %1313 = vmatmul.bf16.vlgmr.msrb.gmra.mxu1 %v1290_v54 }
 0x2db   :  { %1327 = vmatmul.bf16.vlgmr.msrb.gmra.mxu2 %v1290_v54  ;;  %1341 = vmatmul.bf16.vlgmr.msrb.gmra.mxu3 %v1290_v54 }
 0x2dc   :  { %1727 = vmatpush.bf16.msrb.mxu0 %v3287_v27  ;;  %1741 = vmatpush.bf16.msrb.mxu1 %v3322_v36 }
 0x2dd   :  { %1755 = vmatpush.bf16.msrb.mxu2 %v3336_v41  ;;  %1769 = vmatpush.bf16.msrb.mxu3 %v3488_v20 }
 0x2e0   :  { %1728 = vmatpush.bf16.msrb.mxu0 %v3334_v40  ;;  %1742 = vmatpush.bf16.msrb.mxu1 %v3367_v47 }
 0x2e1   :  { %1756 = vmatpush.bf16.msrb.mxu2 %v3380_v52  ;;  %1770 = vmatpush.bf16.msrb.mxu3 %v3510_v25 }
 0x2e4   :  { %1729 = vmatpush.bf16.msrb.mxu0 %v3378_v51  ;;  %1743 = vmatpush.bf16.msrb.mxu1 %v3399_v56 }
 0x2e5   :  { %1757 = vmatpush.bf16.msrb.mxu2 %v3412_v61  ;;  %1771 = vmatpush.bf16.msrb.mxu3 %v3521_v29 }
 0x2e8   :  { %1730 = vmatpush.bf16.msrb.mxu0 %v3410_v60  ;;  %1744 = vmatpush.bf16.msrb.mxu1 %v3431_v1 }
 0x2e9   :  { %1758 = vmatpush.bf16.msrb.mxu2 %v3454_v9  ;;  %1772 = vmatpush.bf16.msrb.mxu3 %v3531_v34 }
 0x2ec   :  { %1731 = vmatpush.bf16.msrb.mxu0 %v3442_v5  ;;  %1745 = vmatpush.bf16.msrb.mxu1 %v3503_v17 }
 0x2ed   :  { %1759 = vmatpush.bf16.msrb.mxu2 %v3541_v38  ;;  %1773 = vmatpush.bf16.msrb.mxu3 %v3553_v45 }
 0x2f0   :  { %1732 = vmatpush.bf16.msrb.mxu0 %v3452_v8  ;;  %1746 = vmatpush.bf16.msrb.mxu1 %v3564_v49 }
 0x2f1   :  { %1760 = vmatpush.bf16.msrb.mxu2 %v3605_v2  ;;  %1774 = vmatpush.bf16.msrb.mxu3 %v3575_v53 }
 0x2f4   :  { %1733 = vmatpush.bf16.msrb.mxu0 %v3465_v12  ;;  %1747 = vmatpush.bf16.msrb.mxu1 %v3620_v6 }
 0x2f5   :  { %1761 = vmatpush.bf16.msrb.mxu2 %v3631_v11  ;;  %1775 = vmatpush.bf16.msrb.mxu3 %v3585_v57 }
 0x2f8   :  { %1734 = vmatpush.bf16.msrb.mxu0 %v3476_v15  ;;  %1748 = vmatpush.bf16.msrb.mxu1 %v3644_v18 }
 0x2f9   :  { %1762 = vmatpush.bf16.msrb.mxu2 %v3668_v32  ;;  %1776 = vmatpush.bf16.msrb.mxu3 %v3595_v62 }
 0x357   :  { %v1300_v13 = vpop.f32.mrf.mxu0  ;;  %v1314_v33 = vpop.f32.mrf.mxu1 }
 0x358   :  { %v1347_v10 = vadd.f32 %v1300_v13, %v199_v59  ;;  %v1348_v21 = vadd.f32 %v1314_v33, %v248_v24  ;;  %v4848_v33 = vld [vmem:[#allocation23_spill] sm:$0xff] }
 0x35a   :  { %v2782_v16 = vmul.f32 -1.442695, %v1347_v10  ;;  %v2784_v37 = vmul.f32 -1.442695, %v1348_v21  ;;  %v348_v10 = vadd.f32 %v4848_v33, %v4844_v28 }
 0x35c   :  { %3016 = vpow2.f32 %v2782_v16 }
 0x35d   :  { %3018 = vpow2.f32 %v2784_v37  ;;  %v4849_v37 = vld [vmem:[#allocation62_spill] sm:$0xff] }
 0x35e   :  { %v1342_v55 = vpop.f32.mrf.mxu3  ;;  %v1328_v21 = vpop.f32.mrf.mxu2 }
 0x35f   :  { %v1350_v4 = vadd.f32 %v1342_v55, %v346_v42  ;;  %v1302_v39 = vpop.f32.mrf.mxu0  ;;  %v1316_v44 = vpop.f32.mrf.mxu1  ;;  %v297_v42 = vadd.f32 %v4850_v0, %v4849_v37 }
 0x360   :  { %v1351_v14 = vadd.f32 %v1302_v39, %v201_v46  ;;  %v1352_v35 = vadd.f32 %v1316_v44, %v250_v63 }
 0x361   :  { %v2786_v48 = vmul.f32 -1.442695, %v1350_v4  ;;  %v1349_v63 = vadd.f32 %v1328_v21, %v297_v42  ;;  %v4851_v42 = vld [vmem:[#allocation39_spill] sm:$0xff] }
 0x362   :  { %v3017_v54 = vpop.eup %3016  ;;  %v2783_v50 = vmul.f32 -1.442695, %v1351_v14  ;;  %v2785_v24 = vmul.f32 -1.442695, %v1352_v35 }
 0x363   :  { %v3019_v59 = vpop.eup %3018  ;;  %v1361_v3 = vadd.f32 1.0, %v3017_v54  ;;  %3020 = vpow2.f32 %v2786_v48 }
 0x364   :  { %v1399_v13 = vadd.f32 1.0, %v3019_v59  ;;  %3022 = vpow2.f32 %v2783_v50 }
 0x365   :  { %3024 = vrcp.f32 %v1361_v3  ;;  %v1372_v33 = vand.u32 2147483647, %v1361_v3  ;;  %vm1368_vm11 = vweird.f32 %v1361_v3 }
 0x366   :  { %3026 = vrcp.f32 %v1399_v13  ;;  %v1344_v16 = vpop.f32.mrf.mxu3  ;;  %v1412_v21 = vand.u32 2147483648, %v1399_v13  ;;  %v1330_v0 = vpop.f32.mrf.mxu2  ;;  %vm1406_vm12 = vweird.f32 %v1399_v13 }
 0x367   :  { %3028 = vpow2.f32 %v2785_v24  ;;  %v1354_v7 = vadd.f32 %v1344_v16, %v348_v10  ;;  %v1374_v10 = vand.u32 2147483648, %v1361_v3  ;;  %vm1373_vm15 = vcmp.eq.f32.partialorder %v1372_v33, 8.507059e+37 }
 0x368   :  { %v1413_v22 = vor.u32 1.1754944e-38, %v1412_v21 }
 0x369   :  { %v3021_v46 = vpop.eup %3020  ;;  %v2787_v44 = vmul.f32 -1.442695, %v1354_v7  ;;  %v299_v7 = vadd.f32 %v4851_v42, %v4849_v37 }
 0x36a   :  { %v3023_v26 = vpop.eup %3022  ;;  %v4207_v55 = vadd.f32 1.0, %v3021_v46 }
 0x36b   :  { %v3025_v4 = vpop.eup %3024  ;;  %v4209_v39 = vadd.f32 1.0, %v3023_v26  ;;  %v1410_v26 = vand.u32 2147483647, %v1399_v13  ;;  %v1353_v42 = vadd.f32 %v1330_v0, %v299_v7 }
 0x36c   :  { %v3027_v14 = vpop.eup %3026  ;;  %v1364_v35 = vmul.f32 %v3025_v4, %v1361_v3  ;;  %3030 = vrcp.f32 %v4207_v55  ;;  %vm1369_vm9 = vweird.f32 %v3025_v4 }
 0x36d   :  { %v3029_v48 = vpop.eup %3028  ;;  %v1402_v54 = vmul.f32 %v3027_v14, %v1399_v13  ;;  %3032 = vrcp.f32 %v4209_v39  ;;  %vm1407_vm10 = vweird.f32 %v3027_v14  ;;  %vm1370_vm13 = vmor %vm1368_vm11, %vm1369_vm9  ;;  %vm1411_vm0 = vcmp.eq.f32.partialorder %v1410_v26, 8.507059e+37 }
 0x36e   :  { %v1365_v50 = vsub.f32 1.0, %v1364_v35  ;;  %3034 = vtanh.f32 %v1349_v63  ;;  %v4213_v59 = vadd.f32 1.0, %v3029_v48  ;;  %v2797_v63 = vld [vmem:[%s4725_s1 + $0x48] sm:$0xff]  ;;  %vm1408_vm14 = vmor %vm1406_vm12, %vm1407_vm10  ;;  %vm1383_vm2 = vweird.f32 %v4209_v39 }
 0x36f   :  { %v1403_v24 = vsub.f32 1.0, %v1402_v54  ;;  %3036 = vpow2.f32 %v2787_v44  ;;  %v2796_v44 = vld [vmem:[%s4725_s1 + $0x40] sm:$0xff]  ;;  %1709 = vperm.xlu0 %2916, %v2797_v63   ;;  %vm1446_vm10 = vweird.f32 %v4207_v55 }
 0x370   :  { %v1366_v16 = vmul.f32 %v3025_v4, %v1365_v50  ;;  %3038 = vrcp.f32 %v4213_v59  ;;  %1704 = vperm.xlu2 %2918, %v2796_v44   ;;  %v1375_v50 = vor.u32 1.1754944e-38, %v1374_v10  ;;  %vm1421_vm6 = vweird.f32 %v4213_v59 }
 0x371   :  { %v1404_v46 = vmul.f32 %v3027_v14, %v1403_v24  ;;  %3040 = vtanh.f32 %v1353_v42 }
 0x372   :  { %v4224_v35 = vpop.eup %3030  ;;  %v1367_v48 = vadd.f32 %v3025_v4, %v1366_v16 }
 0x373   :  { %v3033_v54 = vpop.eup %3032  ;;  %v1405_v24 = vadd.f32 %v3027_v14, %v1404_v46  ;;  %v1442_v13 = vmul.f32 %v4224_v35, %v4207_v55  ;;  %vm1447_vm9 = vweird.f32 %v4224_v35 }
 0x374   :  { %v3035_v19 = vpop.eup %3034  ;;  %v1371_v30 = vsel %vm1370_vm13, %v3025_v4, %v1367_v48  ;;  %v1379_v37 = vmul.f32 %v3033_v54, %v4209_v39  ;;  %v1389_v4 = vand.u32 2147483648, %v4209_v39  ;;  %vm1384_vm1 = vweird.f32 %v3033_v54  ;;  %vm1448_vm12 = vmor %vm1446_vm10, %vm1447_vm9 }
 0x375   :  { %v3037_v28 = vpop.eup %3036  ;;  %v1376_v16 = vsel %vm1373_vm15, %v1375_v50, %v1371_v30  ;;  %v1409_v3 = vsel %vm1408_vm14, %v3027_v14, %v1405_v24  ;;  %v1387_v30 = vand.u32 2147483647, %v4209_v39  ;;  %vm1385_vm4 = vmor %vm1383_vm2, %vm1384_vm1  ;;  %v1425_v48 = vand.u32 2147483647, %v4213_v59 }
 0x376   :  { %v3039_v63 = vpop.eup %3038  ;;  %v1414_v44 = vsel %vm1411_vm0, %v1413_v22, %v1409_v3  ;;  %v1473_v10 = vmul.f32 %v3035_v19, %v1376_v16  ;;  %v1380_v46 = vsub.f32 1.0, %v1379_v37  ;;  %v1440_v0 = vadd.f32 1.0, %v3037_v28 }
 0x377   :  { %v1471_v7 = vmul.f32 %v1414_v44, %v4137_v43  ;;  %v1417_v21 = vmul.f32 %v3039_v63, %v4213_v59  ;;  %v1427_v22 = vand.u32 2147483648, %v4213_v59  ;;  %v1443_v28 = vsub.f32 1.0, %v1442_v13  ;;  %v3041_v24 = vpop.eup %3040 }
 0x378   :  { %v1381_v33 = vmul.f32 %v3033_v54, %v1380_v46  ;;  %3042 = vrcp.f32 %v1440_v0  ;;  %vm1422_vm3 = vweird.f32 %v3039_v63  ;;  %v1390_v37 = vor.u32 1.1754944e-38, %v1389_v4 }
 0x379   :  { %v4235_v14 = vadd.f32 %v1473_v10, %v1471_v7  ;;  %v1418_v26 = vsub.f32 1.0, %v1417_v21  ;;  %vm1388_vm5 = vcmp.eq.f32.partialorder %v1387_v30, 8.507059e+37  ;;  %vm1423_vm7 = vmor %vm1421_vm6, %vm1422_vm3  ;;  %v1428_v44 = vor.u32 1.1754944e-38, %v1427_v22 }
 0x37a   :  { %v1382_v19 = vadd.f32 %v3033_v54, %v1381_v33  ;;  %v1444_v10 = vmul.f32 %v4224_v35, %v1443_v28  ;;  %vm1426_vm8 = vcmp.eq.f32.partialorder %v1425_v48, 8.507059e+37  ;;  %v1452_v33 = vand.u32 2147483648, %v4207_v55 }
 0x37b   :  { %v1419_v43 = vmul.f32 %v3039_v63, %v1418_v26  ;;  %3044 = vtanh.f32 %v4235_v14  ;;  %vm1461_vm13 = vweird.f32 %v1440_v0 }
 0x37c   :  { %v1386_v50 = vsel %vm1385_vm4, %v3033_v54, %v1382_v19  ;;  %v1445_v4 = vadd.f32 %v4224_v35, %v1444_v10  ;;  %v1465_v19 = vand.u32 2147483647, %v1440_v0 }
 0x37d   :  { %v1391_v42 = vsel %vm1388_vm5, %v1390_v37, %v1386_v50  ;;  %v1420_v16 = vadd.f32 %v3039_v63, %v1419_v43  ;;  %v1453_v43 = vor.u32 1.1754944e-38, %v1452_v33 }
 0x37e   :  { %v3043_v3 = vpop.eup %3042  ;;  %v1474_v13 = vmul.f32 %v3041_v24, %v1391_v42  ;;  %v1449_v22 = vsel %vm1448_vm12, %v4224_v35, %v1445_v4  ;;  %vm1466_vm0 = vcmp.eq.f32.partialorder %v1465_v19, 8.507059e+37  ;;  %v1487_v42 = vpop.permute.xlu0 %1486 }
 0x37f   :  { %v1424_v39 = vsel %vm1423_vm7, %v3039_v63, %v1420_v16  ;;  %v1457_v46 = vmul.f32 %v3043_v3, %v1440_v0  ;;  %v1450_v63 = vand.u32 2147483647, %v4207_v55  ;;  %vm1462_vm11 = vweird.f32 %v3043_v3  ;;  %v1492_v16 = vpop.permute.xlu1 %1491 }
 0x380   :  { %v1429_v7 = vsel %vm1426_vm8, %v1428_v44, %v1424_v39  ;;  %vm1463_vm14 = vmor %vm1461_vm13, %vm1462_vm11 }
 0x381   :  { %v1472_v21 = vmul.f32 %v1429_v7, %v4148_v58  ;;  %v1458_v54 = vsub.f32 1.0, %v1457_v46  ;;  %v1467_v58 = vand.u32 2147483648, %v1440_v0  ;;  %v3045_v28 = vpop.eup %3044  ;;  %vm1451_vm15 = vcmp.eq.f32.partialorder %v1450_v63, 8.507059e+37  ;;  %v4855_v7 = vld [vmem:[#allocation41_spill] sm:$0xff] }
 0x382   :  { %v1454_v48 = vsel %vm1451_vm15, %v1453_v43, %v1449_v22  ;;  %v4857_v22 = vld [vmem:[#allocation25_spill] sm:$0xff] }
 0x383   :  { %v4246_v59 = vadd.f32 %v1474_v13, %v1472_v21  ;;  %v1459_v30 = vmul.f32 %v3043_v3, %v1458_v54  ;;  %v1468_v50 = vor.u32 1.1754944e-38, %v1467_v58  ;;  %v1479_v24 = vmul.f32 %v3045_v28, %v1454_v48  ;;  %v4856_v58 = vld [vmem:[#allocation57_spill] sm:$0xff]  ;;  %v4858_v28 = vld [vmem:[#allocation19_spill] sm:$0xff] }
 0x384   :  { %v253_v21 = vadd.f32 %v4855_v7, %v4830_v31  ;;  %v351_v19 = vadd.f32 %v4857_v22, %v4856_v58  ;;  %v206_v43 = vadd.f32 %v4858_v28, %v4819_v23  ;;  %v4862_v22 = vld [vmem:[#allocation42_spill] sm:$0xff] }
 0x385   :  { %v1460_v26 = vadd.f32 %v3043_v3, %v1459_v30  ;;  %3046 = vtanh.f32 %v4246_v59  ;;  %v4253_v39 = vmul.f32 %v1487_v42, %v1479_v24 }
 0x387   :  { %v1464_v37 = vsel %vm1463_vm14, %v3043_v3, %v1460_v26  ;;  %4852 = vst [vmem:[#allocation24_spill] sm:$0xff] %v4253_v39  ;;  %v4854_v3 = vld [vmem:[#allocation16_spill] sm:$0xff] }
 0x388   :  { %v1469_v44 = vsel %vm1466_vm0, %v1468_v50, %v1464_v37  ;;  %v204_v46 = vadd.f32 %v4854_v3, %v4819_v23  ;;  %v4859_v37 = vld [vmem:[#allocation43_spill] sm:$0xff] }
 0x389   :  { %v255_v48 = vadd.f32 %v4859_v37, %v4830_v31 }
 0x38b   :  { %v3047_v55 = vpop.eup %3046 }
 0x38c   :  { %v1480_v10 = vmul.f32 %v3047_v55, %v1469_v44 }
 0x38e   :  { %v4255_v13 = vmul.f32 %v1492_v16, %v1480_v10  ;;  %v1508_v35 = vpack.c.bf16 %v1480_v10, %v1479_v24 }
 0x390   :  { %4853 = vst [vmem:[#allocation27_spill] sm:$0xff] %v4255_v13  ;;  %1517 = vmatmul.bf16.vlgmr.msra.gmra.mxu0 %v1508_v35  ;;  %1531 = vmatmul.bf16.vlgmr.msra.gmra.mxu1 %v1508_v35 }
 0x391   :  { %1545 = vmatmul.bf16.vlgmr.msra.gmra.mxu2 %v1508_v35  ;;  %1559 = vmatmul.bf16.vlgmr.msra.gmra.mxu3 %v1508_v35 }
 0x392   :  { %1945 = vmatpush.bf16.msra.mxu0 %v3287_v27  ;;  %1959 = vmatpush.bf16.msra.mxu1 %v3322_v36 }
 0x393   :  { %1973 = vmatpush.bf16.msra.mxu2 %v3336_v41  ;;  %1987 = vmatpush.bf16.msra.mxu3 %v3488_v20 }
 0x396   :  { %1946 = vmatpush.bf16.msra.mxu0 %v3334_v40  ;;  %1960 = vmatpush.bf16.msra.mxu1 %v3367_v47 }
 0x397   :  { %1974 = vmatpush.bf16.msra.mxu2 %v3380_v52  ;;  %1988 = vmatpush.bf16.msra.mxu3 %v3510_v25 }
 0x39a   :  { %1947 = vmatpush.bf16.msra.mxu0 %v3378_v51  ;;  %1961 = vmatpush.bf16.msra.mxu1 %v3399_v56 }
 0x39b   :  { %1975 = vmatpush.bf16.msra.mxu2 %v3412_v61  ;;  %1989 = vmatpush.bf16.msra.mxu3 %v3521_v29 }
 0x39e   :  { %1948 = vmatpush.bf16.msra.mxu0 %v3410_v60  ;;  %1962 = vmatpush.bf16.msra.mxu1 %v3431_v1 }
 0x39f   :  { %1976 = vmatpush.bf16.msra.mxu2 %v3454_v9  ;;  %1990 = vmatpush.bf16.msra.mxu3 %v3531_v34 }
 0x3a2   :  { %1949 = vmatpush.bf16.msra.mxu0 %v3442_v5  ;;  %1963 = vmatpush.bf16.msra.mxu1 %v3503_v17 }
 0x3a3   :  { %1977 = vmatpush.bf16.msra.mxu2 %v3541_v38  ;;  %1991 = vmatpush.bf16.msra.mxu3 %v3553_v45 }
 0x3a6   :  { %1950 = vmatpush.bf16.msra.mxu0 %v3452_v8  ;;  %1964 = vmatpush.bf16.msra.mxu1 %v3564_v49 }
 0x3a7   :  { %1978 = vmatpush.bf16.msra.mxu2 %v3605_v2  ;;  %1992 = vmatpush.bf16.msra.mxu3 %v3575_v53 }
 0x3aa   :  { %1951 = vmatpush.bf16.msra.mxu0 %v3465_v12  ;;  %1965 = vmatpush.bf16.msra.mxu1 %v3620_v6 }
 0x3ab   :  { %1979 = vmatpush.bf16.msra.mxu2 %v3631_v11  ;;  %1993 = vmatpush.bf16.msra.mxu3 %v3585_v57 }
 0x3ae   :  { %1952 = vmatpush.bf16.msra.mxu0 %v3476_v15  ;;  %1966 = vmatpush.bf16.msra.mxu1 %v3644_v18 }
 0x3af   :  { %1980 = vmatpush.bf16.msra.mxu2 %v3668_v32  ;;  %1994 = vmatpush.bf16.msra.mxu3 %v3595_v62 }
 0x40d   :  { %v1518_v54 = vpop.f32.mrf.mxu0  ;;  %v1532_v4 = vpop.f32.mrf.mxu1 }
 0x40e   :  { %v1565_v33 = vadd.f32 %v1518_v54, %v204_v46  ;;  %v1566_v30 = vadd.f32 %v1532_v4, %v253_v21  ;;  %v4860_v4 = vld [vmem:[#allocation28_spill] sm:$0xff] }
 0x410   :  { %v2790_v63 = vmul.f32 -1.442695, %v1565_v33  ;;  %v2792_v26 = vmul.f32 -1.442695, %v1566_v30  ;;  %v353_v33 = vadd.f32 %v4860_v4, %v4856_v58 }
 0x412   :  { %3048 = vpow2.f32 %v2790_v63 }
 0x413   :  { %3050 = vpow2.f32 %v2792_v26  ;;  %v4861_v26 = vld [vmem:[#allocation62_spill] sm:$0xff] }
 0x414   :  { %v1560_v50 = vpop.f32.mrf.mxu3  ;;  %v1546_v30 = vpop.f32.mrf.mxu2 }
 0x415   :  { %v1568_v24 = vadd.f32 %v1560_v50, %v351_v19  ;;  %v1520_v55 = vpop.f32.mrf.mxu0  ;;  %v1534_v42 = vpop.f32.mrf.mxu1  ;;  %v302_v19 = vadd.f32 %v4862_v22, %v4861_v26 }
 0x416   :  { %v1569_v16 = vadd.f32 %v1520_v55, %v206_v43  ;;  %v1570_v44 = vadd.f32 %v1534_v42, %v255_v48 }
 0x417   :  { %v2794_v10 = vmul.f32 -1.442695, %v1568_v24  ;;  %v1567_v48 = vadd.f32 %v1546_v30, %v302_v19  ;;  %v4863_v19 = vld [vmem:[#allocation45_spill] sm:$0xff] }
 0x418   :  { %v3049_v35 = vpop.eup %3048  ;;  %v2791_v3 = vmul.f32 -1.442695, %v1569_v16  ;;  %v2793_v21 = vmul.f32 -1.442695, %v1570_v44 }
 0x419   :  { %v3051_v46 = vpop.eup %3050  ;;  %v1579_v7 = vadd.f32 1.0, %v3049_v35  ;;  %3052 = vpow2.f32 %v2794_v10 }
 0x41a   :  { %v1617_v54 = vadd.f32 1.0, %v3051_v46  ;;  %3054 = vpow2.f32 %v2791_v3 }
 0x41b   :  { %3056 = vrcp.f32 %v1579_v7  ;;  %v1590_v4 = vand.u32 2147483647, %v1579_v7  ;;  %vm1586_vm3 = vweird.f32 %v1579_v7 }
 0x41c   :  { %3058 = vrcp.f32 %v1617_v54  ;;  %v1562_v63 = vpop.f32.mrf.mxu3  ;;  %v1630_v30 = vand.u32 2147483648, %v1617_v54  ;;  %v1548_v22 = vpop.f32.mrf.mxu2  ;;  %vm1624_vm4 = vweird.f32 %v1617_v54 }
 0x41d   :  { %3060 = vpow2.f32 %v2793_v21  ;;  %v1572_v28 = vadd.f32 %v1562_v63, %v353_v33  ;;  %v1592_v33 = vand.u32 2147483648, %v1579_v7  ;;  %vm1591_vm7 = vcmp.eq.f32.partialorder %v1590_v4, 8.507059e+37 }
 0x41e   :  { %v1631_v39 = vor.u32 1.1754944e-38, %v1630_v30 }
 0x41f   :  { %v3053_v43 = vpop.eup %3052  ;;  %v2795_v42 = vmul.f32 -1.442695, %v1572_v28  ;;  %v304_v28 = vadd.f32 %v4863_v19, %v4861_v26 }
 0x420   :  { %v3055_v37 = vpop.eup %3054  ;;  %v4305_v50 = vadd.f32 1.0, %v3053_v43 }
 0x421   :  { %v3057_v24 = vpop.eup %3056  ;;  %v4307_v55 = vadd.f32 1.0, %v3055_v37  ;;  %v1628_v37 = vand.u32 2147483647, %v1617_v54  ;;  %v1571_v19 = vadd.f32 %v1548_v22, %v304_v28 }
 0x422   :  { %v3059_v16 = vpop.eup %3058  ;;  %v1582_v44 = vmul.f32 %v3057_v24, %v1579_v7  ;;  %3062 = vrcp.f32 %v4305_v50  ;;  %vm1587_vm1 = vweird.f32 %v3057_v24 }
 0x423   :  { %v3061_v10 = vpop.eup %3060  ;;  %v1620_v35 = vmul.f32 %v3059_v16, %v1617_v54  ;;  %3064 = vrcp.f32 %v4307_v55  ;;  %vm1625_vm2 = vweird.f32 %v3059_v16  ;;  %vm1588_vm5 = vmor %vm1586_vm3, %vm1587_vm1  ;;  %vm1629_vm8 = vcmp.eq.f32.partialorder %v1628_v37, 8.507059e+37 }
 0x424   :  { %v1583_v3 = vsub.f32 1.0, %v1582_v44  ;;  %3066 = vtanh.f32 %v1567_v48  ;;  %v4311_v46 = vadd.f32 1.0, %v3061_v10  ;;  %v2804_v48 = vld [vmem:[%s4725_s1 + $0x50] sm:$0xff]  ;;  %vm1626_vm6 = vmor %vm1624_vm4, %vm1625_vm2  ;;  %vm1601_vm10 = vweird.f32 %v4307_v55 }
 0x425   :  { %v1621_v21 = vsub.f32 1.0, %v1620_v35  ;;  %3068 = vpow2.f32 %v2795_v42  ;;  %v2805_v42 = vld [vmem:[%s4725_s1 + $0x58] sm:$0xff]  ;;  %1922 = vperm.xlu1 %2917, %v2804_v48   ;;  %vm1664_vm2 = vweird.f32 %v4305_v50 }
 0x426   :  { %v1584_v63 = vmul.f32 %v3057_v24, %v1583_v3  ;;  %3070 = vrcp.f32 %v4311_v46  ;;  %1927 = vperm.xlu2 %2918, %v2805_v42   ;;  %v1593_v3 = vor.u32 1.1754944e-38, %v1592_v33  ;;  %vm1639_vm14 = vweird.f32 %v4311_v46 }
 0x427   :  { %v1622_v43 = vmul.f32 %v3059_v16, %v1621_v21  ;;  %3072 = vtanh.f32 %v1571_v19 }
 0x428   :  { %v4322_v44 = vpop.eup %3062  ;;  %v1585_v10 = vadd.f32 %v3057_v24, %v1584_v63 }
 0x429   :  { %v3065_v35 = vpop.eup %3064  ;;  %v1623_v21 = vadd.f32 %v3059_v16, %v1622_v43  ;;  %v1660_v54 = vmul.f32 %v4322_v44, %v4305_v50  ;;  %vm1665_vm1 = vweird.f32 %v4322_v44 }
 0x42a   :  { %v3067_v0 = vpop.eup %3066  ;;  %v1589_v13 = vsel %vm1588_vm5, %v3057_v24, %v1585_v10  ;;  %v1597_v26 = vmul.f32 %v3065_v35, %v4307_v55  ;;  %v1607_v24 = vand.u32 2147483648, %v4307_v55  ;;  %vm1602_vm9 = vweird.f32 %v3065_v35  ;;  %vm1666_vm4 = vmor %vm1664_vm2, %vm1665_vm1 }
 0x42b   :  { %v3069_v58 = vpop.eup %3068  ;;  %v1594_v63 = vsel %vm1591_vm7, %v1593_v3, %v1589_v13  ;;  %v1627_v7 = vsel %vm1626_vm6, %v3059_v16, %v1623_v21  ;;  %v1605_v13 = vand.u32 2147483647, %v4307_v55  ;;  %vm1603_vm12 = vmor %vm1601_vm10, %vm1602_vm9  ;;  %v1643_v10 = vand.u32 2147483647, %v4311_v46 }
 0x42c   :  { %v3071_v48 = vpop.eup %3070  ;;  %v1632_v42 = vsel %vm1629_vm8, %v1631_v39, %v1627_v7  ;;  %v1691_v33 = vmul.f32 %v3067_v0, %v1594_v63  ;;  %v1598_v43 = vsub.f32 1.0, %v1597_v26  ;;  %v1658_v22 = vadd.f32 1.0, %v3069_v58 }
 0x42d   :  { %v1689_v28 = vmul.f32 %v1632_v42, %v4235_v14  ;;  %v1635_v30 = vmul.f32 %v3071_v48, %v4311_v46  ;;  %v1645_v39 = vand.u32 2147483648, %v4311_v46  ;;  %v1661_v58 = vsub.f32 1.0, %v1660_v54  ;;  %v3073_v21 = vpop.eup %3072 }
 0x42e   :  { %v1599_v4 = vmul.f32 %v3065_v35, %v1598_v43  ;;  %3074 = vrcp.f32 %v1658_v22  ;;  %vm1640_vm11 = vweird.f32 %v3071_v48  ;;  %v1608_v26 = vor.u32 1.1754944e-38, %v1607_v24 }
 0x42f   :  { %v4333_v16 = vadd.f32 %v1691_v33, %v1689_v28  ;;  %v1636_v37 = vsub.f32 1.0, %v1635_v30  ;;  %vm1606_vm13 = vcmp.eq.f32.partialorder %v1605_v13, 8.507059e+37  ;;  %vm1641_vm15 = vmor %vm1639_vm14, %vm1640_vm11  ;;  %v1646_v42 = vor.u32 1.1754944e-38, %v1645_v39 }
 0x430   :  { %v1600_v0 = vadd.f32 %v3065_v35, %v1599_v4  ;;  %v1662_v33 = vmul.f32 %v4322_v44, %v1661_v58  ;;  %vm1644_vm0 = vcmp.eq.f32.partialorder %v1643_v10, 8.507059e+37  ;;  %v1670_v4 = vand.u32 2147483648, %v4305_v50 }
 0x431   :  { %v1637_v14 = vmul.f32 %v3071_v48, %v1636_v37  ;;  %3076 = vtanh.f32 %v4333_v16  ;;  %vm1679_vm5 = vweird.f32 %v1658_v22 }
 0x432   :  { %v1604_v3 = vsel %vm1603_vm12, %v3065_v35, %v1600_v0  ;;  %v1663_v24 = vadd.f32 %v4322_v44, %v1662_v33  ;;  %v1683_v0 = vand.u32 2147483647, %v1658_v22 }
 0x433   :  { %v1609_v19 = vsel %vm1606_vm13, %v1608_v26, %v1604_v3  ;;  %v1638_v63 = vadd.f32 %v3071_v48, %v1637_v14  ;;  %v1671_v14 = vor.u32 1.1754944e-38, %v1670_v4 }
 0x434   :  { %v3075_v7 = vpop.eup %3074  ;;  %v1692_v54 = vmul.f32 %v3073_v21, %v1609_v19  ;;  %v1667_v39 = vsel %vm1666_vm4, %v4322_v44, %v1663_v24  ;;  %vm1684_vm8 = vcmp.eq.f32.partialorder %v1683_v0, 8.507059e+37  ;;  %v1705_v19 = vpop.permute.xlu2 %1704 }
 0x435   :  { %v1642_v55 = vsel %vm1641_vm15, %v3071_v48, %v1638_v63  ;;  %v1675_v43 = vmul.f32 %v3075_v7, %v1658_v22  ;;  %v1668_v48 = vand.u32 2147483647, %v4305_v50  ;;  %vm1680_vm3 = vweird.f32 %v3075_v7  ;;  %v1710_v63 = vpop.permute.xlu0 %1709 }
 0x436   :  { %v1647_v28 = vsel %vm1644_vm0, %v1646_v42, %v1642_v55  ;;  %vm1681_vm6 = vmor %vm1679_vm5, %vm1680_vm3 }
 0x437   :  { %v1690_v30 = vmul.f32 %v1647_v28, %v4246_v59  ;;  %v1676_v35 = vsub.f32 1.0, %v1675_v43  ;;  %v1685_v59 = vand.u32 2147483648, %v1658_v22  ;;  %v3077_v58 = vpop.eup %3076  ;;  %vm1669_vm7 = vcmp.eq.f32.partialorder %v1668_v48, 8.507059e+37  ;;  %v4871_v28 = vld [vmem:[#allocation62_spill] sm:$0xff] }
 0x438   :  { %v1672_v10 = vsel %vm1669_vm7, %v1671_v14, %v1667_v39 }
 0x439   :  { %v4344_v46 = vadd.f32 %v1692_v54, %v1690_v30  ;;  %v1677_v13 = vmul.f32 %v3075_v7, %v1676_v35  ;;  %v1686_v3 = vor.u32 1.1754944e-38, %v1685_v59  ;;  %v1697_v21 = vmul.f32 %v3077_v58, %v1672_v10  ;;  %v4872_v30 = vld [vmem:[#allocation48_spill] sm:$0xff] }
 0x43a   :  { %v307_v35 = vadd.f32 %v4872_v30, %v4871_v28 }
 0x43b   :  { %v1678_v37 = vadd.f32 %v3075_v7, %v1677_v13  ;;  %3078 = vtanh.f32 %v4344_v46  ;;  %v4351_v55 = vmul.f32 %v1705_v19, %v1697_v21 }
 0x43d   :  { %v1682_v26 = vsel %vm1681_vm6, %v3075_v7, %v1678_v37 }
 0x43e   :  { %v1687_v42 = vsel %vm1684_vm8, %v1686_v3, %v1682_v26 }
 0x441   :  { %v3079_v50 = vpop.eup %3078 }
 0x442   :  { %v1698_v33 = vmul.f32 %v3079_v50, %v1687_v42 }
 0x444   :  { %v4353_v54 = vmul.f32 %v1710_v63, %v1698_v33  ;;  %v1726_v44 = vpack.c.bf16 %v1698_v33, %v1697_v21 }
 0x446   :  { %v2395_v22 = vpack.c.bf16 %v4353_v54, %v4351_v55  ;;  %1735 = vmatmul.bf16.vlgmr.msrb.gmra.mxu0 %v1726_v44  ;;  %1749 = vmatmul.bf16.vlgmr.msrb.gmra.mxu1 %v1726_v44  ;;  %v4896_v55 = vld [vmem:[#allocation44_spill] sm:$0xff] }
 0x447   :  { %1763 = vmatmul.bf16.vlgmr.msrb.gmra.mxu2 %v1726_v44  ;;  %1777 = vmatmul.bf16.vlgmr.msrb.gmra.mxu3 %v1726_v44 }
 0x448   :  { %2163 = vmatpush.bf16.msrb.mxu0 %v3287_v27  ;;  %2177 = vmatpush.bf16.msrb.mxu1 %v3322_v36  ;;  %v4864_v27 = vld [vmem:[#allocation7_spill] sm:$0xff] }
 0x449   :  { %2191 = vmatpush.bf16.msrb.mxu2 %v3336_v41  ;;  %2205 = vmatpush.bf16.msrb.mxu3 %v3488_v20  ;;  %v209_v36 = vadd.f32 %v4864_v27, %v4819_v23  ;;  %v4873_v27 = vld [vmem:[#allocation50_spill] sm:$0xff] }
 0x44c   :  { %2164 = vmatpush.bf16.msrb.mxu0 %v3334_v40  ;;  %2178 = vmatpush.bf16.msrb.mxu1 %v3367_v47  ;;  %v4865_v40 = vld [vmem:[#allocation46_spill] sm:$0xff] }
 0x44d   :  { %2192 = vmatpush.bf16.msrb.mxu2 %v3380_v52  ;;  %2206 = vmatpush.bf16.msrb.mxu3 %v3510_v25  ;;  %v258_v41 = vadd.f32 %v4865_v40, %v4830_v31 }
 0x450   :  { %2165 = vmatpush.bf16.msrb.mxu0 %v3378_v51  ;;  %2179 = vmatpush.bf16.msrb.mxu1 %v3399_v56 }
 0x451   :  { %2193 = vmatpush.bf16.msrb.mxu2 %v3412_v61  ;;  %2207 = vmatpush.bf16.msrb.mxu3 %v3521_v29 }
 0x454   :  { %2166 = vmatpush.bf16.msrb.mxu0 %v3410_v60  ;;  %2180 = vmatpush.bf16.msrb.mxu1 %v3431_v1  ;;  %v4866_v1 = vld [vmem:[#allocation57_spill] sm:$0xff] }
 0x455   :  { %2194 = vmatpush.bf16.msrb.mxu2 %v3454_v9  ;;  %2208 = vmatpush.bf16.msrb.mxu3 %v3531_v34  ;;  %v4868_v9 = vld [vmem:[#allocation9_spill] sm:$0xff]  ;;  %v366_v54 = vadd.f32 %v4896_v55, %v4866_v1 }
 0x458   :  { %2167 = vmatpush.bf16.msrb.mxu0 %v3442_v5  ;;  %2181 = vmatpush.bf16.msrb.mxu1 %v3503_v17  ;;  %v4867_v5 = vld [vmem:[#allocation31_spill] sm:$0xff] }
 0x459   :  { %2195 = vmatpush.bf16.msrb.mxu2 %v3541_v38  ;;  %2209 = vmatpush.bf16.msrb.mxu3 %v3553_v45 }
 0x45c   :  { %2168 = vmatpush.bf16.msrb.mxu0 %v3452_v8  ;;  %2182 = vmatpush.bf16.msrb.mxu1 %v3564_v49  ;;  %v356_v8 = vadd.f32 %v4867_v5, %v4866_v1 }
 0x45d   :  { %2196 = vmatpush.bf16.msrb.mxu2 %v3605_v2  ;;  %2210 = vmatpush.bf16.msrb.mxu3 %v3575_v53 }
 0x460   :  { %2169 = vmatpush.bf16.msrb.mxu0 %v3465_v12  ;;  %2183 = vmatpush.bf16.msrb.mxu1 %v3620_v6  ;;  %v211_v12 = vadd.f32 %v4868_v9, %v4819_v23 }
 0x461   :  { %2197 = vmatpush.bf16.msrb.mxu2 %v3631_v11  ;;  %2211 = vmatpush.bf16.msrb.mxu3 %v3585_v57 }
 0x464   :  { %2170 = vmatpush.bf16.msrb.mxu0 %v3476_v15  ;;  %2184 = vmatpush.bf16.msrb.mxu1 %v3644_v18  ;;  %v4869_v15 = vld [vmem:[#allocation49_spill] sm:$0xff]  ;;  %v4870_v18 = vld [vmem:[#allocation34_spill] sm:$0xff] }
 0x465   :  { %2198 = vmatpush.bf16.msrb.mxu2 %v3668_v32  ;;  %2212 = vmatpush.bf16.msrb.mxu3 %v3595_v62  ;;  %v260_v20 = vadd.f32 %v4869_v15, %v4830_v31  ;;  %v358_v32 = vadd.f32 %v4870_v18, %v4866_v1 }
 0x4c3   :  { %v1736_v47 = vpop.f32.mrf.mxu0  ;;  %v1750_v51 = vpop.f32.mrf.mxu1 }
 0x4c4   :  { %v1783_v52 = vadd.f32 %v1736_v47, %v209_v36  ;;  %v1784_v56 = vadd.f32 %v1750_v51, %v258_v41  ;;  %v309_v36 = vadd.f32 %v4873_v27, %v4871_v28  ;;  %v2812_v47 = vld [vmem:[%s4725_s1 + $0x60] sm:$0xff]  ;;  %v2813_v51 = vld [vmem:[%s4725_s1 + $0x68] sm:$0xff] }
 0x4c5   :  { %2140 = vperm.xlu0 %2916, %v2812_v47   ;;  %2145 = vperm.xlu1 %2917, %v2813_v51  }
 0x4c6   :  { %v2798_v60 = vmul.f32 -1.442695, %v1783_v52  ;;  %v2800_v61 = vmul.f32 -1.442695, %v1784_v56 }
 0x4c8   :  { %3080 = vpow2.f32 %v2798_v60 }
 0x4c9   :  { %3082 = vpow2.f32 %v2800_v61 }
 0x4ca   :  { %v1778_v17 = vpop.f32.mrf.mxu3  ;;  %v1764_v7 = vpop.f32.mrf.mxu2 }
 0x4cb   :  { %v1786_v25 = vadd.f32 %v1778_v17, %v356_v8  ;;  %v1738_v29 = vpop.f32.mrf.mxu0  ;;  %v1752_v34 = vpop.f32.mrf.mxu1  ;;  %v1785_v48 = vadd.f32 %v1764_v7, %v307_v35 }
 0x4cc   :  { %v1787_v38 = vadd.f32 %v1738_v29, %v211_v12  ;;  %v1788_v45 = vadd.f32 %v1752_v34, %v260_v20 }
 0x4cd   :  { %v2802_v49 = vmul.f32 -1.442695, %v1786_v25 }
 0x4ce   :  { %v3081_v53 = vpop.eup %3080  ;;  %v2799_v57 = vmul.f32 -1.442695, %v1787_v38  ;;  %v2801_v6 = vmul.f32 -1.442695, %v1788_v45 }
 0x4cf   :  { %v3083_v62 = vpop.eup %3082  ;;  %v1797_v2 = vadd.f32 1.0, %v3081_v53  ;;  %3084 = vpow2.f32 %v2802_v49 }
 0x4d0   :  { %v1835_v11 = vadd.f32 1.0, %v3083_v62  ;;  %3086 = vpow2.f32 %v2799_v57 }
 0x4d1   :  { %3088 = vrcp.f32 %v1797_v2  ;;  %v1808_v19 = vand.u32 2147483647, %v1797_v2  ;;  %v1810_v63 = vand.u32 2147483648, %v1797_v2  ;;  %vm1804_vm11 = vweird.f32 %v1797_v2 }
 0x4d2   :  { %3090 = vrcp.f32 %v1835_v11  ;;  %v1780_v43 = vpop.f32.mrf.mxu3  ;;  %v1848_v42 = vand.u32 2147483648, %v1835_v11  ;;  %v1766_v44 = vpop.f32.mrf.mxu2  ;;  %v1846_v41 = vand.u32 2147483647, %v1835_v11  ;;  %vm1842_vm12 = vweird.f32 %v1835_v11 }
 0x4d3   :  { %3092 = vpow2.f32 %v2801_v6  ;;  %v1790_v24 = vadd.f32 %v1780_v43, %v358_v32  ;;  %v1811_v61 = vor.u32 1.1754944e-38, %v1810_v63  ;;  %v1789_v8 = vadd.f32 %v1766_v44, %v309_v36 }
 0x4d4   :  { %v1849_v12 = vor.u32 1.1754944e-38, %v1848_v42  ;;  %vm1809_vm15 = vcmp.eq.f32.partialorder %v1808_v19, 8.507059e+37  ;;  %vm1847_vm0 = vcmp.eq.f32.partialorder %v1846_v41, 8.507059e+37 }
 0x4d5   :  { %v3085_v4 = vpop.eup %3084  ;;  %v2803_v0 = vmul.f32 -1.442695, %v1790_v24 }
 0x4d6   :  { %v3087_v13 = vpop.eup %3086  ;;  %v4403_v37 = vadd.f32 1.0, %v3085_v4 }
 0x4d7   :  { %v3089_v59 = vpop.eup %3088  ;;  %v4405_v39 = vadd.f32 1.0, %v3087_v13 }
 0x4d8   :  { %v3091_v58 = vpop.eup %3090  ;;  %v1800_v14 = vmul.f32 %v3089_v59, %v1797_v2  ;;  %3094 = vrcp.f32 %v4403_v37  ;;  %vm1805_vm9 = vweird.f32 %v3089_v59  ;;  %v1888_v44 = vand.u32 2147483648, %v4403_v37 }
 0x4d9   :  { %v3093_v26 = vpop.eup %3092  ;;  %v1838_v10 = vmul.f32 %v3091_v58, %v1835_v11  ;;  %3096 = vrcp.f32 %v4405_v39  ;;  %vm1843_vm10 = vweird.f32 %v3091_v58  ;;  %vm1806_vm13 = vmor %vm1804_vm11, %vm1805_vm9  ;;  %v1825_v6 = vand.u32 2147483648, %v4405_v39  ;;  %v2821_v11 = vld [vmem:[%s4725_s1 + $0x78] sm:$0xff] }
 0x4da   :  { %v1801_v3 = vsub.f32 1.0, %v1800_v14  ;;  %3098 = vtanh.f32 %v1785_v48  ;;  %v4409_v21 = vadd.f32 1.0, %v3093_v26  ;;  %vm1844_vm14 = vmor %vm1842_vm12, %vm1843_vm10  ;;  %v1823_v32 = vand.u32 2147483647, %v4405_v39  ;;  %2363 = vperm.xlu0 %2916, %v2821_v11  }
 0x4db   :  { %v1839_v50 = vsub.f32 1.0, %v1838_v10  ;;  %3100 = vpow2.f32 %v2803_v0  ;;  %vm1819_vm2 = vweird.f32 %v4405_v39  ;;  %v1826_v4 = vor.u32 1.1754944e-38, %v1825_v6 }
 0x4dc   :  { %v1802_v33 = vmul.f32 %v3089_v59, %v1801_v3  ;;  %3102 = vrcp.f32 %v4409_v21  ;;  %v1861_v13 = vand.u32 2147483647, %v4409_v21  ;;  %vm1824_vm5 = vcmp.eq.f32.partialorder %v1823_v32, 8.507059e+37 }
 0x4dd   :  { %v1840_v40 = vmul.f32 %v3091_v58, %v1839_v50  ;;  %3104 = vtanh.f32 %v1789_v8  ;;  %vm1857_vm6 = vweird.f32 %v4409_v21  ;;  %vm1882_vm10 = vweird.f32 %v4403_v37 }
 0x4de   :  { %v4420_v52 = vpop.eup %3094  ;;  %v1803_v56 = vadd.f32 %v3089_v59, %v1802_v33  ;;  %vm1862_vm8 = vcmp.eq.f32.partialorder %v1861_v13, 8.507059e+37  ;;  %v1886_v36 = vand.u32 2147483647, %v4403_v37 }
 0x4df   :  { %v3097_v60 = vpop.eup %3096  ;;  %v1841_v5 = vadd.f32 %v3091_v58, %v1840_v40  ;;  %v1878_v34 = vmul.f32 %v4420_v52, %v4403_v37  ;;  %vm1883_vm9 = vweird.f32 %v4420_v52 }
 0x4e0   :  { %v3099_v9 = vpop.eup %3098  ;;  %v1807_v15 = vsel %vm1806_vm13, %v3089_v59, %v1803_v56  ;;  %v1815_v20 = vmul.f32 %v3097_v60, %v4405_v39  ;;  %vm1820_vm1 = vweird.f32 %v3097_v60  ;;  %vm1884_vm12 = vmor %vm1882_vm10, %vm1883_vm9  ;;  %v1889_v56 = vor.u32 1.1754944e-38, %v1888_v44 }
 0x4e1   :  { %v3101_v17 = vpop.eup %3100  ;;  %v1812_v25 = vsel %vm1809_vm15, %v1811_v61, %v1807_v15  ;;  %v1845_v29 = vsel %vm1844_vm14, %v3091_v58, %v1841_v5  ;;  %v1879_v35 = vsub.f32 1.0, %v1878_v34  ;;  %vm1821_vm4 = vmor %vm1819_vm2, %vm1820_vm1  ;;  %vm1887_vm15 = vcmp.eq.f32.partialorder %v1886_v36, 8.507059e+37  ;;  %v4874_v34 = vld [vmem:[#allocation11_spill] sm:$0xff] }
 0x4e2   :  { %v3103_v38 = vpop.eup %3102  ;;  %v1850_v45 = vsel %vm1847_vm0, %v1849_v12, %v1845_v29  ;;  %v1909_v49 = vmul.f32 %v3099_v9, %v1812_v25  ;;  %v1816_v53 = vsub.f32 1.0, %v1815_v20  ;;  %v4427_v57 = vadd.f32 1.0, %v3101_v17  ;;  %v1923_v9 = vpop.permute.xlu1 %1922  ;;  %v2907_v36 = vld [vmem:[%s4727_s5 + $0x28] sm:$0xff] }
 0x4e3   :  { %v1907_v62 = vmul.f32 %v1850_v45, %v4333_v16  ;;  %v1853_v2 = vmul.f32 %v3103_v38, %v4409_v21  ;;  %v1863_v16 = vand.u32 2147483648, %v4409_v21  ;;  %vm1858_vm3 = vweird.f32 %v3103_v38  ;;  %v3105_v59 = vpop.eup %3104  ;;  %v1928_v12 = vpop.permute.xlu2 %1927  ;;  %v4875_v45 = vld [vmem:[#allocation51_spill] sm:$0xff] }
 0x4e4   :  { %v1817_v18 = vmul.f32 %v3097_v60, %v1816_v53  ;;  %3106 = vrcp.f32 %v4427_v57  ;;  %vm1859_vm7 = vmor %vm1857_vm6, %vm1858_vm3  ;;  %v1880_v39 = vmul.f32 %v4420_v52, %v1879_v35  ;;  %vm1897_vm13 = vweird.f32 %v4427_v57 }
 0x4e5   :  { %v4437_v7 = vadd.f32 %v1909_v49, %v1907_v62  ;;  %v1854_v43 = vsub.f32 1.0, %v1853_v2  ;;  %v1864_v26 = vor.u32 1.1754944e-38, %v1863_v16  ;;  %v1901_v47 = vand.u32 2147483647, %v4427_v57 }
 0x4e6   :  { %v1818_v30 = vadd.f32 %v3097_v60, %v1817_v18  ;;  %v1881_v21 = vadd.f32 %v4420_v52, %v1880_v39  ;;  %v263_v49 = vadd.f32 %v4875_v45, %v4830_v31  ;;  %v4876_v18 = vld [vmem:[#allocation37_spill] sm:$0xff] }
 0x4e7   :  { %v1855_v24 = vmul.f32 %v3103_v38, %v1854_v43  ;;  %3108 = vtanh.f32 %v4437_v7  ;;  %vm1902_vm0 = vcmp.eq.f32.partialorder %v1901_v47, 8.507059e+37  ;;  %v361_v32 = vadd.f32 %v4876_v18, %v4866_v1  ;;  %v4877_v43 = vld [vmem:[#allocation14_spill] sm:$0xff] }
 0x4e8   :  { %v1822_v48 = vsel %vm1821_vm4, %v3097_v60, %v1818_v30  ;;  %v1885_v41 = vsel %vm1884_vm12, %v4420_v52, %v1881_v21  ;;  %v216_v16 = vadd.f32 %v4877_v43, %v4819_v23  ;;  %v4878_v30 = vld [vmem:[#allocation54_spill] sm:$0xff]  ;;  %v2905_v43 = vld [vmem:[%s4727_s5 + $0x18] sm:$0xff] }
 0x4e9   :  { %v1827_v0 = vsel %vm1824_vm5, %v1826_v4, %v1822_v48  ;;  %v1856_v58 = vadd.f32 %v3103_v38, %v1855_v24  ;;  %v1890_v61 = vsel %vm1887_vm15, %v1889_v56, %v1885_v41  ;;  %v265_v35 = vadd.f32 %v4878_v30, %v4830_v31 }
 0x4ea   :  { %v3107_v14 = vpop.eup %3106  ;;  %v1910_v3 = vmul.f32 %v3105_v59, %v1827_v0 }
 0x4eb   :  { %v1860_v10 = vsel %vm1859_vm7, %v3103_v38, %v1856_v58  ;;  %v1893_v50 = vmul.f32 %v3107_v14, %v4427_v57  ;;  %vm1898_vm11 = vweird.f32 %v3107_v14  ;;  %v214_v38 = vadd.f32 %v4874_v34, %v4819_v23  ;;  %v2906_v34 = vld [vmem:[%s4727_s5 + $0x20] sm:$0xff] }
 0x4ec   :  { %v1865_v19 = vsel %vm1862_vm8, %v1864_v26, %v1860_v10  ;;  %vm1899_vm14 = vmor %vm1897_vm13, %vm1898_vm11 }
 0x4ed   :  { %v1908_v63 = vmul.f32 %v1865_v19, %v4344_v46  ;;  %v1894_v42 = vsub.f32 1.0, %v1893_v50  ;;  %v1903_v46 = vand.u32 2147483648, %v4427_v57  ;;  %v3109_v51 = vpop.eup %3108 }
 0x4ee   :  { %v1915_v5 = vmul.f32 %v3109_v51, %v1890_v61 }
 0x4ef   :  { %v4449_v33 = vadd.f32 %v1910_v3, %v1908_v63  ;;  %v1895_v27 = vmul.f32 %v3107_v14, %v1894_v42  ;;  %v1904_v37 = vor.u32 1.1754944e-38, %v1903_v46  ;;  %v2908_v63 = vld [vmem:[%s4727_s5 + $0x30] sm:$0xff] }
 0x4f0   :  { %v4459_v17 = vmul.f32 %v1923_v9, %v1915_v5  ;;  %v4879_v42 = vld [vmem:[#allocation40_spill] sm:$0xff] }
 0x4f1   :  { %v1896_v40 = vadd.f32 %v3107_v14, %v1895_v27  ;;  %3110 = vtanh.f32 %v4449_v33  ;;  %v363_v21 = vadd.f32 %v4879_v42, %v4866_v1 }
 0x4f3   :  { %v1900_v60 = vsel %vm1899_vm14, %v3107_v14, %v1896_v40  ;;  %v2909_v14 = vld [vmem:[%s4727_s5 + $0x38] sm:$0xff]  ;;  %v4880_v40 = vld [vmem:[#allocation52_spill] sm:$0xff] }
 0x4f4   :  { %v1905_v15 = vsel %vm1902_vm0, %v1904_v37, %v1900_v60  ;;  %v312_v46 = vadd.f32 %v4880_v40, %v4871_v28 }
 0x4f7   :  { %v3111_v8 = vpop.eup %3110 }
 0x4f8   :  { %v1916_v20 = vmul.f32 %v3111_v8, %v1905_v15 }
 0x4fa   :  { %v4461_v52 = vmul.f32 %v1928_v12, %v1916_v20  ;;  %v1944_v25 = vpack.c.bf16 %v1916_v20, %v1915_v5 }
 0x4fc   :  { %v2396_v29 = vpack.c.bf16 %v4461_v52, %v4459_v17  ;;  %1953 = vmatmul.bf16.vlgmr.msra.gmra.mxu0 %v1944_v25  ;;  %1967 = vmatmul.bf16.vlgmr.msra.gmra.mxu1 %v1944_v25  ;;  %v4898_v52 = vld [vmem:[#allocation58_spill] sm:$0xff] }
 0x4fd   :  { %1981 = vmatmul.bf16.vlgmr.msra.gmra.mxu2 %v1944_v25  ;;  %1995 = vmatmul.bf16.vlgmr.msra.gmra.mxu3 %v1944_v25 }
 0x4fe   :  { %2467 = vmatpush.bf16.msra.mxu0 %v2909_v14  ;;  %v2904_v14 = vld [vmem:[%s4727_s5 + $0x10] sm:$0xff] }
 0x502   :  { %2468 = vmatpush.bf16.msra.mxu0 %v2908_v63 }
 0x506   :  { %2469 = vmatpush.bf16.msra.mxu0 %v2907_v36 }
 0x50a   :  { %2470 = vmatpush.bf16.msra.mxu0 %v2906_v34 }
 0x50e   :  { %2471 = vmatpush.bf16.msra.mxu0 %v2905_v43 }
 0x512   :  { %2472 = vmatpush.bf16.msra.mxu0 %v2904_v14 }
 0x579   :  { %v1954_v53 = vpop.f32.mrf.mxu0  ;;  %v1968_v57 = vpop.f32.mrf.mxu1 }
 0x57a   :  { %v2001_v62 = vadd.f32 %v1954_v53, %v214_v38  ;;  %v2002_v2 = vadd.f32 %v1968_v57, %v263_v49 }
 0x57c   :  { %v2806_v6 = vmul.f32 -1.442695, %v2001_v62  ;;  %v2808_v11 = vmul.f32 -1.442695, %v2002_v2  ;;  %v2820_v2 = vld [vmem:[%s4725_s1 + $0x70] sm:$0xff] }
 0x57d   :  { %2358 = vperm.xlu2 %2918, %v2820_v2  }
 0x57e   :  { %3112 = vpow2.f32 %v2806_v6  ;;  %v4881_v6 = vld [vmem:[#allocation55_spill] sm:$0xff] }
 0x57f   :  { %3114 = vpow2.f32 %v2808_v11  ;;  %v314_v11 = vadd.f32 %v4881_v6, %v4871_v28 }
 0x580   :  { %v1996_v24 = vpop.f32.mrf.mxu3  ;;  %v1982_v44 = vpop.f32.mrf.mxu2 }
 0x581   :  { %v2004_v4 = vadd.f32 %v1996_v24, %v361_v32  ;;  %v1956_v13 = vpop.f32.mrf.mxu0  ;;  %v1970_v48 = vpop.f32.mrf.mxu1  ;;  %v2003_v56 = vadd.f32 %v1982_v44, %v312_v46 }
 0x582   :  { %v2005_v59 = vadd.f32 %v1956_v13, %v216_v16  ;;  %v2006_v0 = vadd.f32 %v1970_v48, %v265_v35 }
 0x583   :  { %v2810_v58 = vmul.f32 -1.442695, %v2004_v4 }
 0x584   :  { %v3113_v26 = vpop.eup %3112  ;;  %v2807_v39 = vmul.f32 -1.442695, %v2005_v59  ;;  %v2809_v50 = vmul.f32 -1.442695, %v2006_v0 }
 0x585   :  { %v3115_v10 = vpop.eup %3114  ;;  %v4478_v3 = vadd.f32 1.0, %v3113_v26  ;;  %3116 = vpow2.f32 %v2810_v58 }
 0x586   :  { %v4480_v19 = vadd.f32 1.0, %v3115_v10  ;;  %3118 = vpow2.f32 %v2807_v39 }
 0x587   :  { %3120 = vrcp.f32 %v4478_v3  ;;  %v2026_v45 = vand.u32 2147483647, %v4478_v3  ;;  %v2028_v49 = vand.u32 2147483648, %v4478_v3  ;;  %vm2022_vm3 = vweird.f32 %v4478_v3 }
 0x588   :  { %3122 = vrcp.f32 %v4480_v19  ;;  %v1998_v27 = vpop.f32.mrf.mxu3  ;;  %v2066_v53 = vand.u32 2147483648, %v4480_v19  ;;  %v1984_v62 = vpop.f32.mrf.mxu2  ;;  %v2064_v32 = vand.u32 2147483647, %v4480_v19  ;;  %vm2060_vm4 = vweird.f32 %v4480_v19 }
 0x589   :  { %3124 = vpow2.f32 %v2809_v50  ;;  %v2008_v41 = vadd.f32 %v1998_v27, %v363_v21  ;;  %v2029_v24 = vor.u32 1.1754944e-38, %v2028_v49  ;;  %v2007_v13 = vadd.f32 %v1984_v62, %v314_v11 }
 0x58a   :  { %v2067_v59 = vor.u32 1.1754944e-38, %v2066_v53  ;;  %vm2027_vm7 = vcmp.eq.f32.partialorder %v2026_v45, 8.507059e+37  ;;  %vm2065_vm8 = vcmp.eq.f32.partialorder %v2064_v32, 8.507059e+37 }
 0x58b   :  { %v3117_v47 = vpop.eup %3116  ;;  %v2811_v5 = vmul.f32 -1.442695, %v2008_v41  ;;  %v2903_v41 = vld [vmem:[%s4727_s5 + $0x8] sm:$0xff] }
 0x58c   :  { %v3119_v51 = vpop.eup %3118  ;;  %v4494_v60 = vadd.f32 1.0, %v3117_v47  ;;  %2473 = vmatpush.bf16.msra.mxu0 %v2903_v41  ;;  %v4889_v41 = vld [vmem:[#allocation26_spill] sm:$0xff] }
 0x58d   :  { %v3121_v61 = vpop.eup %3120  ;;  %v4496_v37 = vadd.f32 1.0, %v3119_v51 }
 0x58e   :  { %v3123_v8 = vpop.eup %3122  ;;  %v2018_v9 = vmul.f32 %v3121_v61, %v4478_v3  ;;  %3126 = vrcp.f32 %v4494_v60  ;;  %vm2023_vm1 = vweird.f32 %v3121_v61  ;;  %v2106_v32 = vand.u32 2147483648, %v4494_v60 }
 0x58f   :  { %v3125_v12 = vpop.eup %3124  ;;  %v2056_v15 = vmul.f32 %v3123_v8, %v4480_v19  ;;  %3128 = vrcp.f32 %v4496_v37  ;;  %vm2061_vm2 = vweird.f32 %v3123_v8  ;;  %vm2024_vm5 = vmor %vm2022_vm3, %vm2023_vm1  ;;  %v2043_v36 = vand.u32 2147483648, %v4496_v37 }
 0x590   :  { %v2019_v20 = vsub.f32 1.0, %v2018_v9  ;;  %3130 = vtanh.f32 %v2003_v56  ;;  %v4502_v25 = vadd.f32 1.0, %v3125_v12  ;;  %vm2062_vm6 = vmor %vm2060_vm4, %vm2061_vm2  ;;  %v2041_v46 = vand.u32 2147483647, %v4496_v37 }
 0x591   :  { %v2057_v38 = vsub.f32 1.0, %v2056_v15  ;;  %3132 = vpow2.f32 %v2811_v5  ;;  %vm2037_vm10 = vweird.f32 %v4496_v37  ;;  %v2902_v15 = vld [vmem:[%s4727_s5] sm:$0xff]  ;;  %vm2100_vm2 = vweird.f32 %v4494_v60 }
 0x592   :  { %v2020_v57 = vmul.f32 %v3121_v61, %v2019_v20  ;;  %3134 = vrcp.f32 %v4502_v25  ;;  %v2079_v9 = vand.u32 2147483647, %v4502_v25  ;;  %vm2042_vm13 = vcmp.eq.f32.partialorder %v2041_v46, 8.507059e+37  ;;  %2474 = vmatpush.bf16.msra.mxu0 %v2902_v15  ;;  %v4888_v46 = vld [vmem:[#allocation15_spill] sm:$0xff] }
 0x593   :  { %v2058_v18 = vmul.f32 %v3123_v8, %v2057_v38  ;;  %3136 = vtanh.f32 %v2007_v13  ;;  %vm2075_vm14 = vweird.f32 %v4502_v25 }
 0x594   :  { %v4520_v16 = vpop.eup %3126  ;;  %v2021_v30 = vadd.f32 %v3121_v61, %v2020_v57  ;;  %vm2080_vm0 = vcmp.eq.f32.partialorder %v2079_v9, 8.507059e+37  ;;  %v4895_v9 = vld [vmem:[#allocation56_spill] sm:$0xff] }
 0x595   :  { %v3129_v35 = vpop.eup %3128  ;;  %v2059_v4 = vadd.f32 %v3123_v8, %v2058_v18  ;;  %v2096_v3 = vmul.f32 %v4520_v16, %v4494_v60  ;;  %vm2101_vm1 = vweird.f32 %v4520_v16 }
 0x596   :  { %v3131_v48 = vpop.eup %3130  ;;  %v2025_v0 = vsel %vm2024_vm5, %v3121_v61, %v2021_v30  ;;  %v2033_v58 = vmul.f32 %v3129_v35, %v4496_v37  ;;  %vm2038_vm9 = vweird.f32 %v3129_v35  ;;  %v2104_v30 = vand.u32 2147483647, %v4494_v60  ;;  %vm2102_vm4 = vmor %vm2100_vm2, %vm2101_vm1 }
 0x597   :  { %v3133_v26 = vpop.eup %3132  ;;  %v2030_v39 = vsel %vm2027_vm7, %v2029_v24, %v2025_v0  ;;  %v2063_v10 = vsel %vm2062_vm6, %v3123_v8, %v2059_v4  ;;  %v2097_v61 = vsub.f32 1.0, %v2096_v3  ;;  %vm2039_vm12 = vmor %vm2037_vm10, %vm2038_vm9  ;;  %v2044_v8 = vor.u32 1.1754944e-38, %v2043_v36  ;;  %v4886_v36 = vld [vmem:[#allocation53_spill] sm:$0xff] }
 0x598   :  { %v3135_v50 = vpop.eup %3134  ;;  %v2068_v19 = vsel %vm2065_vm8, %v2067_v59, %v2063_v10  ;;  %v2127_v63 = vmul.f32 %v3131_v48, %v2030_v39  ;;  %v2034_v42 = vsub.f32 1.0, %v2033_v58  ;;  %v4531_v21 = vadd.f32 1.0, %v3133_v26  ;;  %v2141_v26 = vpop.permute.xlu0 %2140 }
 0x599   :  { %v2125_v44 = vmul.f32 %v2068_v19, %v4437_v7  ;;  %v2071_v27 = vmul.f32 %v3135_v50, %v4502_v25  ;;  %v2081_v7 = vand.u32 2147483648, %v4502_v25  ;;  %vm2076_vm11 = vweird.f32 %v3135_v50  ;;  %v3137_v20 = vpop.eup %3136  ;;  %v2146_v39 = vpop.permute.xlu1 %2145 }
 0x59a   :  { %v2035_v40 = vmul.f32 %v3129_v35, %v2034_v42  ;;  %3138 = vrcp.f32 %v4531_v21  ;;  %vm2077_vm15 = vmor %vm2075_vm14, %vm2076_vm11  ;;  %v2098_v49 = vmul.f32 %v4520_v16, %v2097_v61  ;;  %vm2115_vm5 = vweird.f32 %v4531_v21  ;;  %v4882_v42 = vld [vmem:[#allocation64_spill] sm:$0xff] }
 0x59b   :  { %v4541_v47 = vadd.f32 %v2127_v63, %v2125_v44  ;;  %v2072_v51 = vsub.f32 1.0, %v2071_v27  ;;  %v2082_v45 = vor.u32 1.1754944e-38, %v2081_v7  ;;  %v2119_v4 = vand.u32 2147483647, %v4531_v21  ;;  %v4885_v27 = vld [vmem:[#allocation12_spill] sm:$0xff]  ;;  %v4891_v7 = vld [vmem:[#allocation27_spill] sm:$0xff] }
 0x59c   :  { %v2036_v56 = vadd.f32 %v3129_v35, %v2035_v40  ;;  %v2099_v25 = vadd.f32 %v4520_v16, %v2098_v49  ;;  %v2107_v48 = vor.u32 1.1754944e-38, %v2106_v32  ;;  %vm2105_vm7 = vcmp.eq.f32.partialorder %v2104_v30, 8.507059e+37 }
 0x59d   :  { %v2073_v5 = vmul.f32 %v3135_v50, %v2072_v51  ;;  %3140 = vtanh.f32 %v4541_v47  ;;  %vm2120_vm8 = vcmp.eq.f32.partialorder %v2119_v4, 8.507059e+37  ;;  %v4887_v40 = vpack.c.bf16 %v4885_v27, %v4886_v36 }
 0x59e   :  { %v2040_v12 = vsel %vm2039_vm12, %v3129_v35, %v2036_v56  ;;  %v2103_v24 = vsel %vm2102_vm4, %v4520_v16, %v2099_v25  ;;  %v4890_v51 = vpack.c.bf16 %v4888_v46, %v4889_v41  ;;  %v4892_v56 = vld [vmem:[#allocation24_spill] sm:$0xff] }
 0x59f   :  { %v2045_v34 = vsel %vm2042_vm13, %v2044_v8, %v2040_v12  ;;  %v2074_v38 = vadd.f32 %v3135_v50, %v2073_v5  ;;  %v2108_v0 = vsel %vm2105_vm7, %v2107_v48, %v2103_v24  ;;  %v4893_v61 = vpack.c.bf16 %v4891_v7, %v4892_v56  ;;  %v4894_v5 = vld [vmem:[#allocation17_spill] sm:$0xff] }
 0x5a0   :  { %v3139_v37 = vpop.eup %3138  ;;  %v2128_v57 = vmul.f32 %v3137_v20, %v2045_v34  ;;  %v219_v8 = vadd.f32 %v4894_v5, %v4819_v23  ;;  %v268_v12 = vadd.f32 %v4895_v9, %v4830_v31 }
 0x5a1   :  { %v2078_v53 = vsel %vm2077_vm15, %v3135_v50, %v2074_v38  ;;  %v2111_v62 = vmul.f32 %v3139_v37, %v4531_v21  ;;  %vm2116_vm3 = vweird.f32 %v3139_v37 }
 0x5a2   :  { %v2083_v2 = vsel %vm2080_vm0, %v2082_v45, %v2078_v53  ;;  %vm2117_vm6 = vmor %vm2115_vm5, %vm2116_vm3 }
 0x5a3   :  { %v2126_v6 = vmul.f32 %v2083_v2, %v4449_v33  ;;  %v2112_v11 = vsub.f32 1.0, %v2111_v62  ;;  %v2121_v33 = vand.u32 2147483648, %v4531_v21  ;;  %v3141_v13 = vpop.eup %3140  ;;  %v4883_v21 = vld [vmem:[#allocation63_spill] sm:$0xff] }
 0x5a4   :  { %v2133_v58 = vmul.f32 %v3141_v13, %v2108_v0  ;;  %v4884_v44 = vpack.c.bf16 %v4882_v42, %v4883_v21  ;;  %v4900_v13 = vld [vmem:[#allocation47_spill] sm:$0xff]  ;;  %v4901_v42 = vld [vmem:[#allocation61_spill] sm:$0xff] }
 0x5a5   :  { %v4556_v18 = vadd.f32 %v2128_v57, %v2126_v6  ;;  %v2113_v43 = vmul.f32 %v3139_v37, %v2112_v11  ;;  %v2122_v60 = vor.u32 1.1754944e-38, %v2121_v33  ;;  %v368_v48 = vadd.f32 %v4900_v13, %v4866_v1 }
 0x5a6   :  { %v2148_v50 = vmul.f32 %v2141_v26, %v2133_v58  ;;  %v319_v21 = vadd.f32 %v4901_v42, %v4871_v28 }
 0x5a7   :  { %v2114_v35 = vadd.f32 %v3139_v37, %v2113_v43  ;;  %3142 = vtanh.f32 %v4556_v18 }
 0x5a9   :  { %v2118_v59 = vsel %vm2117_vm6, %v3139_v37, %v2114_v35 }
 0x5aa   :  { %v2123_v10 = vsel %vm2120_vm8, %v2122_v60, %v2118_v59 }
 0x5ad   :  { %v3143_v14 = vpop.eup %3142 }
 0x5ae   :  { %v2134_v3 = vmul.f32 %v3143_v14, %v2123_v10 }
 0x5b0   :  { %v2149_v16 = vmul.f32 %v2146_v39, %v2134_v3  ;;  %v2162_v19 = vpack.c.bf16 %v2134_v3, %v2133_v58 }
 0x5b2   :  { %v2397_v63 = vpack.c.bf16 %v2149_v16, %v2148_v50  ;;  %2171 = vmatmul.bf16.vlgmr.msrb.gmra.mxu0 %v2162_v19  ;;  %2185 = vmatmul.bf16.vlgmr.msrb.gmra.mxu1 %v2162_v19 }
 0x5b3   :  { %2199 = vmatmul.bf16.vlgmr.msrb.gmra.mxu2 %v2162_v19  ;;  %2213 = vmatmul.bf16.vlgmr.msrb.gmra.mxu3 %v2162_v19 }
 0x5c2   :  { %2475 = vmatmul.bf16.vlgmr.msra.gmra.mxu0 %v4884_v44 }
 0x5d2   :  { %2480 = vmatmul.bf16.gmra.mxu0 %v4887_v40 }
 0x5e2   :  { %2485 = vmatmul.bf16.gmra.mxu0 %v4890_v51 }
 0x5f2   :  { %2490 = vmatmul.bf16.gmra.mxu0 %v4893_v61 }
 0x602   :  { %2495 = vmatmul.bf16.gmra.mxu0 %v2395_v22  ;;  %v4897_v22 = vld [vmem:[#allocation20_spill] sm:$0xff] }
 0x603   :  { %v221_v17 = vadd.f32 %v4897_v22, %v4819_v23  ;;  %v4597_v23 = vld [vmem:[%s4728_s6] ss:$0 sm:$0xff] }
 0x612   :  { %2500 = vmatmul.bf16.gmra.mxu0 %v2396_v29  ;;  %v270_v29 = vadd.f32 %v4898_v52, %v4830_v31  ;;  %v4899_v31 = vld [vmem:[#allocation59_spill] sm:$0xff] }
 0x613   :  { %v317_v4 = vadd.f32 %v4899_v31, %v4871_v28 }
 0x622   :  { %2505 = vmatmul.bf16.gmra.mxu0 %v2397_v63 }
 0x62f   :  { %v2172_v15 = vpop.f32.mrf.mxu0  ;;  %v2186_v20 = vpop.f32.mrf.mxu1 }
 0x630   :  { %v2219_v34 = vadd.f32 %v2172_v15, %v219_v8  ;;  %v2220_v38 = vadd.f32 %v2186_v20, %v268_v12 }
 0x632   :  { %v2814_v37 = vmul.f32 -1.442695, %v2219_v34  ;;  %v2816_v45 = vmul.f32 -1.442695, %v2220_v38 }
 0x634   :  { %3144 = vpow2.f32 %v2814_v37 }
 0x635   :  { %3146 = vpow2.f32 %v2816_v45 }
 0x636   :  { %v2214_v49 = vpop.f32.mrf.mxu3  ;;  %v2200_v35 = vpop.f32.mrf.mxu2 }
 0x637   :  { %v2222_v53 = vadd.f32 %v2214_v49, %v366_v54  ;;  %v2174_v57 = vpop.f32.mrf.mxu0  ;;  %v2188_v62 = vpop.f32.mrf.mxu1  ;;  %v2221_v0 = vadd.f32 %v2200_v35, %v317_v4 }
 0x638   :  { %v2223_v2 = vadd.f32 %v2174_v57, %v221_v17  ;;  %v2224_v6 = vadd.f32 %v2188_v62, %v270_v29 }
 0x639   :  { %v2818_v11 = vmul.f32 -1.442695, %v2222_v53 }
 0x63a   :  { %v3145_v25 = vpop.eup %3144  ;;  %v2815_v32 = vmul.f32 -1.442695, %v2223_v2  ;;  %v2817_v33 = vmul.f32 -1.442695, %v2224_v6 }
 0x63b   :  { %v3147_v43 = vpop.eup %3146  ;;  %v2233_v30 = vadd.f32 1.0, %v3145_v25  ;;  %3148 = vpow2.f32 %v2818_v11 }
 0x63c   :  { %v2271_v24 = vadd.f32 1.0, %v3147_v43  ;;  %3150 = vpow2.f32 %v2815_v32 }
 0x63d   :  { %3152 = vrcp.f32 %v2233_v30  ;;  %v2244_v40 = vand.u32 2147483647, %v2233_v30  ;;  %v2246_v46 = vand.u32 2147483648, %v2233_v30  ;;  %vm2240_vm12 = vweird.f32 %v2233_v30 }
 0x63e   :  { %3154 = vrcp.f32 %v2271_v24  ;;  %v2216_v59 = vpop.f32.mrf.mxu3  ;;  %v2202_v27 = vpop.f32.mrf.mxu2  ;;  %v2284_v7 = vand.u32 2147483648, %v2271_v24  ;;  %v2282_v56 = vand.u32 2147483647, %v2271_v24  ;;  %vm2278_vm10 = vweird.f32 %v2271_v24 }
 0x63f   :  { %3156 = vpow2.f32 %v2817_v33  ;;  %v2476_v60 = vpop.f32.mrf.mxu0  ;;  %v2226_v58 = vadd.f32 %v2216_v59, %v368_v48  ;;  %v2225_v8 = vadd.f32 %v2202_v27, %v319_v21  ;;  %vm4620_vm13 = vcmp.eq.f32.partialorder %v2244_v40, 8.507059e+37 }
 0x640   :  { %v2477_v14 = vadd.f32 %v4597_v23, %v2476_v60  ;;  %3158 = vtanh.f32 %v2221_v0  ;;  %v2247_v34 = vor.u32 1.1754944e-38, %v2246_v46  ;;  %v2285_v45 = vor.u32 1.1754944e-38, %v2284_v7 }
 0x641   :  { %v3149_v26 = vpop.eup %3148  ;;  %v2819_v1 = vmul.f32 -1.442695, %v2226_v58  ;;  %vm2283_vm15 = vcmp.eq.f32.partialorder %v2282_v56, 8.507059e+37 }
 0x642   :  { %v3151_v39 = vpop.eup %3150  ;;  %v4604_v10 = vadd.f32 1.0, %v3149_v26  ;;  %2516 = vst [vmem:[%s4729_s7] sm:$0xff] %v2477_v14 }
 0x643   :  { %v3153_v3 = vpop.eup %3152  ;;  %v4609_v50 = vadd.f32 1.0, %v3151_v39 }
 0x644   :  { %v3155_v16 = vpop.eup %3154  ;;  %v2236_v19 = vmul.f32 %v3153_v3, %v2233_v30  ;;  %3160 = vrcp.f32 %v4604_v10  ;;  %vm2241_vm9 = vweird.f32 %v3153_v3  ;;  %v2324_v59 = vand.u32 2147483648, %v4604_v10 }
 0x645   :  { %v3157_v63 = vpop.eup %3156  ;;  %v2274_v44 = vmul.f32 %v3155_v16, %v2271_v24  ;;  %3162 = vrcp.f32 %v4609_v50  ;;  %vm2279_vm11 = vweird.f32 %v3155_v16  ;;  %vm2242_vm14 = vmor %vm2240_vm12, %vm2241_vm9  ;;  %vm2255_vm1 = vweird.f32 %v4609_v50 }
 0x646   :  { %v2237_v36 = vsub.f32 1.0, %v2236_v19  ;;  %v4615_v41 = vadd.f32 1.0, %v3157_v63  ;;  %3164 = vpow2.f32 %v2819_v1  ;;  %v3159_v28 = vpop.eup %3158  ;;  %vm2280_vm0 = vmor %vm2278_vm10, %vm2279_vm11  ;;  %v2259_v57 = vand.u32 2147483647, %v4609_v50 }
 0x647   :  { %v2275_v51 = vsub.f32 1.0, %v2274_v44  ;;  %v2478_v61 = vpop.f32.mrf.mxu0  ;;  %v2261_v30 = vand.u32 2147483648, %v4609_v50  ;;  %vm2318_vm7 = vweird.f32 %v4604_v10 }
 0x648   :  { %v2238_v5 = vmul.f32 %v3153_v3, %v2237_v36  ;;  %3166 = vrcp.f32 %v4615_v41  ;;  %v2479_v38 = vadd.f32 %v4597_v23, %v2478_v61  ;;  %v2299_v48 = vand.u32 2147483648, %v4615_v41 }
 0x649   :  { %v2276_v9 = vmul.f32 %v3155_v16, %v2275_v51  ;;  %3168 = vtanh.f32 %v2225_v8  ;;  %v2297_v60 = vand.u32 2147483647, %v4615_v41  ;;  %v2262_v26 = vor.u32 1.1754944e-38, %v2261_v30 }
 0x64a   :  { %v4618_v12 = vpop.eup %3160  ;;  %v2239_v15 = vadd.f32 %v3153_v3, %v2238_v5  ;;  %2517 = vst [vmem:[%s4729_s7 + $0x8] sm:$0xff] %v2479_v38  ;;  %vm2260_vm6 = vcmp.eq.f32.partialorder %v2259_v57, 8.507059e+37  ;;  %vm2293_vm8 = vweird.f32 %v4615_v41  ;;  %v2300_v42 = vor.u32 1.1754944e-38, %v2299_v48 }
 0x64b   :  { %v3163_v37 = vpop.eup %3162  ;;  %v2277_v55 = vadd.f32 %v3155_v16, %v2276_v9  ;;  %v2314_v54 = vmul.f32 %v4618_v12, %v4604_v10  ;;  %vm2319_vm3 = vweird.f32 %v4618_v12  ;;  %vm2298_vm11 = vcmp.eq.f32.partialorder %v2297_v60, 8.507059e+37 }
 0x64c   :  { %v2243_v22 = vsel %vm2242_vm14, %v3153_v3, %v2239_v15  ;;  %v2251_v17 = vmul.f32 %v3163_v37, %v4609_v50  ;;  %v3165_v52 = vpop.eup %3164  ;;  %vm2256_vm2 = vweird.f32 %v3163_v37  ;;  %v2322_v3 = vand.u32 2147483647, %v4604_v10  ;;  %vm4658_vm9 = vmor %vm2318_vm7, %vm2319_vm3 }
 0x64d   :  { %v2248_v29 = vsel %vm4620_vm13, %v2247_v34, %v2243_v22  ;;  %v2281_v49 = vsel %vm2280_vm0, %v3155_v16, %v2277_v55  ;;  %v2315_v53 = vsub.f32 1.0, %v2314_v54  ;;  %v4636_v25 = vadd.f32 1.0, %v3165_v52  ;;  %vm2257_vm5 = vmor %vm2255_vm1, %vm2256_vm2  ;;  %v2364_v55 = vpop.permute.xlu0 %2363  ;;  %v2359_v54 = vpop.permute.xlu2 %2358 }
 0x64e   :  { %v3167_v62 = vpop.eup %3166  ;;  %v2286_v2 = vsel %vm2283_vm15, %v2285_v45, %v2281_v49  ;;  %v2345_v6 = vmul.f32 %v3159_v28, %v2248_v29  ;;  %v2252_v11 = vsub.f32 1.0, %v2251_v17  ;;  %v2325_v36 = vor.u32 1.1754944e-38, %v2324_v59 }
 0x64f   :  { %v2343_v32 = vmul.f32 %v2286_v2, %v4541_v47  ;;  %v2289_v43 = vmul.f32 %v3167_v62, %v4615_v41  ;;  %v2481_v35 = vpop.f32.mrf.mxu0  ;;  %v2316_v33 = vmul.f32 %v4618_v12, %v2315_v53  ;;  %3170 = vrcp.f32 %v4636_v25  ;;  %v3169_v47 = vpop.eup %3168 }
 0x650   :  { %v2253_v24 = vmul.f32 %v3163_v37, %v2252_v11  ;;  %v2482_v31 = vadd.f32 %v4597_v23, %v2481_v35  ;;  %vm2294_vm4 = vweird.f32 %v3167_v62  ;;  %vm2323_vm12 = vcmp.eq.f32.partialorder %v2322_v3, 8.507059e+37 }
 0x651   :  { %v2347_v4 = vadd.f32 %v2345_v6, %v2343_v32  ;;  %v2290_v13 = vsub.f32 1.0, %v2289_v43  ;;  %v2317_v58 = vadd.f32 %v4618_v12, %v2316_v33  ;;  %vm2295_vm10 = vmor %vm2293_vm8, %vm2294_vm4  ;;  %v2339_v9 = vand.u32 2147483648, %v4636_v25 }
 0x652   :  { %v2254_v0 = vadd.f32 %v3163_v37, %v2253_v24  ;;  %2518 = vst [vmem:[%s4729_s7 + $0x10] sm:$0xff] %v2482_v31  ;;  %vm2333_vm14 = vweird.f32 %v4636_v25 }
 0x653   :  { %3172 = vtanh.f32 %v2347_v4  ;;  %v2291_v14 = vmul.f32 %v3167_v62, %v2290_v13  ;;  %v2321_v50 = vsel %vm4658_vm9, %v4618_v12, %v2317_v58  ;;  %v2337_v12 = vand.u32 2147483647, %v4636_v25 }
 0x654   :  { %v2258_v39 = vsel %vm2257_vm5, %v3163_v37, %v2254_v0  ;;  %v2326_v56 = vsel %vm2323_vm12, %v2325_v36, %v2321_v50  ;;  %v2340_v34 = vor.u32 1.1754944e-38, %v2339_v9 }
 0x655   :  { %v2263_v1 = vsel %vm2260_vm6, %v2262_v26, %v2258_v39  ;;  %v2292_v16 = vadd.f32 %v3167_v62, %v2291_v14  ;;  %v3171_v63 = vpop.eup %3170  ;;  %vm2338_vm0 = vcmp.eq.f32.partialorder %v2337_v12, 8.507059e+37 }
 0x656   :  { %v2346_v44 = vmul.f32 %v3169_v47, %v2263_v1  ;;  %v2329_v10 = vmul.f32 %v3171_v63, %v4636_v25  ;;  %vm2334_vm13 = vweird.f32 %v3171_v63 }
 0x657   :  { %v2296_v21 = vsel %vm2295_vm10, %v3167_v62, %v2292_v16  ;;  %v2483_v27 = vpop.f32.mrf.mxu0  ;;  %vm2335_vm15 = vmor %vm2333_vm14, %vm2334_vm13 }
 0x658   :  { %v2301_v40 = vsel %vm2298_vm11, %v2300_v42, %v2296_v21  ;;  %v2484_v46 = vadd.f32 %v4597_v23, %v2483_v27  ;;  %v2330_v7 = vsub.f32 1.0, %v2329_v10 }
 0x659   :  { %v3173_v41 = vpop.eup %3172  ;;  %v2344_v51 = vmul.f32 %v2301_v40, %v4556_v18 }
 0x65a   :  { %2519 = vst [vmem:[%s4729_s7 + $0x18] sm:$0xff] %v2484_v46  ;;  %v2351_v61 = vmul.f32 %v3173_v41, %v2326_v56  ;;  %v2331_v8 = vmul.f32 %v3171_v63, %v2330_v7 }
 0x65b   :  { %v2348_v5 = vadd.f32 %v2346_v44, %v2344_v51 }
 0x65c   :  { %v2332_v28 = vadd.f32 %v3171_v63, %v2331_v8  ;;  %v2366_v22 = vmul.f32 %v2359_v54, %v2351_v61 }
 0x65d   :  { %3174 = vtanh.f32 %v2348_v5 }
 0x65e   :  { %v2336_v20 = vsel %vm2335_vm15, %v3171_v63, %v2332_v28 }
 0x65f   :  { %v2486_v15 = vpop.f32.mrf.mxu0  ;;  %v2341_v37 = vsel %vm2338_vm0, %v2340_v34, %v2336_v20 }
 0x660   :  { %v2487_v18 = vadd.f32 %v4597_v23, %v2486_v15 }
 0x662   :  { %2520 = vst [vmem:[%s4729_s7 + $0x20] sm:$0xff] %v2487_v18 }
 0x663   :  { %v3175_v38 = vpop.eup %3174 }
 0x664   :  { %v2352_v45 = vmul.f32 %v3175_v38, %v2341_v37 }
 0x666   :  { %v2367_v17 = vmul.f32 %v2364_v55, %v2352_v45 }
 0x667   :  { %v2488_v52 = vpop.f32.mrf.mxu0 }
 0x668   :  { %v2489_v29 = vadd.f32 %v4597_v23, %v2488_v52  ;;  %v2398_v49 = vpack.c.bf16 %v2367_v17, %v2366_v22 }
 0x66a   :  { %2521 = vst [vmem:[%s4729_s7 + $0x28] sm:$0xff] %v2489_v29  ;;  %2510 = vmatmul.bf16.gmra.mxu0 %v2398_v49 }
 0x66f   :  { %v2491_v53 = vpop.f32.mrf.mxu0 }
 0x670   :  { %v2492_v57 = vadd.f32 %v4597_v23, %v2491_v53 }
 0x672   :  { %2522 = vst [vmem:[%s4729_s7 + $0x30] sm:$0xff] %v2492_v57 }
 0x677   :  { %v2493_v62 = vpop.f32.mrf.mxu0 }
 0x678   :  { %v2494_v2 = vadd.f32 %v4597_v23, %v2493_v62 }
 0x67a   :  { %2523 = vst [vmem:[%s4729_s7 + $0x38] sm:$0xff] %v2494_v2 }
 0x67f   :  { %v2496_v6 = vpop.f32.mrf.mxu0 }
 0x680   :  { %v2497_v11 = vadd.f32 %v4597_v23, %v2496_v6 }
 0x682   :  { %2524 = vst [vmem:[%s4729_s7 + $0x40] sm:$0xff] %v2497_v11 }
 0x687   :  { %v2498_v25 = vpop.f32.mrf.mxu0 }
 0x688   :  { %v2499_v32 = vadd.f32 %v4597_v23, %v2498_v25 }
 0x68a   :  { %2525 = vst [vmem:[%s4729_s7 + $0x48] sm:$0xff] %v2499_v32 }
 0x68f   :  { %v2501_v43 = vpop.f32.mrf.mxu0 }
 0x690   :  { %v2502_v30 = vadd.f32 %v4597_v23, %v2501_v43 }
 0x692   :  { %2526 = vst [vmem:[%s4729_s7 + $0x50] sm:$0xff] %v2502_v30 }
 0x697   :  { %v2503_v35 = vpop.f32.mrf.mxu0 }
 0x698   :  { %v2504_v33 = vadd.f32 %v4597_v23, %v2503_v35 }
 0x69a   :  { %2527 = vst [vmem:[%s4729_s7 + $0x58] sm:$0xff] %v2504_v33 }
 0x69f   :  { %v2506_v24 = vpop.f32.mrf.mxu0 }
 0x6a0   :  { %v2507_v31 = vadd.f32 %v4597_v23, %v2506_v24 }
 0x6a2   :  { %2528 = vst [vmem:[%s4729_s7 + $0x60] sm:$0xff] %v2507_v31 }
 0x6a7   :  { %v2508_v4 = vpop.f32.mrf.mxu0 }
 0x6a8   :  { %v2509_v13 = vadd.f32 %v4597_v23, %v2508_v4 }
 0x6aa   :  { %2529 = vst [vmem:[%s4729_s7 + $0x68] sm:$0xff] %v2509_v13 }
 0x6e7   :  { %v2511_v48 = vpop.f32.mrf.mxu0 }
 0x6e8   :  { %v2512_v59 = vadd.f32 %v4597_v23, %v2511_v48 }
 0x6ea   :  { %2530 = vst [vmem:[%s4729_s7 + $0x70] sm:$0xff] %v2512_v59 }
 0x6ef   :  { %v2513_v47 = vpop.f32.mrf.mxu0 }
 0x6f0   :  { %v2514_v0 = vadd.f32 %v4597_v23, %v2513_v47 }
 0x6f2   :  { %2531 = vst [vmem:[%s4729_s7 + $0x78] sm:$0xff] %v2514_v0 }

</bundles_post_ra>
